<compile_context>
chip_gen: v6e
topology: v6e:2x2x1
jax: 0.10.0
libtpu: 0.0.40
codegen_flags: <defaults>
</compile_context>

<pallas_src>
import functools

import jax
import jax.numpy as jnp
import numpy as np
from jax import lax
from jax.experimental import pallas as pl
from jax.experimental.pallas import tpu as pltpu

_SUB = 8  # mid-samples per vectorised sublane chunk


def _ray_march_kernel(col_ref, dens_ref, dep_ref, misc_ref, w_ref, *,
                      density_bias, white_back, use_inf_depth, lane_chunk):
    f32 = jnp.float32
    S = dep_ref.shape[0]            # samples per ray
    C = col_ref.shape[1]            # colour channels
    TN = dep_ref.shape[1]           # rays in this tile (lane axis)
    n_mid = w_ref.shape[0]          # composited samples per ray
    n_reg = S - 1                   # regular (averaged) midpoints
    n_full = n_reg // _SUB          # full 8-midpoint chunks
    t0 = n_full * _SUB              # first tail midpoint
    assert TN % lane_chunk == 0

    ones = {sh: jnp.ones((sh, lane_chunk), f32) for sh in (1, 2, 4)}
    inf_delta = jnp.full((1, lane_chunk), 1e10, f32)

    for l0 in range(0, TN, lane_chunk):
        lanes = pl.ds(l0, lane_chunk)

        def chunk_body(c, carry):
            trans, rgb_acc, depth_acc8, w_acc8, w_prev = carry
            s0 = pl.multiple_of(c * _SUB, _SUB)
            s_nxt = pl.multiple_of(c * _SUB + _SUB, _SUB)

            dep_lo = dep_ref[pl.ds(s0, _SUB), lanes].astype(f32)
            dens_lo = dens_ref[pl.ds(s0, _SUB), lanes].astype(f32)
            dep_nxt = dep_ref[pl.ds(s_nxt, 1), lanes].astype(f32)
            dens_nxt = dens_ref[pl.ds(s_nxt, 1), lanes].astype(f32)
            # rows [s0+1, s0+9) built from the aligned chunk + one extra row
            # (avoids an unaligned dynamic sublane load).
            dep_hi = jnp.concatenate([dep_lo[1:], dep_nxt], axis=0)
            dens_hi = jnp.concatenate([dens_lo[1:], dens_nxt], axis=0)

            delta = dep_hi - dep_lo
            dep_mid = (dep_lo + dep_hi) * 0.5
            dens_mid = (dens_lo + dens_hi) * 0.5
            # clamp_mode == 'softplus'
            sigma = jax.nn.softplus(dens_mid + density_bias)
            alpha = 1.0 - jnp.exp(-(sigma * delta))          # [8, lanes]

            # In-chunk transmittance: Hillis-Steele inclusive product scan.
            a = 1.0 - alpha + 1e-10
            p = a
            for sh in (1, 2, 4):
                p = p * jnp.concatenate([ones[sh], p[:-sh]], axis=0)
            t_local = jnp.concatenate([ones[1], p[:-1]], axis=0)   # exclusive
            w = alpha * (trans * t_local)                    # weights of mids [s0, s0+8)
            trans = trans * p[_SUB - 1:_SUB, :]

            # Full 8-sublane unmasked store of this weights chunk.
            w_ref[pl.ds(s0, _SUB), lanes] = w.astype(w_ref.dtype)

            depth_acc8 = depth_acc8 + w * dep_mid
            w_acc8 = w_acc8 + w

            # Combined-weight colour accumulation: colour row j gets
            # 0.5 * (w[j-1] + w[j]); every colour row read exactly once.
            w_shift = jnp.concatenate([w_prev, w[:-1]], axis=0)
            coeff = (w + w_shift) * 0.5
            for k in range(_SUB):
                col_row = col_ref[s0 + k, :, lanes].astype(f32)   # [C, lanes]
                rgb_acc = rgb_acc + coeff[k:k + 1, :] * col_row
            w_prev = w[_SUB - 1:_SUB, :]
            return trans, rgb_acc, depth_acc8, w_acc8, w_prev

        carry = (jnp.ones((1, lane_chunk), f32),        # transmittance so far
                 jnp.zeros((C, lane_chunk), f32),       # rgb accumulator
                 jnp.zeros((_SUB, lane_chunk), f32),    # depth accumulator (per sublane)
                 jnp.zeros((_SUB, lane_chunk), f32),    # weight-total accumulator
                 jnp.zeros((1, lane_chunk), f32))       # w[previous mid] (w[-1] = 0)
        if n_full > 0:
            carry = lax.fori_loop(0, n_full, chunk_body, carry)
        trans, rgb_acc, depth_acc8, w_acc8, w_prev = carry
        depth_acc = jnp.sum(depth_acc8, axis=0, keepdims=True)
        w_acc = jnp.sum(w_acc8, axis=0, keepdims=True)

        # Ragged tail: remaining regular midpoints plus the optional inf-depth
        # sample, statically peeled (< 8 rows, runs once per lane chunk).
        w_tail = []
        for m in range(t0, n_mid):
            if m < n_reg:
                dep_a = dep_ref[m:m + 1, lanes].astype(f32)
                dep_b = dep_ref[m + 1:m + 2, lanes].astype(f32)
                dens_a = dens_ref[m:m + 1, lanes].astype(f32)
                dens_b = dens_ref[m + 1:m + 2, lanes].astype(f32)
                delta = dep_b - dep_a
                dep_mid = (dep_a + dep_b) * 0.5
                dens_mid = (dens_a + dens_b) * 0.5
            else:
                # Inf-depth sample: delta = 1e10, "midpoint" = last sample.
                # sigma * 1e10 may overflow to +inf; exp(-inf) = 0 so alpha = 1
                # exactly, matching the reference.
                delta = inf_delta
                dep_mid = dep_ref[m:m + 1, lanes].astype(f32)
                dens_mid = dens_ref[m:m + 1, lanes].astype(f32)
            sigma = jax.nn.softplus(dens_mid + density_bias)
            # TODO(synk): cut_quantile > 0 needs a global quantile over the full
            # densities tensor (cross-block two-pass reduction); assumed 0.0.
            alpha = 1.0 - jnp.exp(-(sigma * delta))
            w = alpha * trans
            w_tail.append(w)
            depth_acc = depth_acc + w * dep_mid
            w_acc = w_acc + w
            col_row = col_ref[m, :, lanes].astype(f32)
            if m < n_reg:
                rgb_acc = rgb_acc + (0.5 * (w_prev + w)) * col_row
            else:
                rgb_acc = rgb_acc + (0.5 * w_prev + w) * col_row
            trans = trans * (1.0 - alpha + 1e-10)
            w_prev = w
        if w_tail:
            w_ref[t0:n_mid, lanes] = jnp.concatenate(w_tail, axis=0).astype(w_ref.dtype)
        if not use_inf_depth:
            # Flush the deferred half-weight of the last colour row.
            rgb_acc = rgb_acc + (0.5 * w_prev) * col_ref[S - 1, :, lanes].astype(f32)

        rgb = rgb_acc
        if white_back:
            rgb = rgb + (1.0 - w_acc)
        rgb = rgb * 2.0 - 1.0

        # Packed small outputs: rows [0:C] rgb, row C depth, row C+1 final
        # transmittance -> one lane-dense store per lane chunk.
        misc_ref[:, lanes] = jnp.concatenate([rgb, depth_acc, trans], axis=0)


def mip_ray_marcher2(colors, densities, depths, rendering_options, *,
                     tile_rays=None, lane_chunk=256, weights_dtype=jnp.float32):
    """Pallas implementation of MipRayMarcher2.forward.

    colors:    [B, R, S, C]
    densities: [B, R, S, 1]
    depths:    [B, R, S, 1]
    Returns (composite_rgb [B,R,C], depth [B,R,1],
             weights [B,R,S',1], final_transmittance [B,R]).
    """
    assert rendering_options["clamp_mode"] == "softplus", \
        "MipRayMarcher only supports `clamp_mode`=`softplus`!"
    use_inf_depth = bool(rendering_options["use_inf_depth"])
    density_bias = float(rendering_options["density_bias"])
    white_back = bool(rendering_options.get("white_back", False))
    # TODO(synk): cut_quantile > 0 unsupported (needs a global two-pass quantile).
    assert float(rendering_options.get("cut_quantile", 0.0)) == 0.0

    B, R, S, C = colors.shape
    N = B * R
    n_mid = S if use_inf_depth else S - 1
    assert n_mid >= 1

    f32 = jnp.float32
    lane_chunk = max(128, (int(lane_chunk) // 128) * 128)

    in_itemsize = max(jnp.dtype(colors.dtype).itemsize,
                      jnp.dtype(densities.dtype).itemsize,
                      jnp.dtype(depths.dtype).itemsize)
    if tile_rays is None:
        # Double-buffered VMEM bytes per ray of tile; a ~40 MiB budget keeps
        # the blocks comfortably inside v7x's 64 MiB/TC (v5e/v6e have slack).
        bytes_per_ray = 2 * ((S * C + 2 * S) * in_itemsize
                             + n_mid * jnp.dtype(weights_dtype).itemsize
                             + (C + 2) * 4)
        tile_rays = (40 * 1024 * 1024) // max(bytes_per_ray, 1)
        tile_rays = min(max(tile_rays, lane_chunk), 2048)
    tile_rays = max(lane_chunk, (int(tile_rays) // lane_chunk) * lane_chunk)
    # Prefer >= 2 grid steps so dimension_semantics=("parallel",) can shard the
    # grid across both TensorCores on v7x.
    tile_rays = min(tile_rays,
                    max(lane_chunk, pl.cdiv(pl.cdiv(N, 2), lane_chunk) * lane_chunk))
    lane_chunk = min(lane_chunk, tile_rays)
    grid = (pl.cdiv(N, tile_rays),)

    # The kernel wants rays on the 128-lane axis.  The relayout is a plain
    # (materialised) XLA transpose so the pallas input DMAs stay
    # lane-contiguous; fusing the transpose into the kernel DMA would make it
    # an element-strided gather.  Inputs keep their dtype (bf16 halves reads).
    # TODO(synk): a natural-layout ([N, S, C]) variant with an in-kernel XLU
    # relayout would remove this extra HBM round-trip of `colors`.
    col_t = jnp.transpose(colors.reshape(N, S, C), (1, 2, 0))   # [S, C, N]
    dens_t = jnp.transpose(densities.reshape(N, S), (1, 0))     # [S, N]
    dep_t = jnp.transpose(depths.reshape(N, S), (1, 0))         # [S, N]

    kernel = functools.partial(
        _ray_march_kernel,
        density_bias=density_bias,
        white_back=white_back,
        use_inf_depth=use_inf_depth,
        lane_chunk=lane_chunk,
    )

    misc_t, w_t = pl.pallas_call(
        kernel,
        out_shape=(
            jax.ShapeDtypeStruct((C + 2, N), f32),            # packed rgb/depth/Tfinal
            jax.ShapeDtypeStruct((n_mid, N), weights_dtype),  # weights
        ),
        grid_spec=pltpu.PrefetchScalarGridSpec(
            num_scalar_prefetch=0,
            grid=grid,
            in_specs=[
                pl.BlockSpec((S, C, tile_rays), lambda i: (0, 0, i)),
                pl.BlockSpec((S, tile_rays), lambda i: (0, i)),
                pl.BlockSpec((S, tile_rays), lambda i: (0, i)),
            ],
            out_specs=[
                pl.BlockSpec((C + 2, tile_rays), lambda i: (0, i)),
                pl.BlockSpec((n_mid, tile_rays), lambda i: (0, i)),
            ],
        ),
        compiler_params=pltpu.CompilerParams(
            dimension_semantics=("parallel",),
            vmem_limit_bytes=56 * 1024 * 1024,
        ),
    )(col_t, dens_t, dep_t)

    composite_rgb = jnp.transpose(misc_t[:C], (1, 0)).reshape(B, R, C)
    depth = jnp.reshape(misc_t[C:C + 1], (B, R, 1))
    final_transmittance = jnp.reshape(misc_t[C + 1:C + 2], (B, R))
    # TODO(synk): this re-transpose re-reads/writes the full weights tensor in
    # HBM; drop it if the consumer can accept [S', N] layout.
    weights = jnp.transpose(w_t, (1, 0)).reshape(B, R, n_mid, 1)
    return composite_rgb, depth, weights, final_transmittance


def mip_ray_marcher2_ref(colors, densities, depths, opts):
    """Pure-JAX reference mirroring the PyTorch forward (for validation)."""
    deltas = depths[:, :, 1:] - depths[:, :, :-1]
    colors_mid = (colors[:, :, :-1] + colors[:, :, 1:]) / 2
    densities_mid = (densities[:, :, :-1] + densities[:, :, 1:]) / 2
    depths_mid = (depths[:, :, :-1] + depths[:, :, 1:]) / 2
    if opts["use_inf_depth"]:
        deltas_last = 1e10 * jnp.ones_like(deltas[:, :, :1])
        deltas = jnp.concatenate([deltas, deltas_last], axis=2)
        colors_mid = jnp.concatenate([colors_mid, colors[:, :, -1:]], axis=2)
        densities_mid = jnp.concatenate([densities_mid, densities[:, :, -1:]], axis=2)
        depths_mid = jnp.concatenate([depths_mid, depths[:, :, -1:]], axis=2)
    densities_mid = jax.nn.softplus(densities_mid + opts["density_bias"])
    density_delta = densities_mid * deltas
    alpha = 1 - jnp.exp(-density_delta)
    alpha_shifted = jnp.concatenate(
        [jnp.ones_like(alpha[:, :, :1]), 1 - alpha + 1e-10], axis=-2)
    transmittance = jnp.cumprod(alpha_shifted, axis=-2)
    final_transmittance = transmittance[:, :, -1, 0]
    weights = alpha * transmittance[:, :, :-1]
    composite_rgb = jnp.sum(weights * colors_mid, axis=-2)
    weight_total = weights.sum(2)
    depth = jnp.sum(weights * depths_mid, axis=-2)
    if opts.get("white_back", False):
        composite_rgb = composite_rgb + 1 - weight_total
    composite_rgb = composite_rgb * 2 - 1
    return composite_rgb, depth, weights, final_transmittance


if __name__ == "__main__":
    key = jax.random.PRNGKey(0)

    def make_inputs(k, B, R, S, C, dtype=jnp.float32):
        kc, kd, kz = jax.random.split(k, 3)
        colors = jax.random.uniform(kc, (B, R, S, C), dtype=jnp.float32)
        densities = jax.random.normal(kd, (B, R, S, 1), dtype=jnp.float32)
        dz = jax.random.uniform(kz, (B, R, S, 1), dtype=jnp.float32,
                                minval=0.05, maxval=0.5)
        depths = jnp.cumsum(dz, axis=2) + 1.0
        return colors.astype(dtype), densities.astype(dtype), depths.astype(dtype)

    B, R, C = 2, 192, 4   # N = 384 rays -> 2 grid steps, last block partial
    cases = [
        # (S, rendering_options, call kwargs)
        (13, dict(use_inf_depth=True, clamp_mode="softplus", density_bias=-1.0,
                  cut_quantile=0.0, white_back=False), {}),
        (13, dict(use_inf_depth=False, clamp_mode="softplus", density_bias=-1.0,
                  cut_quantile=0.0, white_back=True), dict(lane_chunk=128)),
        (17, dict(use_inf_depth=True, clamp_mode="softplus", density_bias=0.0,
                  cut_quantile=0.0, white_back=True), {}),
        (17, dict(use_inf_depth=False, clamp_mode="softplus", density_bias=-1.0,
                  cut_quantile=0.0, white_back=False), {}),
    ]
    for idx, (S, opts, kw) in enumerate(cases):
        colors, densities, depths = make_inputs(jax.random.fold_in(key, idx),
                                                B, R, S, C)
        fn = jax.jit(functools.partial(mip_ray_marcher2,
                                       rendering_options=opts, **kw))
        outs = jax.block_until_ready(fn(colors, densities, depths))
        refs = mip_ray_marcher2_ref(colors, densities, depths, opts)
        for o, r in zip(outs, refs):
            np.testing.assert_allclose(np.asarray(o), np.asarray(r),
                                       rtol=2e-5, atol=2e-5)

    # bf16 input path (kernel math stays f32): compare against the f32
    # reference evaluated on the same bf16-rounded inputs.
    S = 13
    opts = dict(use_inf_depth=True, clamp_mode="softplus", density_bias=-1.0,
                cut_quantile=0.0, white_back=False)
    colors, densities, depths = make_inputs(jax.random.fold_in(key, 99),
                                            B, R, S, C, dtype=jnp.bfloat16)
    fn = jax.jit(functools.partial(mip_ray_marcher2, rendering_options=opts))
    outs = jax.block_until_ready(fn(colors, densities, depths))
    refs = mip_ray_marcher2_ref(colors.astype(jnp.float32),
                                densities.astype(jnp.float32),
                                depths.astype(jnp.float32), opts)
    for o, r in zip(outs, refs):
        np.testing.assert_allclose(np.asarray(o), np.asarray(r),
                                   rtol=2e-5, atol=2e-5)

    print("KERNEL_OK")
</pallas_src>

<mosaic_0001>
module attributes {stable_mosaic.version = 11 : i64} {
  func.func @_ray_march_kernel(%arg0: i32, %arg1: memref<13x4x256xf32, #tpu.memory_space<vmem>>, %arg2: memref<13x256xf32, #tpu.memory_space<vmem>>, %arg3: memref<13x256xf32, #tpu.memory_space<vmem>>, %arg4: memref<6x256xf32, #tpu.memory_space<vmem>>, %arg5: memref<13x256xf32, #tpu.memory_space<vmem>>) attributes {dimension_semantics = [#tpu.dimension_semantics<parallel>], iteration_bounds = array<i64: 2>, scalar_prefetch = 0 : i64, scratch_operands = 0 : i64, tpu.core_type = #tpu.core_type<tc>, window_params = [{transform_indices = @transform_0, window_bounds = array<i64: 13, 4, 256>}, {transform_indices = @transform_1, window_bounds = array<i64: 13, 256>}, {transform_indices = @transform_2, window_bounds = array<i64: 13, 256>}, {transform_indices = @transform_3, window_bounds = array<i64: 6, 256>}, {transform_indices = @transform_4, window_bounds = array<i64: 13, 256>}]} {
    %cst = arith.constant 1.000000e+00 : f32
    %0 = vector.broadcast %cst : f32 to vector<1x256xf32>
    %cst_0 = arith.constant 1.000000e+00 : f32
    %1 = vector.broadcast %cst_0 : f32 to vector<2x256xf32>
    %cst_1 = arith.constant 1.000000e+00 : f32
    %2 = vector.broadcast %cst_1 : f32 to vector<4x256xf32>
    %cst_2 = arith.constant 1.000000e+10 : f32
    %3 = vector.broadcast %cst_2 : f32 to vector<1x256xf32>
    %cst_3 = arith.constant 1.000000e+00 : f32
    %4 = vector.broadcast %cst_3 : f32 to vector<1x256xf32>
    %cst_4 = arith.constant 0.000000e+00 : f32
    %5 = vector.broadcast %cst_4 : f32 to vector<4x256xf32>
    %cst_5 = arith.constant 0.000000e+00 : f32
    %6 = vector.broadcast %cst_5 : f32 to vector<8x256xf32>
    %cst_6 = arith.constant 0.000000e+00 : f32
    %7 = vector.broadcast %cst_6 : f32 to vector<1x256xf32>
    %c0_i32 = arith.constant 0 : i32
    %c8_i32 = arith.constant 8 : i32
    %8 = arith.muli %c0_i32, %c8_i32 : i32
    %9 = tpu.assume_multiple %8, 8 : i32
    %c8_i32_7 = arith.constant 8 : i32
    %10 = arith.muli %c0_i32, %c8_i32_7 : i32
    %c8_i32_8 = arith.constant 8 : i32
    %11 = arith.addi %10, %c8_i32_8 : i32
    %12 = tpu.assume_multiple %11, 8 : i32
    %13 = arith.index_cast %9 : i32 to index
    %c0 = arith.constant 0 : index
    %14 = vector.load %arg3[%13, %c0] : memref<13x256xf32, #tpu.memory_space<vmem>>, vector<8x256xf32>
    %15 = arith.index_cast %9 : i32 to index
    %c0_9 = arith.constant 0 : index
    %16 = vector.load %arg2[%15, %c0_9] : memref<13x256xf32, #tpu.memory_space<vmem>>, vector<8x256xf32>
    %17 = arith.index_cast %12 : i32 to index
    %c0_10 = arith.constant 0 : index
    %18 = vector.load %arg3[%17, %c0_10] : memref<13x256xf32, #tpu.memory_space<vmem>>, vector<1x256xf32>
    %19 = arith.index_cast %12 : i32 to index
    %c0_11 = arith.constant 0 : index
    %20 = vector.load %arg2[%19, %c0_11] : memref<13x256xf32, #tpu.memory_space<vmem>>, vector<1x256xf32>
    %21 = vector.extract_strided_slice %14 {offsets = [1, 0], sizes = [7, 256], strides = [1, 1]} : vector<8x256xf32> to vector<7x256xf32>
    %22 = tpu.concatenate %21, %18 in 0 : vector<7x256xf32>, vector<1x256xf32> -> vector<8x256xf32>
    %23 = vector.extract_strided_slice %16 {offsets = [1, 0], sizes = [7, 256], strides = [1, 1]} : vector<8x256xf32> to vector<7x256xf32>
    %24 = tpu.concatenate %23, %20 in 0 : vector<7x256xf32>, vector<1x256xf32> -> vector<8x256xf32>
    %25 = arith.subf %22, %14 : vector<8x256xf32>
    %26 = arith.addf %14, %22 : vector<8x256xf32>
    %cst_12 = arith.constant 5.000000e-01 : f32
    %27 = vector.broadcast %cst_12 : f32 to vector<8x256xf32>
    %28 = arith.mulf %26, %27 : vector<8x256xf32>
    %29 = arith.addf %16, %24 : vector<8x256xf32>
    %cst_13 = arith.constant 5.000000e-01 : f32
    %30 = vector.broadcast %cst_13 : f32 to vector<8x256xf32>
    %31 = arith.mulf %29, %30 : vector<8x256xf32>
    %cst_14 = arith.constant -1.000000e+00 : f32
    %32 = vector.broadcast %cst_14 : f32 to vector<8x256xf32>
    %33 = arith.addf %31, %32 : vector<8x256xf32>
    %cst_15 = arith.constant 0.000000e+00 : f32
    %34 = vector.broadcast %cst_15 : f32 to vector<8x256xf32>
    %35 = arith.maximumf %33, %34 : vector<8x256xf32>
    %36 = vector.broadcast %cst_15 : f32 to vector<8x256xf32>
    %37 = arith.subf %33, %36 : vector<8x256xf32>
    %38 = arith.cmpf one, %37, %37 : vector<8x256xf32>
    %39 = vector.broadcast %cst_15 : f32 to vector<8x256xf32>
    %40 = arith.addf %33, %39 : vector<8x256xf32>
    %41 = math.absf %37 : vector<8x256xf32>
    %cst_16 = arith.constant 0.000000e+00 : f32
    %42 = vector.broadcast %cst_16 : f32 to vector<8x256xf32>
    %43 = arith.subf %42, %41 : vector<8x256xf32>
    %44 = math.exp %43 : vector<8x256xf32>
    %45 = math.log1p %44 : vector<8x256xf32>
    %46 = arith.addf %35, %45 : vector<8x256xf32>
    %47 = arith.select %38, %40, %46 : vector<8x256xi1>, vector<8x256xf32>
    %48 = arith.mulf %47, %25 : vector<8x256xf32>
    %cst_17 = arith.constant 0.000000e+00 : f32
    %49 = vector.broadcast %cst_17 : f32 to vector<8x256xf32>
    %50 = arith.subf %49, %48 : vector<8x256xf32>
    %51 = math.exp %50 : vector<8x256xf32>
    %cst_18 = arith.constant 1.000000e+00 : f32
    %52 = vector.broadcast %cst_18 : f32 to vector<8x256xf32>
    %53 = arith.subf %52, %51 : vector<8x256xf32>
    %cst_19 = arith.constant 1.000000e+00 : f32
    %54 = vector.broadcast %cst_19 : f32 to vector<8x256xf32>
    %55 = arith.subf %54, %53 : vector<8x256xf32>
    %cst_20 = arith.constant 1.000000e-10 : f32
    %56 = vector.broadcast %cst_20 : f32 to vector<8x256xf32>
    %57 = arith.addf %55, %56 : vector<8x256xf32>
    %58 = vector.extract_strided_slice %57 {offsets = [0, 0], sizes = [7, 256], strides = [1, 1]} : vector<8x256xf32> to vector<7x256xf32>
    %59 = tpu.concatenate %0, %58 in 0 : vector<1x256xf32>, vector<7x256xf32> -> vector<8x256xf32>
    %60 = arith.mulf %57, %59 : vector<8x256xf32>
    %61 = vector.extract_strided_slice %60 {offsets = [0, 0], sizes = [6, 256], strides = [1, 1]} : vector<8x256xf32> to vector<6x256xf32>
    %62 = tpu.concatenate %1, %61 in 0 : vector<2x256xf32>, vector<6x256xf32> -> vector<8x256xf32>
    %63 = arith.mulf %60, %62 : vector<8x256xf32>
    %64 = vector.extract_strided_slice %63 {offsets = [0, 0], sizes = [4, 256], strides = [1, 1]} : vector<8x256xf32> to vector<4x256xf32>
    %65 = tpu.concatenate %2, %64 in 0 : vector<4x256xf32>, vector<4x256xf32> -> vector<8x256xf32>
    %66 = arith.mulf %63, %65 : vector<8x256xf32>
    %67 = vector.extract_strided_slice %66 {offsets = [0, 0], sizes = [7, 256], strides = [1, 1]} : vector<8x256xf32> to vector<7x256xf32>
    %68 = tpu.concatenate %0, %67 in 0 : vector<1x256xf32>, vector<7x256xf32> -> vector<8x256xf32>
    %69 = vector.broadcast %4 : vector<1x256xf32> to vector<8x256xf32>
    %70 = arith.mulf %69, %68 : vector<8x256xf32>
    %71 = arith.mulf %53, %70 : vector<8x256xf32>
    %72 = vector.extract_strided_slice %66 {offsets = [7, 0], sizes = [1, 256], strides = [1, 1]} : vector<8x256xf32> to vector<1x256xf32>
    %73 = arith.mulf %4, %72 : vector<1x256xf32>
    %74 = arith.index_cast %9 : i32 to index
    %c0_21 = arith.constant 0 : index
    %75 = vector.load %arg5[%74, %c0_21] : memref<13x256xf32, #tpu.memory_space<vmem>>, vector<8x256xf32>
    tpu.vector_store %arg5[%74, %c0_21], %71 {strides = array<i32>} : memref<13x256xf32, #tpu.memory_space<vmem>>, vector<8x256xf32>,
    %76 = arith.mulf %71, %28 : vector<8x256xf32>
    %77 = arith.addf %6, %76 : vector<8x256xf32>
    %78 = vector.extract_strided_slice %71 {offsets = [0, 0], sizes = [7, 256], strides = [1, 1]} : vector<8x256xf32> to vector<7x256xf32>
    %79 = tpu.concatenate %7, %78 in 0 : vector<1x256xf32>, vector<7x256xf32> -> vector<8x256xf32>
    %80 = arith.addf %71, %79 : vector<8x256xf32>
    %cst_22 = arith.constant 5.000000e-01 : f32
    %81 = vector.broadcast %cst_22 : f32 to vector<8x256xf32>
    %82 = arith.mulf %80, %81 : vector<8x256xf32>
    %c0_i32_23 = arith.constant 0 : i32
    %83 = arith.addi %9, %c0_i32_23 : i32
    %84 = arith.index_cast %83 : i32 to index
    %c0_24 = arith.constant 0 : index
    %c0_25 = arith.constant 0 : index
    %85 = vector.load %arg1[%84, %c0_24, %c0_25] : memref<13x4x256xf32, #tpu.memory_space<vmem>>, vector<1x4x256xf32>
    %86 = vector.shape_cast %85 : vector<1x4x256xf32> to vector<4x256xf32>
    %87 = vector.extract_strided_slice %82 {offsets = [0, 0], sizes = [1, 256], strides = [1, 1]} : vector<8x256xf32> to vector<1x256xf32>
    %88 = vector.broadcast %87 : vector<1x256xf32> to vector<4x256xf32>
    %89 = arith.mulf %88, %86 : vector<4x256xf32>
    %90 = arith.addf %5, %89 : vector<4x256xf32>
    %c1_i32 = arith.constant 1 : i32
    %91 = arith.addi %9, %c1_i32 : i32
    %92 = arith.index_cast %91 : i32 to index
    %c0_26 = arith.constant 0 : index
    %c0_27 = arith.constant 0 : index
    %93 = vector.load %arg1[%92, %c0_26, %c0_27] : memref<13x4x256xf32, #tpu.memory_space<vmem>>, vector<1x4x256xf32>
    %94 = vector.shape_cast %93 : vector<1x4x256xf32> to vector<4x256xf32>
    %95 = vector.extract_strided_slice %82 {offsets = [1, 0], sizes = [1, 256], strides = [1, 1]} : vector<8x256xf32> to vector<1x256xf32>
    %96 = vector.broadcast %95 : vector<1x256xf32> to vector<4x256xf32>
    %97 = arith.mulf %96, %94 : vector<4x256xf32>
    %98 = arith.addf %90, %97 : vector<4x256xf32>
    %c2_i32 = arith.constant 2 : i32
    %99 = arith.addi %9, %c2_i32 : i32
    %100 = arith.index_cast %99 : i32 to index
    %c0_28 = arith.constant 0 : index
    %c0_29 = arith.constant 0 : index
    %101 = vector.load %arg1[%100, %c0_28, %c0_29] : memref<13x4x256xf32, #tpu.memory_space<vmem>>, vector<1x4x256xf32>
    %102 = vector.shape_cast %101 : vector<1x4x256xf32> to vector<4x256xf32>
    %103 = vector.extract_strided_slice %82 {offsets = [2, 0], sizes = [1, 256], strides = [1, 1]} : vector<8x256xf32> to vector<1x256xf32>
    %104 = vector.broadcast %103 : vector<1x256xf32> to vector<4x256xf32>
    %105 = arith.mulf %104, %102 : vector<4x256xf32>
    %106 = arith.addf %98, %105 : vector<4x256xf32>
    %c3_i32 = arith.constant 3 : i32
    %107 = arith.addi %9, %c3_i32 : i32
    %108 = arith.index_cast %107 : i32 to index
    %c0_30 = arith.constant 0 : index
    %c0_31 = arith.constant 0 : index
    %109 = vector.load %arg1[%108, %c0_30, %c0_31] : memref<13x4x256xf32, #tpu.memory_space<vmem>>, vector<1x4x256xf32>
    %110 = vector.shape_cast %109 : vector<1x4x256xf32> to vector<4x256xf32>
    %111 = vector.extract_strided_slice %82 {offsets = [3, 0], sizes = [1, 256], strides = [1, 1]} : vector<8x256xf32> to vector<1x256xf32>
    %112 = vector.broadcast %111 : vector<1x256xf32> to vector<4x256xf32>
    %113 = arith.mulf %112, %110 : vector<4x256xf32>
    %114 = arith.addf %106, %113 : vector<4x256xf32>
    %c4_i32 = arith.constant 4 : i32
    %115 = arith.addi %9, %c4_i32 : i32
    %116 = arith.index_cast %115 : i32 to index
    %c0_32 = arith.constant 0 : index
    %c0_33 = arith.constant 0 : index
    %117 = vector.load %arg1[%116, %c0_32, %c0_33] : memref<13x4x256xf32, #tpu.memory_space<vmem>>, vector<1x4x256xf32>
    %118 = vector.shape_cast %117 : vector<1x4x256xf32> to vector<4x256xf32>
    %119 = vector.extract_strided_slice %82 {offsets = [4, 0], sizes = [1, 256], strides = [1, 1]} : vector<8x256xf32> to vector<1x256xf32>
    %120 = vector.broadcast %119 : vector<1x256xf32> to vector<4x256xf32>
    %121 = arith.mulf %120, %118 : vector<4x256xf32>
    %122 = arith.addf %114, %121 : vector<4x256xf32>
    %c5_i32 = arith.constant 5 : i32
    %123 = arith.addi %9, %c5_i32 : i32
    %124 = arith.index_cast %123 : i32 to index
    %c0_34 = arith.constant 0 : index
    %c0_35 = arith.constant 0 : index
    %125 = vector.load %arg1[%124, %c0_34, %c0_35] : memref<13x4x256xf32, #tpu.memory_space<vmem>>, vector<1x4x256xf32>
    %126 = vector.shape_cast %125 : vector<1x4x256xf32> to vector<4x256xf32>
    %127 = vector.extract_strided_slice %82 {offsets = [5, 0], sizes = [1, 256], strides = [1, 1]} : vector<8x256xf32> to vector<1x256xf32>
    %128 = vector.broadcast %127 : vector<1x256xf32> to vector<4x256xf32>
    %129 = arith.mulf %128, %126 : vector<4x256xf32>
    %130 = arith.addf %122, %129 : vector<4x256xf32>
    %c6_i32 = arith.constant 6 : i32
    %131 = arith.addi %9, %c6_i32 : i32
    %132 = arith.index_cast %131 : i32 to index
    %c0_36 = arith.constant 0 : index
    %c0_37 = arith.constant 0 : index
    %133 = vector.load %arg1[%132, %c0_36, %c0_37] : memref<13x4x256xf32, #tpu.memory_space<vmem>>, vector<1x4x256xf32>
    %134 = vector.shape_cast %133 : vector<1x4x256xf32> to vector<4x256xf32>
    %135 = vector.extract_strided_slice %82 {offsets = [6, 0], sizes = [1, 256], strides = [1, 1]} : vector<8x256xf32> to vector<1x256xf32>
    %136 = vector.broadcast %135 : vector<1x256xf32> to vector<4x256xf32>
    %137 = arith.mulf %136, %134 : vector<4x256xf32>
    %138 = arith.addf %130, %137 : vector<4x256xf32>
    %c7_i32 = arith.constant 7 : i32
    %139 = arith.addi %9, %c7_i32 : i32
    %140 = arith.index_cast %139 : i32 to index
    %c0_38 = arith.constant 0 : index
    %c0_39 = arith.constant 0 : index
    %141 = vector.load %arg1[%140, %c0_38, %c0_39] : memref<13x4x256xf32, #tpu.memory_space<vmem>>, vector<1x4x256xf32>
    %142 = vector.shape_cast %141 : vector<1x4x256xf32> to vector<4x256xf32>
    %143 = vector.extract_strided_slice %82 {offsets = [7, 0], sizes = [1, 256], strides = [1, 1]} : vector<8x256xf32> to vector<1x256xf32>
    %144 = vector.broadcast %143 : vector<1x256xf32> to vector<4x256xf32>
    %145 = arith.mulf %144, %142 : vector<4x256xf32>
    %146 = arith.addf %138, %145 : vector<4x256xf32>
    %147 = vector.extract_strided_slice %71 {offsets = [7, 0], sizes = [1, 256], strides = [1, 1]} : vector<8x256xf32> to vector<1x256xf32>
    %c1_i32_40 = arith.constant 1 : i32
    %cst_41 = arith.constant dense<0.000000e+00> : vector<256xf32>
    %148 = vector.multi_reduction <add>, %77, %cst_41 [0] : vector<8x256xf32> to vector<256xf32>
    %149 = vector.shape_cast %148 : vector<256xf32> to vector<1x256xf32>
    %c8 = arith.constant 8 : index
    %c0_42 = arith.constant 0 : index
    %150 = vector.load %arg3[%c8, %c0_42] : memref<13x256xf32, #tpu.memory_space<vmem>>, vector<1x256xf32>
    %c9 = arith.constant 9 : index
    %c0_43 = arith.constant 0 : index
    %151 = vector.load %arg3[%c9, %c0_43] : memref<13x256xf32, #tpu.memory_space<vmem>>, vector<1x256xf32>
    %c8_44 = arith.constant 8 : index
    %c0_45 = arith.constant 0 : index
    %152 = vector.load %arg2[%c8_44, %c0_45] : memref<13x256xf32, #tpu.memory_space<vmem>>, vector<1x256xf32>
    %c9_46 = arith.constant 9 : index
    %c0_47 = arith.constant 0 : index
    %153 = vector.load %arg2[%c9_46, %c0_47] : memref<13x256xf32, #tpu.memory_space<vmem>>, vector<1x256xf32>
    %154 = arith.subf %151, %150 : vector<1x256xf32>
    %155 = arith.addf %150, %151 : vector<1x256xf32>
    %cst_48 = arith.constant 5.000000e-01 : f32
    %156 = vector.broadcast %cst_48 : f32 to vector<1x256xf32>
    %157 = arith.mulf %155, %156 : vector<1x256xf32>
    %158 = arith.addf %152, %153 : vector<1x256xf32>
    %cst_49 = arith.constant 5.000000e-01 : f32
    %159 = vector.broadcast %cst_49 : f32 to vector<1x256xf32>
    %160 = arith.mulf %158, %159 : vector<1x256xf32>
    %cst_50 = arith.constant -1.000000e+00 : f32
    %161 = vector.broadcast %cst_50 : f32 to vector<1x256xf32>
    %162 = arith.addf %160, %161 : vector<1x256xf32>
    %cst_51 = arith.constant 0.000000e+00 : f32
    %163 = vector.broadcast %cst_51 : f32 to vector<1x256xf32>
    %164 = arith.maximumf %162, %163 : vector<1x256xf32>
    %165 = vector.broadcast %cst_51 : f32 to vector<1x256xf32>
    %166 = arith.subf %162, %165 : vector<1x256xf32>
    %167 = arith.cmpf one, %166, %166 : vector<1x256xf32>
    %168 = vector.broadcast %cst_51 : f32 to vector<1x256xf32>
    %169 = arith.addf %162, %168 : vector<1x256xf32>
    %170 = math.absf %166 : vector<1x256xf32>
    %cst_52 = arith.constant 0.000000e+00 : f32
    %171 = vector.broadcast %cst_52 : f32 to vector<1x256xf32>
    %172 = arith.subf %171, %170 : vector<1x256xf32>
    %173 = math.exp %172 : vector<1x256xf32>
    %174 = math.log1p %173 : vector<1x256xf32>
    %175 = arith.addf %164, %174 : vector<1x256xf32>
    %176 = arith.select %167, %169, %175 : vector<1x256xi1>, vector<1x256xf32>
    %177 = arith.mulf %176, %154 : vector<1x256xf32>
    %cst_53 = arith.constant 0.000000e+00 : f32
    %178 = vector.broadcast %cst_53 : f32 to vector<1x256xf32>
    %179 = arith.subf %178, %177 : vector<1x256xf32>
    %180 = math.exp %179 : vector<1x256xf32>
    %cst_54 = arith.constant 1.000000e+00 : f32
    %181 = vector.broadcast %cst_54 : f32 to vector<1x256xf32>
    %182 = arith.subf %181, %180 : vector<1x256xf32>
    %183 = arith.mulf %182, %73 : vector<1x256xf32>
    %184 = arith.mulf %183, %157 : vector<1x256xf32>
    %185 = arith.addf %149, %184 : vector<1x256xf32>
    %c8_55 = arith.constant 8 : index
    %c0_56 = arith.constant 0 : index
    %c0_57 = arith.constant 0 : index
    %186 = vector.load %arg1[%c8_55, %c0_56, %c0_57] : memref<13x4x256xf32, #tpu.memory_space<vmem>>, vector<1x4x256xf32>
    %187 = vector.shape_cast %186 : vector<1x4x256xf32> to vector<4x256xf32>
    %188 = arith.addf %147, %183 : vector<1x256xf32>
    %cst_58 = arith.constant 5.000000e-01 : f32
    %189 = vector.broadcast %cst_58 : f32 to vector<1x256xf32>
    %190 = arith.mulf %189, %188 : vector<1x256xf32>
    %191 = vector.broadcast %190 : vector<1x256xf32> to vector<4x256xf32>
    %192 = arith.mulf %191, %187 : vector<4x256xf32>
    %193 = arith.addf %146, %192 : vector<4x256xf32>
    %cst_59 = arith.constant 1.000000e+00 : f32
    %194 = vector.broadcast %cst_59 : f32 to vector<1x256xf32>
    %195 = arith.subf %194, %182 : vector<1x256xf32>
    %cst_60 = arith.constant 1.000000e-10 : f32
    %196 = vector.broadcast %cst_60 : f32 to vector<1x256xf32>
    %197 = arith.addf %195, %196 : vector<1x256xf32>
    %198 = arith.mulf %73, %197 : vector<1x256xf32>
    %c9_61 = arith.constant 9 : index
    %c0_62 = arith.constant 0 : index
    %199 = vector.load %arg3[%c9_61, %c0_62] : memref<13x256xf32, #tpu.memory_space<vmem>>, vector<1x256xf32>
    %c10 = arith.constant 10 : index
    %c0_63 = arith.constant 0 : index
    %200 = vector.load %arg3[%c10, %c0_63] : memref<13x256xf32, #tpu.memory_space<vmem>>, vector<1x256xf32>
    %c9_64 = arith.constant 9 : index
    %c0_65 = arith.constant 0 : index
    %201 = vector.load %arg2[%c9_64, %c0_65] : memref<13x256xf32, #tpu.memory_space<vmem>>, vector<1x256xf32>
    %c10_66 = arith.constant 10 : index
    %c0_67 = arith.constant 0 : index
    %202 = vector.load %arg2[%c10_66, %c0_67] : memref<13x256xf32, #tpu.memory_space<vmem>>, vector<1x256xf32>
    %203 = arith.subf %200, %199 : vector<1x256xf32>
    %204 = arith.addf %199, %200 : vector<1x256xf32>
    %cst_68 = arith.constant 5.000000e-01 : f32
    %205 = vector.broadcast %cst_68 : f32 to vector<1x256xf32>
    %206 = arith.mulf %204, %205 : vector<1x256xf32>
    %207 = arith.addf %201, %202 : vector<1x256xf32>
    %cst_69 = arith.constant 5.000000e-01 : f32
    %208 = vector.broadcast %cst_69 : f32 to vector<1x256xf32>
    %209 = arith.mulf %207, %208 : vector<1x256xf32>
    %cst_70 = arith.constant -1.000000e+00 : f32
    %210 = vector.broadcast %cst_70 : f32 to vector<1x256xf32>
    %211 = arith.addf %209, %210 : vector<1x256xf32>
    %cst_71 = arith.constant 0.000000e+00 : f32
    %212 = vector.broadcast %cst_71 : f32 to vector<1x256xf32>
    %213 = arith.maximumf %211, %212 : vector<1x256xf32>
    %214 = vector.broadcast %cst_71 : f32 to vector<1x256xf32>
    %215 = arith.subf %211, %214 : vector<1x256xf32>
    %216 = arith.cmpf one, %215, %215 : vector<1x256xf32>
    %217 = vector.broadcast %cst_71 : f32 to vector<1x256xf32>
    %218 = arith.addf %211, %217 : vector<1x256xf32>
    %219 = math.absf %215 : vector<1x256xf32>
    %cst_72 = arith.constant 0.000000e+00 : f32
    %220 = vector.broadcast %cst_72 : f32 to vector<1x256xf32>
    %221 = arith.subf %220, %219 : vector<1x256xf32>
    %222 = math.exp %221 : vector<1x256xf32>
    %223 = math.log1p %222 : vector<1x256xf32>
    %224 = arith.addf %213, %223 : vector<1x256xf32>
    %225 = arith.select %216, %218, %224 : vector<1x256xi1>, vector<1x256xf32>
    %226 = arith.mulf %225, %203 : vector<1x256xf32>
    %cst_73 = arith.constant 0.000000e+00 : f32
    %227 = vector.broadcast %cst_73 : f32 to vector<1x256xf32>
    %228 = arith.subf %227, %226 : vector<1x256xf32>
    %229 = math.exp %228 : vector<1x256xf32>
    %cst_74 = arith.constant 1.000000e+00 : f32
    %230 = vector.broadcast %cst_74 : f32 to vector<1x256xf32>
    %231 = arith.subf %230, %229 : vector<1x256xf32>
    %232 = arith.mulf %231, %198 : vector<1x256xf32>
    %233 = arith.mulf %232, %206 : vector<1x256xf32>
    %234 = arith.addf %185, %233 : vector<1x256xf32>
    %c9_75 = arith.constant 9 : index
    %c0_76 = arith.constant 0 : index
    %c0_77 = arith.constant 0 : index
    %235 = vector.load %arg1[%c9_75, %c0_76, %c0_77] : memref<13x4x256xf32, #tpu.memory_space<vmem>>, vector<1x4x256xf32>
    %236 = vector.shape_cast %235 : vector<1x4x256xf32> to vector<4x256xf32>
    %237 = arith.addf %183, %232 : vector<1x256xf32>
    %cst_78 = arith.constant 5.000000e-01 : f32
    %238 = vector.broadcast %cst_78 : f32 to vector<1x256xf32>
    %239 = arith.mulf %238, %237 : vector<1x256xf32>
    %240 = vector.broadcast %239 : vector<1x256xf32> to vector<4x256xf32>
    %241 = arith.mulf %240, %236 : vector<4x256xf32>
    %242 = arith.addf %193, %241 : vector<4x256xf32>
    %cst_79 = arith.constant 1.000000e+00 : f32
    %243 = vector.broadcast %cst_79 : f32 to vector<1x256xf32>
    %244 = arith.subf %243, %231 : vector<1x256xf32>
    %cst_80 = arith.constant 1.000000e-10 : f32
    %245 = vector.broadcast %cst_80 : f32 to vector<1x256xf32>
    %246 = arith.addf %244, %245 : vector<1x256xf32>
    %247 = arith.mulf %198, %246 : vector<1x256xf32>
    %c10_81 = arith.constant 10 : index
    %c0_82 = arith.constant 0 : index
    %248 = vector.load %arg3[%c10_81, %c0_82] : memref<13x256xf32, #tpu.memory_space<vmem>>, vector<1x256xf32>
    %c11 = arith.constant 11 : index
    %c0_83 = arith.constant 0 : index
    %249 = vector.load %arg3[%c11, %c0_83] : memref<13x256xf32, #tpu.memory_space<vmem>>, vector<1x256xf32>
    %c10_84 = arith.constant 10 : index
    %c0_85 = arith.constant 0 : index
    %250 = vector.load %arg2[%c10_84, %c0_85] : memref<13x256xf32, #tpu.memory_space<vmem>>, vector<1x256xf32>
    %c11_86 = arith.constant 11 : index
    %c0_87 = arith.constant 0 : index
    %251 = vector.load %arg2[%c11_86, %c0_87] : memref<13x256xf32, #tpu.memory_space<vmem>>, vector<1x256xf32>
    %252 = arith.subf %249, %248 : vector<1x256xf32>
    %253 = arith.addf %248, %249 : vector<1x256xf32>
    %cst_88 = arith.constant 5.000000e-01 : f32
    %254 = vector.broadcast %cst_88 : f32 to vector<1x256xf32>
    %255 = arith.mulf %253, %254 : vector<1x256xf32>
    %256 = arith.addf %250, %251 : vector<1x256xf32>
    %cst_89 = arith.constant 5.000000e-01 : f32
    %257 = vector.broadcast %cst_89 : f32 to vector<1x256xf32>
    %258 = arith.mulf %256, %257 : vector<1x256xf32>
    %cst_90 = arith.constant -1.000000e+00 : f32
    %259 = vector.broadcast %cst_90 : f32 to vector<1x256xf32>
    %260 = arith.addf %258, %259 : vector<1x256xf32>
    %cst_91 = arith.constant 0.000000e+00 : f32
    %261 = vector.broadcast %cst_91 : f32 to vector<1x256xf32>
    %262 = arith.maximumf %260, %261 : vector<1x256xf32>
    %263 = vector.broadcast %cst_91 : f32 to vector<1x256xf32>
    %264 = arith.subf %260, %263 : vector<1x256xf32>
    %265 = arith.cmpf one, %264, %264 : vector<1x256xf32>
    %266 = vector.broadcast %cst_91 : f32 to vector<1x256xf32>
    %267 = arith.addf %260, %266 : vector<1x256xf32>
    %268 = math.absf %264 : vector<1x256xf32>
    %cst_92 = arith.constant 0.000000e+00 : f32
    %269 = vector.broadcast %cst_92 : f32 to vector<1x256xf32>
    %270 = arith.subf %269, %268 : vector<1x256xf32>
    %271 = math.exp %270 : vector<1x256xf32>
    %272 = math.log1p %271 : vector<1x256xf32>
    %273 = arith.addf %262, %272 : vector<1x256xf32>
    %274 = arith.select %265, %267, %273 : vector<1x256xi1>, vector<1x256xf32>
    %275 = arith.mulf %274, %252 : vector<1x256xf32>
    %cst_93 = arith.constant 0.000000e+00 : f32
    %276 = vector.broadcast %cst_93 : f32 to vector<1x256xf32>
    %277 = arith.subf %276, %275 : vector<1x256xf32>
    %278 = math.exp %277 : vector<1x256xf32>
    %cst_94 = arith.constant 1.000000e+00 : f32
    %279 = vector.broadcast %cst_94 : f32 to vector<1x256xf32>
    %280 = arith.subf %279, %278 : vector<1x256xf32>
    %281 = arith.mulf %280, %247 : vector<1x256xf32>
    %282 = arith.mulf %281, %255 : vector<1x256xf32>
    %283 = arith.addf %234, %282 : vector<1x256xf32>
    %c10_95 = arith.constant 10 : index
    %c0_96 = arith.constant 0 : index
    %c0_97 = arith.constant 0 : index
    %284 = vector.load %arg1[%c10_95, %c0_96, %c0_97] : memref<13x4x256xf32, #tpu.memory_space<vmem>>, vector<1x4x256xf32>
    %285 = vector.shape_cast %284 : vector<1x4x256xf32> to vector<4x256xf32>
    %286 = arith.addf %232, %281 : vector<1x256xf32>
    %cst_98 = arith.constant 5.000000e-01 : f32
    %287 = vector.broadcast %cst_98 : f32 to vector<1x256xf32>
    %288 = arith.mulf %287, %286 : vector<1x256xf32>
    %289 = vector.broadcast %288 : vector<1x256xf32> to vector<4x256xf32>
    %290 = arith.mulf %289, %285 : vector<4x256xf32>
    %291 = arith.addf %242, %290 : vector<4x256xf32>
    %cst_99 = arith.constant 1.000000e+00 : f32
    %292 = vector.broadcast %cst_99 : f32 to vector<1x256xf32>
    %293 = arith.subf %292, %280 : vector<1x256xf32>
    %cst_100 = arith.constant 1.000000e-10 : f32
    %294 = vector.broadcast %cst_100 : f32 to vector<1x256xf32>
    %295 = arith.addf %293, %294 : vector<1x256xf32>
    %296 = arith.mulf %247, %295 : vector<1x256xf32>
    %c11_101 = arith.constant 11 : index
    %c0_102 = arith.constant 0 : index
    %297 = vector.load %arg3[%c11_101, %c0_102] : memref<13x256xf32, #tpu.memory_space<vmem>>, vector<1x256xf32>
    %c12 = arith.constant 12 : index
    %c0_103 = arith.constant 0 : index
    %298 = vector.load %arg3[%c12, %c0_103] : memref<13x256xf32, #tpu.memory_space<vmem>>, vector<1x256xf32>
    %c11_104 = arith.constant 11 : index
    %c0_105 = arith.constant 0 : index
    %299 = vector.load %arg2[%c11_104, %c0_105] : memref<13x256xf32, #tpu.memory_space<vmem>>, vector<1x256xf32>
    %c12_106 = arith.constant 12 : index
    %c0_107 = arith.constant 0 : index
    %300 = vector.load %arg2[%c12_106, %c0_107] : memref<13x256xf32, #tpu.memory_space<vmem>>, vector<1x256xf32>
    %301 = arith.subf %298, %297 : vector<1x256xf32>
    %302 = arith.addf %297, %298 : vector<1x256xf32>
    %cst_108 = arith.constant 5.000000e-01 : f32
    %303 = vector.broadcast %cst_108 : f32 to vector<1x256xf32>
    %304 = arith.mulf %302, %303 : vector<1x256xf32>
    %305 = arith.addf %299, %300 : vector<1x256xf32>
    %cst_109 = arith.constant 5.000000e-01 : f32
    %306 = vector.broadcast %cst_109 : f32 to vector<1x256xf32>
    %307 = arith.mulf %305, %306 : vector<1x256xf32>
    %cst_110 = arith.constant -1.000000e+00 : f32
    %308 = vector.broadcast %cst_110 : f32 to vector<1x256xf32>
    %309 = arith.addf %307, %308 : vector<1x256xf32>
    %cst_111 = arith.constant 0.000000e+00 : f32
    %310 = vector.broadcast %cst_111 : f32 to vector<1x256xf32>
    %311 = arith.maximumf %309, %310 : vector<1x256xf32>
    %312 = vector.broadcast %cst_111 : f32 to vector<1x256xf32>
    %313 = arith.subf %309, %312 : vector<1x256xf32>
    %314 = arith.cmpf one, %313, %313 : vector<1x256xf32>
    %315 = vector.broadcast %cst_111 : f32 to vector<1x256xf32>
    %316 = arith.addf %309, %315 : vector<1x256xf32>
    %317 = math.absf %313 : vector<1x256xf32>
    %cst_112 = arith.constant 0.000000e+00 : f32
    %318 = vector.broadcast %cst_112 : f32 to vector<1x256xf32>
    %319 = arith.subf %318, %317 : vector<1x256xf32>
    %320 = math.exp %319 : vector<1x256xf32>
    %321 = math.log1p %320 : vector<1x256xf32>
    %322 = arith.addf %311, %321 : vector<1x256xf32>
    %323 = arith.select %314, %316, %322 : vector<1x256xi1>, vector<1x256xf32>
    %324 = arith.mulf %323, %301 : vector<1x256xf32>
    %cst_113 = arith.constant 0.000000e+00 : f32
    %325 = vector.broadcast %cst_113 : f32 to vector<1x256xf32>
    %326 = arith.subf %325, %324 : vector<1x256xf32>
    %327 = math.exp %326 : vector<1x256xf32>
    %cst_114 = arith.constant 1.000000e+00 : f32
    %328 = vector.broadcast %cst_114 : f32 to vector<1x256xf32>
    %329 = arith.subf %328, %327 : vector<1x256xf32>
    %330 = arith.mulf %329, %296 : vector<1x256xf32>
    %331 = arith.mulf %330, %304 : vector<1x256xf32>
    %332 = arith.addf %283, %331 : vector<1x256xf32>
    %c11_115 = arith.constant 11 : index
    %c0_116 = arith.constant 0 : index
    %c0_117 = arith.constant 0 : index
    %333 = vector.load %arg1[%c11_115, %c0_116, %c0_117] : memref<13x4x256xf32, #tpu.memory_space<vmem>>, vector<1x4x256xf32>
    %334 = vector.shape_cast %333 : vector<1x4x256xf32> to vector<4x256xf32>
    %335 = arith.addf %281, %330 : vector<1x256xf32>
    %cst_118 = arith.constant 5.000000e-01 : f32
    %336 = vector.broadcast %cst_118 : f32 to vector<1x256xf32>
    %337 = arith.mulf %336, %335 : vector<1x256xf32>
    %338 = vector.broadcast %337 : vector<1x256xf32> to vector<4x256xf32>
    %339 = arith.mulf %338, %334 : vector<4x256xf32>
    %340 = arith.addf %291, %339 : vector<4x256xf32>
    %cst_119 = arith.constant 1.000000e+00 : f32
    %341 = vector.broadcast %cst_119 : f32 to vector<1x256xf32>
    %342 = arith.subf %341, %329 : vector<1x256xf32>
    %cst_120 = arith.constant 1.000000e-10 : f32
    %343 = vector.broadcast %cst_120 : f32 to vector<1x256xf32>
    %344 = arith.addf %342, %343 : vector<1x256xf32>
    %345 = arith.mulf %296, %344 : vector<1x256xf32>
    %c12_121 = arith.constant 12 : index
    %c0_122 = arith.constant 0 : index
    %346 = vector.load %arg3[%c12_121, %c0_122] : memref<13x256xf32, #tpu.memory_space<vmem>>, vector<1x256xf32>
    %c12_123 = arith.constant 12 : index
    %c0_124 = arith.constant 0 : index
    %347 = vector.load %arg2[%c12_123, %c0_124] : memref<13x256xf32, #tpu.memory_space<vmem>>, vector<1x256xf32>
    %cst_125 = arith.constant -1.000000e+00 : f32
    %348 = vector.broadcast %cst_125 : f32 to vector<1x256xf32>
    %349 = arith.addf %347, %348 : vector<1x256xf32>
    %cst_126 = arith.constant 0.000000e+00 : f32
    %350 = vector.broadcast %cst_126 : f32 to vector<1x256xf32>
    %351 = arith.maximumf %349, %350 : vector<1x256xf32>
    %352 = vector.broadcast %cst_126 : f32 to vector<1x256xf32>
    %353 = arith.subf %349, %352 : vector<1x256xf32>
    %354 = arith.cmpf one, %353, %353 : vector<1x256xf32>
    %355 = vector.broadcast %cst_126 : f32 to vector<1x256xf32>
    %356 = arith.addf %349, %355 : vector<1x256xf32>
    %357 = math.absf %353 : vector<1x256xf32>
    %cst_127 = arith.constant 0.000000e+00 : f32
    %358 = vector.broadcast %cst_127 : f32 to vector<1x256xf32>
    %359 = arith.subf %358, %357 : vector<1x256xf32>
    %360 = math.exp %359 : vector<1x256xf32>
    %361 = math.log1p %360 : vector<1x256xf32>
    %362 = arith.addf %351, %361 : vector<1x256xf32>
    %363 = arith.select %354, %356, %362 : vector<1x256xi1>, vector<1x256xf32>
    %364 = arith.mulf %363, %3 : vector<1x256xf32>
    %cst_128 = arith.constant 0.000000e+00 : f32
    %365 = vector.broadcast %cst_128 : f32 to vector<1x256xf32>
    %366 = arith.subf %365, %364 : vector<1x256xf32>
    %367 = math.exp %366 : vector<1x256xf32>
    %cst_129 = arith.constant 1.000000e+00 : f32
    %368 = vector.broadcast %cst_129 : f32 to vector<1x256xf32>
    %369 = arith.subf %368, %367 : vector<1x256xf32>
    %370 = arith.mulf %369, %345 : vector<1x256xf32>
    %371 = arith.mulf %370, %346 : vector<1x256xf32>
    %372 = arith.addf %332, %371 : vector<1x256xf32>
    %c12_130 = arith.constant 12 : index
    %c0_131 = arith.constant 0 : index
    %c0_132 = arith.constant 0 : index
    %373 = vector.load %arg1[%c12_130, %c0_131, %c0_132] : memref<13x4x256xf32, #tpu.memory_space<vmem>>, vector<1x4x256xf32>
    %374 = vector.shape_cast %373 : vector<1x4x256xf32> to vector<4x256xf32>
    %cst_133 = arith.constant 5.000000e-01 : f32
    %375 = vector.broadcast %cst_133 : f32 to vector<1x256xf32>
    %376 = arith.mulf %375, %330 : vector<1x256xf32>
    %377 = arith.addf %376, %370 : vector<1x256xf32>
    %378 = vector.broadcast %377 : vector<1x256xf32> to vector<4x256xf32>
    %379 = arith.mulf %378, %374 : vector<4x256xf32>
    %380 = arith.addf %340, %379 : vector<4x256xf32>
    %cst_134 = arith.constant 1.000000e+00 : f32
    %381 = vector.broadcast %cst_134 : f32 to vector<1x256xf32>
    %382 = arith.subf %381, %369 : vector<1x256xf32>
    %cst_135 = arith.constant 1.000000e-10 : f32
    %383 = vector.broadcast %cst_135 : f32 to vector<1x256xf32>
    %384 = arith.addf %382, %383 : vector<1x256xf32>
    %385 = arith.mulf %345, %384 : vector<1x256xf32>
    %386 = tpu.concatenate %183, %232, %281, %330, %370 in 0 : vector<1x256xf32>, vector<1x256xf32>, vector<1x256xf32>, vector<1x256xf32>, vector<1x256xf32> -> vector<5x256xf32>
    %c8_136 = arith.constant 8 : index
    %c0_137 = arith.constant 0 : index
    %387 = vector.load %arg5[%c8_136, %c0_137] : memref<13x256xf32, #tpu.memory_space<vmem>>, vector<5x256xf32>
    tpu.vector_store %arg5[%c8_136, %c0_137], %386 {strides = array<i32>} : memref<13x256xf32, #tpu.memory_space<vmem>>, vector<5x256xf32>,
    %cst_138 = arith.constant 2.000000e+00 : f32
    %388 = vector.broadcast %cst_138 : f32 to vector<4x256xf32>
    %389 = arith.mulf %380, %388 : vector<4x256xf32>
    %cst_139 = arith.constant 1.000000e+00 : f32
    %390 = vector.broadcast %cst_139 : f32 to vector<4x256xf32>
    %391 = arith.subf %389, %390 : vector<4x256xf32>
    %392 = tpu.concatenate %391, %372, %385 in 0 : vector<4x256xf32>, vector<1x256xf32>, vector<1x256xf32> -> vector<6x256xf32>
    %c0_140 = arith.constant 0 : index
    %c0_141 = arith.constant 0 : index
    %393 = vector.load %arg4[%c0_140, %c0_141] : memref<6x256xf32, #tpu.memory_space<vmem>>, vector<6x256xf32>
    tpu.vector_store %arg4[%c0_140, %c0_141], %392 {strides = array<i32>} : memref<6x256xf32, #tpu.memory_space<vmem>>, vector<6x256xf32>,
    return
  }
  func.func @transform_0(%arg0: i32) -> (i32, i32, i32) {
    %c0_i32 = arith.constant 0 : i32
    %c0_i32_0 = arith.constant 0 : i32
    %c0_i32_1 = arith.constant 0 : i32
    return %c0_i32, %c0_i32_0, %arg0 : i32, i32, i32
  }
  func.func @transform_1(%arg0: i32) -> (i32, i32) {
    %c0_i32 = arith.constant 0 : i32
    %c0_i32_0 = arith.constant 0 : i32
    return %c0_i32, %arg0 : i32, i32
  }
  func.func @transform_2(%arg0: i32) -> (i32, i32) {
    %c0_i32 = arith.constant 0 : i32
    %c0_i32_0 = arith.constant 0 : i32
    return %c0_i32, %arg0 : i32, i32
  }
  func.func @transform_3(%arg0: i32) -> (i32, i32) {
    %c0_i32 = arith.constant 0 : i32
    %c0_i32_0 = arith.constant 0 : i32
    return %c0_i32, %arg0 : i32, i32
  }
  func.func @transform_4(%arg0: i32) -> (i32, i32) {
    %c0_i32 = arith.constant 0 : i32
    %c0_i32_0 = arith.constant 0 : i32
    return %c0_i32, %arg0 : i32, i32
  }
}

</mosaic_0001>

<bundles_post_ra>
// kernel: mip_ray_marcher2.1
= control target key start
LH: loop header
LB: loop body
LE: loop exit
PB: predicated region body
PF: predicated region fallthrough
CT: control target
= control target key end

     0   :  { %s8079_s0 = inlined_call_operand.vmem [shape: f32[13,4,384], index: 0, kind: input, shape index: {}]   ;;  %s8080_s1 = inlined_call_operand.vmem [shape: f32[13,384], index: 1, kind: input, shape index: {}]   ;;  %s8081_s2 = inlined_call_operand.vmem [shape: f32[13,384], index: 2, kind: input, shape index: {}]   ;;  %s8082_s3 = inlined_call_operand.vmem [shape: f32[6,384], index: 3, kind: output, shape index: {0}]   ;;  %s8083_s4 = inlined_call_operand.vmem [shape: f32[13,384], index: 4, kind: output, shape index: {1}]  }
   0x1   :  { %8087 = sst [smem:[#allocation7_spill]] %s8079_s0 }
   0x2   :  { %s5746_s15 = smov 0   ;;  %s5748_s16 = smov 0  }
   0x3   :  { %s5750_s17 = smov 0  }
   0x4 LB: > { %s5762_s18 = sadd.s32 4294967295, %s5388_s17   ;;  %s5765_s19 = sadd.s32 1, %s5388_s17   ;;  %s5388_s17 = sphi %s5750_s17, %s8168_s17   ;;  %s5384_s16 = sphi %s5748_s16, %s8167_s16   ;;  %s5380_s15 = sphi %s5746_s15, %s8166_s15  }
   0x5   : > { %s19_s20 = ssub.s32 %s5388_s17, %s5765_s19  ;;  %s22_s21 = sadd.s32 1, %s5384_s16 }
   0x6   : > { %p20_p0 = scmp.eq.s32.totalorder %s19_s20, 0  ;;  %p29_p1 = scmp.ne.s32.totalorder %s5384_s16, %s5380_s15 }
   0x7   : > { %p30_p2 = scmp.eq.s32.totalorder %s5388_s17, 0  ;;  %p111_p3 = scmp.eq.s32.totalorder %s5762_s18, 1 }
   0x8   : > { %s5775_s22 = scalar_select %p20_p0, %s5384_s16, %s22_s21  }
   0x9   : > { %p5777_p4 = por %p30_p2, %p29_p1  ;;  %p5781_p5 = por %p111_p3, %p29_p1 }
   0xa   : > { %p4112_p6 = scmp.ge.s32.totalorder %s5388_s17, 2 }
   0xc   : > { %159 = sbr.rel (%p4112_p6) target bundleno = 395 (0x18b), region = 16 }
  0x11   : > { %162 = sbr.rel (!%p5777_p4) target bundleno = 149 (0x95), region = 20  ;;  %s164_s25 = sand.u32 (%p5777_p4), 1, %s5384_s16  }
  0x12   : > { %s4113_s26 = sshll.u32 (%p5777_p4), %s5388_s17, 1  ;;  %s4314_s27 = smul.u32 (%p5777_p4), 104, %s164_s25 }
  0x13   : > { %s168_s28 = ssub.s32 (%p5777_p4), 3, %s4113_s26  ;;  %s4289_s29 = sshll.u32 (%p5777_p4), %s5388_s17, 3 }
  0x14   : > { %p169_p7 = scmp.lt.s32.totalorder (%p5777_p4), %s168_s28, 2  ;;  %s8090_s0 = sld [smem:[#allocation7_spill]] (%p5777_p4) }
  0x15   : > { %s5798_s9 = scalar_lea.vmem (%p5777_p4), [#allocation2], %s4314_s27  }
  0x16   : > { %s8170_s28 = smov (!%p169_p7, %s168_s28), 2 }
  0x17   : > { %s171_s7 = smul.u32 832, %s8170_s28  ;;  %s5796_s8 = sshll.u32 %s8170_s28, 2 }
  0x19   : > { %p4117_p8 = scmp.eq.s32.totalorder %s171_s7, 0 }
  0x1a   : > { %s5794_s6 = scalar_lea.vmem %s8090_s0, %s4289_s29   ;;  %p179_p9 = scmp.lt.u32.totalorder (!%p4117_p8), %s5796_s8, 8 }
  0x1b   : > { %178 = sbr.rel (%p4117_p8) target bundleno = 149 (0x95), region = 24 }
  0x20   : > { %182 = sbr.rel (%p179_p9) target bundleno = 128 (0x80), region = 28  ;;  %s5802_s10 = sand.u32 (!%p179_p9), 7, %s5796_s8  }
  0x21   : > { %p223_p10 = scmp.eq.s32.totalorder (!%p179_p9), %s5802_s10, 0  ;;  %p4118_p11 = scmp.ne.s32.totalorder (!%p179_p9), %s5802_s10, 0 }
  0x25   : > { %226 = sbr.rel (%p4118_p11) target bundleno = 74 (0x4a), region = 43  ;;  %s227_s11 = sshrl.u32 (!%p4118_p11), %s5796_s8, 3 }
  0x26   : > { %s5809_s12 = sshrl.u32 (!%p4118_p11), %s227_s11, 3 }
  0x27   : > { %p4119_p12 = scmp.le.s32.totalorder (!%p4118_p11), %s5809_s12, 0 }
  0x2a   : > { %3793 = sbr.rel (%p4119_p12) target bundleno = 58 (0x3a), region = 537  ;;  %s8091_s13 = smov (!%p4119_p12), %s5798_s9 }
  0x2b   : > { %s8092_s14 = smov (!%p4119_p12), %s5794_s6  ;;  %s5818_s20 = smov (!%p4119_p12), 0  }
  0x2c   : > { %s5820_s21 = smov (!%p4119_p12), 0  }
  0x2f LB: >> { %v240_v0 = vld [vmem:[%s5396_s14] sm:$0xff]  ;;  %v256_v1 = vld [vmem:[%s5396_s14 + $0xc] sm:$0xff]  ;;  %v272_v2 = vld [vmem:[%s5396_s14 + $0x18] sm:$0xff]  ;;  %s448_s25 = sadd.s32 1, %s5400_s20  ;;  %s234_s21 = sadd.s32 1, %s5404_s21   ;;  %s5404_s21 = sphi %s5820_s21, %s234_s21   ;;  %s5400_s20 = sphi %s5818_s20, %s8093_s20   ;;  %s5396_s14 = sphi %s8092_s14, %s453_s14   ;;  %s5392_s13 = sphi %s8091_s13, %s454_s13  }
  0x30   : >> { %241 = vst [vmem:[%s5392_s13] sm:$0xff] %v240_v0  ;;  %257 = vst [vmem:[%s5392_s13 + $0x8] sm:$0xff] %v256_v1  ;;  %v288_v3 = vld [vmem:[%s5396_s14 + $0x24] sm:$0xff]  ;;  %v304_v4 = vld [vmem:[%s5396_s14 + $0x30] sm:$0xff]  ;;  %p449_p13 = scmp.ge.s32.totalorder %s448_s25, %s5809_s12  ;;  %p233_p0 = scmp.ge.s32.totalorder %s234_s21, %s5809_s12 }
  0x31   : >> { %273 = vst [vmem:[%s5392_s13 + $0x10] sm:$0xff] %v272_v2  ;;  %v320_v5 = vld [vmem:[%s5396_s14 + $0x3c] sm:$0xff]  ;;  %289 = vst [vmem:[%s5392_s13 + $0x18] sm:$0xff] %v288_v3  ;;  %v336_v6 = vld [vmem:[%s5396_s14 + $0x48] sm:$0xff] }
  0x32   : >> { %305 = vst [vmem:[%s5392_s13 + $0x20] sm:$0xff] %v304_v4  ;;  %321 = vst [vmem:[%s5392_s13 + $0x28] sm:$0xff] %v320_v5  ;;  %v352_v7 = vld [vmem:[%s5396_s14 + $0x54] sm:$0xff]  ;;  %v368_v8 = vld [vmem:[%s5396_s14 + $0x60] sm:$0xff]  ;;  %s8172_s25 = smov (%p449_p13, %s448_s25), 0 }
  0x33   : >> { %337 = vst [vmem:[%s5392_s13 + $0x30] sm:$0xff] %v336_v6  ;;  %353 = vst [vmem:[%s5392_s13 + $0x38] sm:$0xff] %v352_v7  ;;  %v384_v9 = vld [vmem:[%s5396_s14 + $0x6c] sm:$0xff]  ;;  %v400_v10 = vld [vmem:[%s5396_s14 + $0x78] sm:$0xff]  ;;  %s4120_s26 = sshll.u32 %s8172_s25, 6  ;;  %s8093_s20 = smov %s8172_s25 }
  0x34   : >> { %369 = vst [vmem:[%s5392_s13 + $0x40] sm:$0xff] %v368_v8  ;;  %v416_v11 = vld [vmem:[%s5396_s14 + $0x84] sm:$0xff]  ;;  %385 = vst [vmem:[%s5392_s13 + $0x48] sm:$0xff] %v384_v9  ;;  %v432_v12 = vld [vmem:[%s5396_s14 + $0x90] sm:$0xff] }
  0x35   : >> { %401 = vst [vmem:[%s5392_s13 + $0x50] sm:$0xff] %v400_v10  ;;  %417 = vst [vmem:[%s5392_s13 + $0x58] sm:$0xff] %v416_v11  ;;  %v434_v13 = vld [vmem:[%s5396_s14 + $0x98] sm:$0xff]  ;;  %v436_v14 = vld [vmem:[%s5396_s14 + $0xa0] sm:$0xff]  ;;  %236 = sbr.rel (!%p233_p0) target bundleno = 47 (0x2f), region = 543 }
  0x36   : >> { %433 = vst [vmem:[%s5392_s13 + $0x60] sm:$0xff] %v432_v12  ;;  %435 = vst [vmem:[%s5392_s13 + $0x68] sm:$0xff] %v434_v13  ;;  %v438_v15 = vld [vmem:[%s5396_s14 + $0xa8] sm:$0xff]  ;;  %v440_v16 = vld [vmem:[%s5396_s14 + $0xb0] sm:$0xff] }
  0x37   : >> { %437 = vst [vmem:[%s5392_s13 + $0x70] sm:$0xff] %v436_v14  ;;  %v442_v17 = vld [vmem:[%s5396_s14 + $0xb8] sm:$0xff]  ;;  %439 = vst [vmem:[%s5392_s13 + $0x78] sm:$0xff] %v438_v15  ;;  %v444_v18 = vld [vmem:[%s5396_s14 + $0xc0] sm:$0xff] }
  0x38   : >> { %441 = vst [vmem:[%s5392_s13 + $0x80] sm:$0xff] %v440_v16  ;;  %443 = vst [vmem:[%s5392_s13 + $0x88] sm:$0xff] %v442_v17  ;;  %v446_v19 = vld [vmem:[%s5396_s14 + $0xc8] sm:$0xff]  ;;  %s453_s14 = scalar_lea.vmem %s5794_s6, %s4120_s26  }
  0x39   : >> { %445 = vst [vmem:[%s5392_s13 + $0x90] sm:$0xff] %v444_v18  ;;  %447 = vst [vmem:[%s5392_s13 + $0x98] sm:$0xff] %v446_v19  ;;  %s454_s13 = scalar_lea.vmem %s5798_s9, %s4120_s26 [#allocation2]  }
  0x3a PF: > { %s5890_s27 = sand.u32 7, %s227_s11   ;;  %s4290_s28 = sshll.u32 %s5809_s12, 10 }
  0x3b   : > { %s459_s29 = sshra.s32 %s4290_s28, 4  ;;  %p4125_p1 = scmp.le.s32.totalorder %s5890_s27, 0 }
  0x3c   : > { %s5894_s30 = scalar_lea.vmem %s5794_s6, %s459_s29   ;;  %s5897_s5 = scalar_lea.vmem %s5798_s9, %s459_s29 [#allocation2]  }
  0x3d   : > { %3807 = sbr.rel (%p4125_p1) target bundleno = 74 (0x4a), region = 548  ;;  %s8094_s7 = smov (!%p4125_p1), %s5897_s5 }
  0x3e   : > { %s8095_s13 = smov (!%p4125_p1), %s5894_s30  ;;  %s5906_s14 = smov (!%p4125_p1), 0  }
  0x3f   : > { %s5908_s20 = smov (!%p4125_p1), 0  }
  0x42 LB: >> { %v475_v20 = vld [vmem:[%s5412_s13] sm:$0xff]  ;;  %v477_v21 = vld [vmem:[%s5412_s13 + $0xc] sm:$0xff]  ;;  %v479_v22 = vld [vmem:[%s5412_s13 + $0x18] sm:$0xff]  ;;  %s501_s11 = sadd.s32 1, %s5416_s14  ;;  %s469_s20 = sadd.s32 1, %s5420_s20   ;;  %s5420_s20 = sphi %s5908_s20, %s469_s20   ;;  %s5416_s14 = sphi %s5906_s14, %s8096_s14   ;;  %s5412_s13 = sphi %s8095_s13, %s506_s13   ;;  %s5408_s7 = sphi %s8094_s7, %s507_s7  }
  0x43   : >> { %476 = vst [vmem:[%s5408_s7] sm:$0xff] %v475_v20  ;;  %478 = vst [vmem:[%s5408_s7 + $0x8] sm:$0xff] %v477_v21  ;;  %v481_v23 = vld [vmem:[%s5412_s13 + $0x24] sm:$0xff]  ;;  %v483_v24 = vld [vmem:[%s5412_s13 + $0x30] sm:$0xff]  ;;  %p502_p2 = scmp.ge.s32.totalorder %s501_s11, %s5890_s27  ;;  %p468_p3 = scmp.ge.s32.totalorder %s469_s20, %s5890_s27 }
  0x44   : >> { %480 = vst [vmem:[%s5408_s7 + $0x10] sm:$0xff] %v479_v22  ;;  %v485_v25 = vld [vmem:[%s5412_s13 + $0x3c] sm:$0xff]  ;;  %482 = vst [vmem:[%s5408_s7 + $0x18] sm:$0xff] %v481_v23  ;;  %v487_v26 = vld [vmem:[%s5412_s13 + $0x48] sm:$0xff] }
  0x45   : >> { %484 = vst [vmem:[%s5408_s7 + $0x20] sm:$0xff] %v483_v24  ;;  %486 = vst [vmem:[%s5408_s7 + $0x28] sm:$0xff] %v485_v25  ;;  %v489_v27 = vld [vmem:[%s5412_s13 + $0x54] sm:$0xff]  ;;  %v491_v28 = vld [vmem:[%s5412_s13 + $0x60] sm:$0xff]  ;;  %s8174_s11 = smov (%p502_p2, %s501_s11), 0  ;;  %471 = sbr.rel (!%p468_p3) target bundleno = 66 (0x42), region = 554 }
  0x46   : >> { %488 = vst [vmem:[%s5408_s7 + $0x30] sm:$0xff] %v487_v26  ;;  %490 = vst [vmem:[%s5408_s7 + $0x38] sm:$0xff] %v489_v27  ;;  %v493_v29 = vld [vmem:[%s5412_s13 + $0x6c] sm:$0xff]  ;;  %v495_v30 = vld [vmem:[%s5412_s13 + $0x78] sm:$0xff]  ;;  %s4126_s12 = sshll.u32 %s8174_s11, 3  ;;  %s8096_s14 = smov %s8174_s11 }
  0x47   : >> { %492 = vst [vmem:[%s5408_s7 + $0x40] sm:$0xff] %v491_v28  ;;  %v497_v31 = vld [vmem:[%s5412_s13 + $0x84] sm:$0xff]  ;;  %494 = vst [vmem:[%s5408_s7 + $0x48] sm:$0xff] %v493_v29  ;;  %v499_v32 = vld [vmem:[%s5412_s13 + $0x90] sm:$0xff]  ;;  %s506_s13 = scalar_lea.vmem %s5894_s30, %s4126_s12  }
  0x48   : >> { %496 = vst [vmem:[%s5408_s7 + $0x50] sm:$0xff] %v495_v30  ;;  %498 = vst [vmem:[%s5408_s7 + $0x58] sm:$0xff] %v497_v31 }
  0x49   : >> { %500 = vst [vmem:[%s5408_s7 + $0x60] sm:$0xff] %v499_v32  ;;  %s507_s7 = scalar_lea.vmem %s5897_s5, %s4126_s12 [#allocation2]  }
  0x4a PF: > { %510 = sbr.rel (%p223_p10) target bundleno = 128 (0x80), region = 61  ;;  %s512_s21 = ssub.s32 (!%p223_p10), %s5796_s8, %s5802_s10 }
  0x4b   : > { %s516_s25 = sshrl.u32 (!%p223_p10), %s5796_s8, 3  ;;  %s5965_s26 = scalar_lea.vmem (!%p223_p10), %s5794_s6, %s512_s21 }
  0x4c   : > { %s5968_s28 = scalar_lea.vmem (!%p223_p10), %s5798_s9, %s512_s21 [#allocation2]  ;;  %s5972_s29 = sshrl.u32 (!%p223_p10), %s516_s25, 3 }
  0x4d   : > { %p4128_p6 = scmp.le.s32.totalorder (!%p223_p10), %s5972_s29, 0 }
  0x4f   : > { %3821 = sbr.rel (%p4128_p6) target bundleno = 95 (0x5f), region = 559  ;;  %s8097_s27 = smov (!%p4128_p6), %s5798_s9 }
  0x50   : > { %s8098_s30 = smov (!%p4128_p6), %s5794_s6  ;;  %s5981_s5 = smov (!%p4128_p6), 0  }
  0x51   : > { %s5983_s7 = smov (!%p4128_p6), 0  }
  0x54 LB: >> { %v529_v33 = vld [vmem:[%s5428_s30] sm:$0xff]  ;;  %v545_v34 = vld [vmem:[%s5428_s30 + $0xc] sm:$0xff]  ;;  %v561_v35 = vld [vmem:[%s5428_s30 + $0x18] sm:$0xff]  ;;  %s737_s13 = sadd.s32 1, %s5432_s5  ;;  %s523_s7 = sadd.s32 1, %s5436_s7   ;;  %s5436_s7 = sphi %s5983_s7, %s523_s7   ;;  %s5432_s5 = sphi %s5981_s5, %s8099_s5   ;;  %s5428_s30 = sphi %s8098_s30, %s742_s30   ;;  %s5424_s27 = sphi %s8097_s27, %s743_s27  }
  0x55   : >> { %530 = vst [vmem:[%s5424_s27] sm:$0xff] %v529_v33  ;;  %546 = vst [vmem:[%s5424_s27 + $0x8] sm:$0xff] %v545_v34  ;;  %v577_v36 = vld [vmem:[%s5428_s30 + $0x24] sm:$0xff]  ;;  %v593_v37 = vld [vmem:[%s5428_s30 + $0x30] sm:$0xff]  ;;  %p738_p7 = scmp.ge.s32.totalorder %s737_s13, %s5972_s29  ;;  %p522_p8 = scmp.ge.s32.totalorder %s523_s7, %s5972_s29 }
  0x56   : >> { %562 = vst [vmem:[%s5424_s27 + $0x10] sm:$0xff] %v561_v35  ;;  %v609_v38 = vld [vmem:[%s5428_s30 + $0x3c] sm:$0xff]  ;;  %578 = vst [vmem:[%s5424_s27 + $0x18] sm:$0xff] %v577_v36  ;;  %v625_v39 = vld [vmem:[%s5428_s30 + $0x48] sm:$0xff] }
  0x57   : >> { %594 = vst [vmem:[%s5424_s27 + $0x20] sm:$0xff] %v593_v37  ;;  %610 = vst [vmem:[%s5424_s27 + $0x28] sm:$0xff] %v609_v38  ;;  %v641_v40 = vld [vmem:[%s5428_s30 + $0x54] sm:$0xff]  ;;  %v657_v41 = vld [vmem:[%s5428_s30 + $0x60] sm:$0xff]  ;;  %s8176_s13 = smov (%p738_p7, %s737_s13), 0 }
  0x58   : >> { %626 = vst [vmem:[%s5424_s27 + $0x30] sm:$0xff] %v625_v39  ;;  %642 = vst [vmem:[%s5424_s27 + $0x38] sm:$0xff] %v641_v40  ;;  %v673_v42 = vld [vmem:[%s5428_s30 + $0x6c] sm:$0xff]  ;;  %v689_v43 = vld [vmem:[%s5428_s30 + $0x78] sm:$0xff]  ;;  %s4129_s14 = sshll.u32 %s8176_s13, 6  ;;  %s8099_s5 = smov %s8176_s13 }
  0x59   : >> { %658 = vst [vmem:[%s5424_s27 + $0x40] sm:$0xff] %v657_v41  ;;  %v705_v44 = vld [vmem:[%s5428_s30 + $0x84] sm:$0xff]  ;;  %674 = vst [vmem:[%s5424_s27 + $0x48] sm:$0xff] %v673_v42  ;;  %v721_v45 = vld [vmem:[%s5428_s30 + $0x90] sm:$0xff] }
  0x5a   : >> { %690 = vst [vmem:[%s5424_s27 + $0x50] sm:$0xff] %v689_v43  ;;  %706 = vst [vmem:[%s5424_s27 + $0x58] sm:$0xff] %v705_v44  ;;  %v723_v46 = vld [vmem:[%s5428_s30 + $0x98] sm:$0xff]  ;;  %v725_v47 = vld [vmem:[%s5428_s30 + $0xa0] sm:$0xff]  ;;  %525 = sbr.rel (!%p522_p8) target bundleno = 84 (0x54), region = 565 }
  0x5b   : >> { %722 = vst [vmem:[%s5424_s27 + $0x60] sm:$0xff] %v721_v45  ;;  %724 = vst [vmem:[%s5424_s27 + $0x68] sm:$0xff] %v723_v46  ;;  %v727_v48 = vld [vmem:[%s5428_s30 + $0xa8] sm:$0xff]  ;;  %v729_v49 = vld [vmem:[%s5428_s30 + $0xb0] sm:$0xff] }
  0x5c   : >> { %726 = vst [vmem:[%s5424_s27 + $0x70] sm:$0xff] %v725_v47  ;;  %v731_v50 = vld [vmem:[%s5428_s30 + $0xb8] sm:$0xff]  ;;  %728 = vst [vmem:[%s5424_s27 + $0x78] sm:$0xff] %v727_v48  ;;  %v733_v51 = vld [vmem:[%s5428_s30 + $0xc0] sm:$0xff] }
  0x5d   : >> { %730 = vst [vmem:[%s5424_s27 + $0x80] sm:$0xff] %v729_v49  ;;  %732 = vst [vmem:[%s5424_s27 + $0x88] sm:$0xff] %v731_v50  ;;  %v735_v52 = vld [vmem:[%s5428_s30 + $0xc8] sm:$0xff]  ;;  %s742_s30 = scalar_lea.vmem %s5794_s6, %s4129_s14  }
  0x5e   : >> { %734 = vst [vmem:[%s5424_s27 + $0x90] sm:$0xff] %v733_v51  ;;  %736 = vst [vmem:[%s5424_s27 + $0x98] sm:$0xff] %v735_v52  ;;  %s743_s27 = scalar_lea.vmem %s5798_s9, %s4129_s14 [#allocation2]  }
  0x5f PF: > { %s6053_s20 = sand.u32 7, %s516_s25   ;;  %s4292_s11 = sshll.u32 %s5972_s29, 10 }
  0x60   : > { %s748_s12 = sshra.s32 %s4292_s11, 4  ;;  %p4134_p9 = scmp.le.s32.totalorder %s6053_s20, 0 }
  0x61   : > { %s6057_s21 = scalar_lea.vmem %s5794_s6, %s748_s12   ;;  %s6060_s14 = scalar_lea.vmem %s5798_s9, %s748_s12 [#allocation2]  }
  0x62   : > { %3835 = sbr.rel (%p4134_p9) target bundleno = 111 (0x6f), region = 570  ;;  %s8100_s27 = smov (!%p4134_p9), %s6060_s14 }
  0x63   : > { %s8101_s30 = smov (!%p4134_p9), %s6057_s21  ;;  %s6069_s5 = smov (!%p4134_p9), 0  }
  0x64   : > { %s6071_s7 = smov (!%p4134_p9), 0  }
  0x67 LB: >> { %v764_v53 = vld [vmem:[%s5444_s30] sm:$0xff]  ;;  %v766_v54 = vld [vmem:[%s5444_s30 + $0xc] sm:$0xff]  ;;  %v768_v55 = vld [vmem:[%s5444_s30 + $0x18] sm:$0xff]  ;;  %s790_s25 = sadd.s32 1, %s5448_s5  ;;  %s758_s7 = sadd.s32 1, %s5452_s7   ;;  %s5452_s7 = sphi %s6071_s7, %s758_s7   ;;  %s5448_s5 = sphi %s6069_s5, %s8102_s5   ;;  %s5444_s30 = sphi %s8101_s30, %s795_s30   ;;  %s5440_s27 = sphi %s8100_s27, %s796_s27  }
  0x68   : >> { %765 = vst [vmem:[%s5440_s27] sm:$0xff] %v764_v53  ;;  %767 = vst [vmem:[%s5440_s27 + $0x8] sm:$0xff] %v766_v54  ;;  %v770_v56 = vld [vmem:[%s5444_s30 + $0x24] sm:$0xff]  ;;  %v772_v57 = vld [vmem:[%s5444_s30 + $0x30] sm:$0xff]  ;;  %p791_p10 = scmp.ge.s32.totalorder %s790_s25, %s6053_s20  ;;  %p757_p11 = scmp.ge.s32.totalorder %s758_s7, %s6053_s20 }
  0x69   : >> { %769 = vst [vmem:[%s5440_s27 + $0x10] sm:$0xff] %v768_v55  ;;  %v774_v58 = vld [vmem:[%s5444_s30 + $0x3c] sm:$0xff]  ;;  %771 = vst [vmem:[%s5440_s27 + $0x18] sm:$0xff] %v770_v56  ;;  %v776_v59 = vld [vmem:[%s5444_s30 + $0x48] sm:$0xff] }
  0x6a   : >> { %773 = vst [vmem:[%s5440_s27 + $0x20] sm:$0xff] %v772_v57  ;;  %775 = vst [vmem:[%s5440_s27 + $0x28] sm:$0xff] %v774_v58  ;;  %v778_v60 = vld [vmem:[%s5444_s30 + $0x54] sm:$0xff]  ;;  %v780_v61 = vld [vmem:[%s5444_s30 + $0x60] sm:$0xff]  ;;  %s8178_s25 = smov (%p791_p10, %s790_s25), 0  ;;  %760 = sbr.rel (!%p757_p11) target bundleno = 103 (0x67), region = 576 }
  0x6b   : >> { %777 = vst [vmem:[%s5440_s27 + $0x30] sm:$0xff] %v776_v59  ;;  %779 = vst [vmem:[%s5440_s27 + $0x38] sm:$0xff] %v778_v60  ;;  %v782_v62 = vld [vmem:[%s5444_s30 + $0x6c] sm:$0xff]  ;;  %v784_v63 = vld [vmem:[%s5444_s30 + $0x78] sm:$0xff]  ;;  %s4135_s29 = sshll.u32 %s8178_s25, 3  ;;  %s8102_s5 = smov %s8178_s25 }
  0x6c   : >> { %781 = vst [vmem:[%s5440_s27 + $0x40] sm:$0xff] %v780_v61  ;;  %v786_v0 = vld [vmem:[%s5444_s30 + $0x84] sm:$0xff]  ;;  %783 = vst [vmem:[%s5440_s27 + $0x48] sm:$0xff] %v782_v62  ;;  %v788_v1 = vld [vmem:[%s5444_s30 + $0x90] sm:$0xff]  ;;  %s795_s30 = scalar_lea.vmem %s6057_s21, %s4135_s29  }
  0x6d   : >> { %785 = vst [vmem:[%s5440_s27 + $0x50] sm:$0xff] %v784_v63  ;;  %787 = vst [vmem:[%s5440_s27 + $0x58] sm:$0xff] %v786_v0 }
  0x6e   : >> { %789 = vst [vmem:[%s5440_s27 + $0x60] sm:$0xff] %v788_v1  ;;  %s796_s27 = scalar_lea.vmem %s6060_s14, %s4135_s29 [#allocation2]  }
  0x6f PF: > { %s5710_s13 = smov 1  }
  0x70   : > { %s797_s11 = sshll.u32 %s5710_s13, %s5802_s10 }
  0x71   : > { %s4137_s12 = sadd.s32 4294967295, %s797_s11 }
  0x72   : > { %v807_v2 = vld [vmem:[%s5965_s26] sm:%s4137_s12]  ;;  %v809_v3 = vld [vmem:[%s5965_s26 + $0xc] sm:%s4137_s12] }
  0x73   : > { %808 = vst [vmem:[%s5968_s28] sm:%s4137_s12] %v807_v2  ;;  %810 = vst [vmem:[%s5968_s28 + $0x8] sm:%s4137_s12] %v809_v3 }
  0x74   : > { %v811_v4 = vld [vmem:[%s5965_s26 + $0x18] sm:%s4137_s12]  ;;  %v813_v5 = vld [vmem:[%s5965_s26 + $0x24] sm:%s4137_s12] }
  0x75   : > { %812 = vst [vmem:[%s5968_s28 + $0x10] sm:%s4137_s12] %v811_v4  ;;  %814 = vst [vmem:[%s5968_s28 + $0x18] sm:%s4137_s12] %v813_v5 }
  0x76   : > { %v815_v6 = vld [vmem:[%s5965_s26 + $0x30] sm:%s4137_s12]  ;;  %v817_v7 = vld [vmem:[%s5965_s26 + $0x3c] sm:%s4137_s12] }
  0x77   : > { %816 = vst [vmem:[%s5968_s28 + $0x20] sm:%s4137_s12] %v815_v6  ;;  %818 = vst [vmem:[%s5968_s28 + $0x28] sm:%s4137_s12] %v817_v7 }
  0x78   : > { %v819_v8 = vld [vmem:[%s5965_s26 + $0x48] sm:%s4137_s12]  ;;  %v821_v9 = vld [vmem:[%s5965_s26 + $0x54] sm:%s4137_s12] }
  0x79   : > { %820 = vst [vmem:[%s5968_s28 + $0x30] sm:%s4137_s12] %v819_v8  ;;  %822 = vst [vmem:[%s5968_s28 + $0x38] sm:%s4137_s12] %v821_v9 }
  0x7a   : > { %v823_v10 = vld [vmem:[%s5965_s26 + $0x60] sm:%s4137_s12]  ;;  %v825_v11 = vld [vmem:[%s5965_s26 + $0x6c] sm:%s4137_s12] }
  0x7b   : > { %824 = vst [vmem:[%s5968_s28 + $0x40] sm:%s4137_s12] %v823_v10  ;;  %826 = vst [vmem:[%s5968_s28 + $0x48] sm:%s4137_s12] %v825_v11 }
  0x7c   : > { %v827_v12 = vld [vmem:[%s5965_s26 + $0x78] sm:%s4137_s12]  ;;  %v829_v13 = vld [vmem:[%s5965_s26 + $0x84] sm:%s4137_s12] }
  0x7d   : > { %828 = vst [vmem:[%s5968_s28 + $0x50] sm:%s4137_s12] %v827_v12  ;;  %830 = vst [vmem:[%s5968_s28 + $0x58] sm:%s4137_s12] %v829_v13 }
  0x7e   : > { %v831_v14 = vld [vmem:[%s5965_s26 + $0x90] sm:%s4137_s12] }
  0x7f   : > { %832 = vst [vmem:[%s5968_s28 + $0x60] sm:%s4137_s12] %v831_v14 }
  0x80 PF: > { %p4138_p12 = scmp.ge.u32.totalorder %s5796_s8, 8 }
  0x81   : > { %s5711_s10 = smov (!%p4138_p12), 1  }
  0x82   : > { %185 = sbr.rel (%p4138_p12) target bundleno = 149 (0x95), region = 32  ;;  %s186_s26 = sshll.u32 (!%p4138_p12), %s5711_s10, %s5796_s8 }
  0x83   : > { %s4139_s28 = sadd.s32 (!%p4138_p12), 4294967295, %s186_s26 }
  0x87   : > { %v196_v15 = vld [vmem:[%s5794_s6] sm:%s4139_s28]  ;;  %v198_v16 = vld [vmem:[%s5794_s6 + $0xc] sm:%s4139_s28] }
  0x88   : > { %197 = vst [vmem:[%s5798_s9] sm:%s4139_s28] %v196_v15  ;;  %199 = vst [vmem:[%s5798_s9 + $0x8] sm:%s4139_s28] %v198_v16 }
  0x89   : > { %v200_v17 = vld [vmem:[%s5794_s6 + $0x18] sm:%s4139_s28]  ;;  %v202_v18 = vld [vmem:[%s5794_s6 + $0x24] sm:%s4139_s28] }
  0x8a   : > { %201 = vst [vmem:[%s5798_s9 + $0x10] sm:%s4139_s28] %v200_v17  ;;  %203 = vst [vmem:[%s5798_s9 + $0x18] sm:%s4139_s28] %v202_v18 }
  0x8b   : > { %v204_v19 = vld [vmem:[%s5794_s6 + $0x30] sm:%s4139_s28]  ;;  %v206_v20 = vld [vmem:[%s5794_s6 + $0x3c] sm:%s4139_s28] }
  0x8c   : > { %205 = vst [vmem:[%s5798_s9 + $0x20] sm:%s4139_s28] %v204_v19  ;;  %207 = vst [vmem:[%s5798_s9 + $0x28] sm:%s4139_s28] %v206_v20 }
  0x8d   : > { %v208_v21 = vld [vmem:[%s5794_s6 + $0x48] sm:%s4139_s28]  ;;  %v210_v22 = vld [vmem:[%s5794_s6 + $0x54] sm:%s4139_s28] }
  0x8e   : > { %209 = vst [vmem:[%s5798_s9 + $0x30] sm:%s4139_s28] %v208_v21  ;;  %211 = vst [vmem:[%s5798_s9 + $0x38] sm:%s4139_s28] %v210_v22 }
  0x8f   : > { %v212_v23 = vld [vmem:[%s5794_s6 + $0x60] sm:%s4139_s28]  ;;  %v214_v24 = vld [vmem:[%s5794_s6 + $0x6c] sm:%s4139_s28] }
  0x90   : > { %213 = vst [vmem:[%s5798_s9 + $0x40] sm:%s4139_s28] %v212_v23  ;;  %215 = vst [vmem:[%s5798_s9 + $0x48] sm:%s4139_s28] %v214_v24 }
  0x91   : > { %v216_v25 = vld [vmem:[%s5794_s6 + $0x78] sm:%s4139_s28]  ;;  %v218_v26 = vld [vmem:[%s5794_s6 + $0x84] sm:%s4139_s28] }
  0x92   : > { %217 = vst [vmem:[%s5798_s9 + $0x50] sm:%s4139_s28] %v216_v25  ;;  %219 = vst [vmem:[%s5798_s9 + $0x58] sm:%s4139_s28] %v218_v26 }
  0x93   : > { %v220_v27 = vld [vmem:[%s5794_s6 + $0x90] sm:%s4139_s28] }
  0x94   : > { %221 = vst [vmem:[%s5798_s9 + $0x60] sm:%s4139_s28] %v220_v27 }
  0x95 PF: > { %836 = sbr.rel (!%p5777_p4) target bundleno = 272 (0x110), region = 86  ;;  %s838_s8 = sand.u32 (%p5777_p4), 1, %s5384_s16  }
  0x96   : > { %s4141_s20 = sshll.u32 (%p5777_p4), %s5388_s17, 1  ;;  %s4140_s21 = sshll.u32 (%p5777_p4), %s838_s8, 5 }
  0x97   : > { %s842_s14 = ssub.s32 (%p5777_p4), 3, %s4141_s20  ;;  %s4294_s27 = sshll.u32 (%p5777_p4), %s5388_s17, 4 }
  0x98   : > { %p843_p13 = scmp.lt.s32.totalorder (%p5777_p4), %s842_s14, 2  ;;  %s6185_s6 = scalar_lea.vmem (%p5777_p4), %s8080_s1, %s4294_s27  }
  0x99   : > { %s6189_s25 = scalar_lea.vmem (%p5777_p4), [#allocation3], %s4140_s21  }
  0x9a   : > { %s8180_s14 = smov (!%p843_p13, %s842_s14), 2 }
  0x9b   : > { %s4142_s9 = sshll.u32 %s8180_s14, 8  ;;  %s6187_s7 = sshll.u32 %s8180_s14, 3 }
  0x9c   : > { %p4146_p0 = scmp.eq.s32.totalorder %s4142_s9, 0 }
  0x9d   : > { %p853_p1 = scmp.lt.u32.totalorder (!%p4146_p0), %s6187_s7, 8 }
  0x9e   : > { %852 = sbr.rel (%p4146_p0) target bundleno = 272 (0x110), region = 90 }
  0xa3   : > { %856 = sbr.rel (%p853_p1) target bundleno = 263 (0x107), region = 94  ;;  %s6193_s29 = sand.u32 (!%p853_p1), 7, %s6187_s7  }
  0xa4   : > { %p875_p2 = scmp.eq.s32.totalorder (!%p853_p1), %s6193_s29, 0  ;;  %p4147_p3 = scmp.ne.s32.totalorder (!%p853_p1), %s6193_s29, 0 }
  0xa8   : > { %878 = sbr.rel (%p4147_p3) target bundleno = 213 (0xd5), region = 109  ;;  %s879_s13 = sshrl.u32 (!%p4147_p3), %s6187_s7, 3 }
  0xa9   : > { %s6200_s11 = sshrl.u32 (!%p4147_p3), %s879_s13, 5 }
  0xaa   : > { %p4148_p6 = scmp.le.s32.totalorder (!%p4147_p3), %s6200_s11, 0 }
  0xad   : > { %3849 = sbr.rel (%p4148_p6) target bundleno = 197 (0xc5), region = 581  ;;  %s8103_s12 = smov (!%p4148_p6), %s6189_s25 }
  0xae   : > { %s8104_s10 = smov (!%p4148_p6), %s6185_s6  ;;  %s6209_s26 = smov (!%p4148_p6), 0  }
  0xaf   : > { %s6211_s28 = smov (!%p4148_p6), 0  }
  0xb2 LB: >> { %v898_v28 = vld [vmem:[%s5460_s10 + $0x18] sm:$0xff]  ;;  %v900_v29 = vld [vmem:[%s5460_s10 + $0x20] sm:$0xff]  ;;  %v902_v30 = vld [vmem:[%s5460_s10 + $0x28] sm:$0xff]  ;;  %s1020_s8 = sadd.s32 1, %s5464_s26  ;;  %s886_s28 = sadd.s32 1, %s5468_s28   ;;  %s5468_s28 = sphi %s6211_s28, %s886_s28   ;;  %s5464_s26 = sphi %s6209_s26, %s8107_s26   ;;  %s5460_s10 = sphi %s8104_s10, %s8106_s10   ;;  %s5456_s12 = sphi %s8103_s12, %s8105_s12  }
  0xb3   : >> { %v904_v31 = vld [vmem:[%s5460_s10 + $0x30] sm:$0xff]  ;;  %v906_v32 = vld [vmem:[%s5460_s10 + $0x38] sm:$0xff]  ;;  %v908_v33 = vld [vmem:[%s5460_s10 + $0x40] sm:$0xff]  ;;  %957 = vst [vmem:[%s5456_s12 + $0x10] sm:$0xff] %v898_v28  ;;  %p1021_p7 = scmp.ge.s32.totalorder %s1020_s8, %s6200_s11  ;;  %p885_p8 = scmp.ge.s32.totalorder %s886_s28, %s6200_s11 }
  0xb4   : >> { %959 = vst [vmem:[%s5456_s12 + $0x18] sm:$0xff] %v900_v29  ;;  %961 = vst [vmem:[%s5456_s12 + $0x20] sm:$0xff] %v902_v30  ;;  %v910_v34 = vld [vmem:[%s5460_s10 + $0x48] sm:$0xff]  ;;  %v912_v35 = vld [vmem:[%s5460_s10 + $0x50] sm:$0xff] }
  0xb5   : >> { %v914_v36 = vld [vmem:[%s5460_s10 + $0x58] sm:$0xff]  ;;  %963 = vst [vmem:[%s5456_s12 + $0x28] sm:$0xff] %v904_v31  ;;  %965 = vst [vmem:[%s5456_s12 + $0x30] sm:$0xff] %v906_v32  ;;  %v916_v37 = vld [vmem:[%s5460_s10 + $0x60] sm:$0xff]  ;;  %s8182_s8 = smov (%p1021_p7, %s1020_s8), 0 }
  0xb6   : >> { %967 = vst [vmem:[%s5456_s12 + $0x38] sm:$0xff] %v908_v33  ;;  %v918_v38 = vld [vmem:[%s5460_s10 + $0x68] sm:$0xff]  ;;  %v920_v39 = vld [vmem:[%s5460_s10 + $0x70] sm:$0xff]  ;;  %969 = vst [vmem:[%s5456_s12 + $0x40] sm:$0xff] %v910_v34  ;;  %s4149_s20 = sshll.u32 %s8182_s8, 8  ;;  %s8107_s26 = smov %s8182_s8 }
  0xb7   : >> { %971 = vst [vmem:[%s5456_s12 + $0x48] sm:$0xff] %v912_v35  ;;  %973 = vst [vmem:[%s5456_s12 + $0x50] sm:$0xff] %v914_v36  ;;  %v922_v40 = vld [vmem:[%s5460_s10 + $0x78] sm:$0xff]  ;;  %v924_v41 = vld [vmem:[%s5460_s10 + $0x80] sm:$0xff]  ;;  %s1025_s21 = scalar_lea.vmem %s6185_s6, %s4149_s20   ;;  %s1026_s14 = scalar_lea.vmem %s6189_s25, %s4149_s20 [#allocation3]  }
  0xb8   : >> { %v926_v42 = vld [vmem:[%s5460_s10 + $0x88] sm:$0xff]  ;;  %975 = vst [vmem:[%s5456_s12 + $0x58] sm:$0xff] %v916_v37  ;;  %977 = vst [vmem:[%s5456_s12 + $0x60] sm:$0xff] %v918_v38  ;;  %v928_v43 = vld [vmem:[%s5460_s10 + $0x90] sm:$0xff] }
  0xb9   : >> { %979 = vst [vmem:[%s5456_s12 + $0x68] sm:$0xff] %v920_v39  ;;  %v930_v44 = vld [vmem:[%s5460_s10 + $0x98] sm:$0xff]  ;;  %v932_v45 = vld [vmem:[%s5460_s10 + $0xa0] sm:$0xff]  ;;  %981 = vst [vmem:[%s5456_s12 + $0x70] sm:$0xff] %v922_v40 }
  0xba   : >> { %983 = vst [vmem:[%s5456_s12 + $0x78] sm:$0xff] %v924_v41  ;;  %985 = vst [vmem:[%s5456_s12 + $0x80] sm:$0xff] %v926_v42  ;;  %v934_v46 = vld [vmem:[%s5460_s10 + $0xa8] sm:$0xff]  ;;  %v936_v47 = vld [vmem:[%s5460_s10 + $0xb0] sm:$0xff] }
  0xbb   : >> { %v938_v48 = vld [vmem:[%s5460_s10 + $0xb8] sm:$0xff]  ;;  %987 = vst [vmem:[%s5456_s12 + $0x88] sm:$0xff] %v928_v43  ;;  %989 = vst [vmem:[%s5456_s12 + $0x90] sm:$0xff] %v930_v44  ;;  %v940_v49 = vld [vmem:[%s5460_s10 + $0xc0] sm:$0xff] }
  0xbc   : >> { %991 = vst [vmem:[%s5456_s12 + $0x98] sm:$0xff] %v932_v45  ;;  %v942_v50 = vld [vmem:[%s5460_s10 + $0xc8] sm:$0xff]  ;;  %v944_v51 = vld [vmem:[%s5460_s10 + $0xd0] sm:$0xff]  ;;  %993 = vst [vmem:[%s5456_s12 + $0xa0] sm:$0xff] %v934_v46 }
  0xbd   : >> { %995 = vst [vmem:[%s5456_s12 + $0xa8] sm:$0xff] %v936_v47  ;;  %997 = vst [vmem:[%s5456_s12 + $0xb0] sm:$0xff] %v938_v48  ;;  %v946_v52 = vld [vmem:[%s5460_s10 + $0xd8] sm:$0xff]  ;;  %v948_v53 = vld [vmem:[%s5460_s10 + $0xe0] sm:$0xff] }
  0xbe   : >> { %v950_v54 = vld [vmem:[%s5460_s10 + $0xe8] sm:$0xff]  ;;  %999 = vst [vmem:[%s5456_s12 + $0xb8] sm:$0xff] %v940_v49  ;;  %1001 = vst [vmem:[%s5456_s12 + $0xc0] sm:$0xff] %v942_v50  ;;  %v952_v55 = vld [vmem:[%s5460_s10 + $0xf0] sm:$0xff] }
  0xbf   : >> { %1003 = vst [vmem:[%s5456_s12 + $0xc8] sm:$0xff] %v944_v51  ;;  %v954_v56 = vld [vmem:[%s5460_s10 + $0xf8] sm:$0xff]  ;;  %v892_v57 = vld [vmem:[%s5460_s10] sm:$0xff]  ;;  %1005 = vst [vmem:[%s5456_s12 + $0xd0] sm:$0xff] %v946_v52 }
  0xc0   : >> { %1007 = vst [vmem:[%s5456_s12 + $0xd8] sm:$0xff] %v948_v53  ;;  %1009 = vst [vmem:[%s5456_s12 + $0xe0] sm:$0xff] %v950_v54  ;;  %v894_v58 = vld [vmem:[%s5460_s10 + $0x8] sm:$0xff]  ;;  %v1014_v59 = vld [vmem:[%s5460_s10 + $0x100] sm:$0xff]  ;;  %888 = sbr.rel (!%p885_p8) target bundleno = 178 (0xb2), region = 587 }
  0xc1   : >> { %893 = vst [vmem:[%s5456_s12] sm:$0xff] %v892_v57  ;;  %1011 = vst [vmem:[%s5456_s12 + $0xe8] sm:$0xff] %v952_v55  ;;  %v1016_v60 = vld [vmem:[%s5460_s10 + $0x108] sm:$0xff]  ;;  %v1018_v61 = vld [vmem:[%s5460_s10 + $0x110] sm:$0xff]  ;;  %s8106_s10 = smov %s1025_s21 }
  0xc2   : >> { %1013 = vst [vmem:[%s5456_s12 + $0xf0] sm:$0xff] %v954_v56  ;;  %895 = vst [vmem:[%s5456_s12 + $0x8] sm:$0xff] %v894_v58 }
  0xc3   : >> { %1015 = vst [vmem:[%s5456_s12 + $0xf8] sm:$0xff] %v1014_v59  ;;  %1017 = vst [vmem:[%s5456_s12 + $0x100] sm:$0xff] %v1016_v60 }
  0xc4   : >> { %1019 = vst [vmem:[%s5456_s12 + $0x108] sm:$0xff] %v1018_v61  ;;  %s8105_s12 = smov %s1026_s14 }
  0xc5 PF: > { %s6313_s27 = sand.u32 31, %s879_s13   ;;  %s4295_s30 = sshll.u32 %s6200_s11, 12 }
  0xc6   : > { %s1031_s5 = sshra.s32 %s4295_s30, 4  ;;  %p4154_p9 = scmp.le.s32.totalorder %s6313_s27, 0 }
  0xc7   : > { %s6317_s9 = scalar_lea.vmem %s6185_s6, %s1031_s5   ;;  %s1035_s20 = scalar_lea.vmem %s6189_s25, %s1031_s5 [#allocation3]  }
  0xc8   : > { %3863 = sbr.rel (%p4154_p9) target bundleno = 213 (0xd5), region = 592  ;;  %s5470_s8 = smov (!%p4154_p9), %s1035_s20  }
  0xc9   : > { %s5474_s28 = smov (!%p4154_p9), %s6317_s9   ;;  %s5478_s21 = smov (!%p4154_p9), 0  }
  0xca   : > { %s5482_s12 = smov (!%p4154_p9), 0  }
  0xcd LB: >> { %v1047_v62 = vld [vmem:[%s5476_s28] sm:$0xff]  ;;  %v1049_v63 = vld [vmem:[%s5476_s28 + $0x18] sm:$0xff]  ;;  %s1051_s13 = sadd.s32 1, %s5480_s21  ;;  %s1041_s12 = sadd.s32 1, %s5484_s12   ;;  %s5484_s12 = sphi %s5482_s12, %s1041_s12   ;;  %s5480_s21 = sphi %s5478_s21, %s5479_s21   ;;  %s5476_s28 = sphi %s5474_s28, %s1056_s28   ;;  %s5472_s8 = sphi %s5470_s8, %s1057_s8  }
  0xce   : >> { %1048 = vst [vmem:[%s5472_s8] sm:$0xff] %v1047_v62  ;;  %1050 = vst [vmem:[%s5472_s8 + $0x10] sm:$0xff] %v1049_v63  ;;  %p1052_p10 = scmp.ge.s32.totalorder %s1051_s13, %s6313_s27  ;;  %p1040_p11 = scmp.ge.s32.totalorder %s1041_s12, %s6313_s27 }
  0xd0   : >> { %s8184_s13 = smov (%p1052_p10, %s1051_s13), 0  ;;  %1043 = sbr.rel (!%p1040_p11) target bundleno = 205 (0xcd), region = 598 }
  0xd1   : >> { %s4155_s11 = sshll.u32 %s8184_s13, 3  ;;  %s5479_s21 = smov %s8184_s13  }
  0xd2   : >> { %s1056_s28 = scalar_lea.vmem %s6317_s9, %s4155_s11   ;;  %s1057_s8 = scalar_lea.vmem %s1035_s20, %s4155_s11 [#allocation3]  }
  0xd5 PF: > { %1060 = sbr.rel (%p875_p2) target bundleno = 263 (0x107), region = 127  ;;  %s1062_s10 = ssub.s32 (!%p875_p2), %s6187_s7, %s6193_s29 }
  0xd6   : > { %s1066_s26 = sshrl.u32 (!%p875_p2), %s6187_s7, 3  ;;  %s6331_s14 = scalar_lea.vmem (!%p875_p2), %s6185_s6, %s1062_s10 }
  0xd7   : > { %s6334_s30 = scalar_lea.vmem (!%p875_p2), %s6189_s25, %s1062_s10 [#allocation3]  ;;  %s6338_s5 = sshrl.u32 (!%p875_p2), %s1066_s26, 5 }
  0xd8   : > { %p4157_p12 = scmp.le.s32.totalorder (!%p875_p2), %s6338_s5, 0 }
  0xda   : > { %3877 = sbr.rel (%p4157_p12) target bundleno = 242 (0xf2), region = 603  ;;  %s8108_s27 = smov (!%p4157_p12), %s6189_s25 }
  0xdb   : > { %s8109_s9 = smov (!%p4157_p12), %s6185_s6  ;;  %s6347_s20 = smov (!%p4157_p12), 0  }
  0xdc   : > { %s6349_s8 = smov (!%p4157_p12), 0  }
  0xdf LB: >> { %v1085_v0 = vld [vmem:[%s5492_s9 + $0x18] sm:$0xff]  ;;  %v1087_v1 = vld [vmem:[%s5492_s9 + $0x20] sm:$0xff]  ;;  %v1089_v2 = vld [vmem:[%s5492_s9 + $0x28] sm:$0xff]  ;;  %s1207_s28 = sadd.s32 1, %s5496_s20  ;;  %s1073_s8 = sadd.s32 1, %s5500_s8   ;;  %s5500_s8 = sphi %s6349_s8, %s1073_s8   ;;  %s5496_s20 = sphi %s6347_s20, %s8112_s20   ;;  %s5492_s9 = sphi %s8109_s9, %s8111_s9   ;;  %s5488_s27 = sphi %s8108_s27, %s8110_s27  }
  0xe0   : >> { %v1091_v3 = vld [vmem:[%s5492_s9 + $0x30] sm:$0xff]  ;;  %v1093_v4 = vld [vmem:[%s5492_s9 + $0x38] sm:$0xff]  ;;  %v1095_v5 = vld [vmem:[%s5492_s9 + $0x40] sm:$0xff]  ;;  %1144 = vst [vmem:[%s5488_s27 + $0x10] sm:$0xff] %v1085_v0  ;;  %p1208_p13 = scmp.ge.s32.totalorder %s1207_s28, %s6338_s5  ;;  %p1072_p0 = scmp.ge.s32.totalorder %s1073_s8, %s6338_s5 }
  0xe1   : >> { %1146 = vst [vmem:[%s5488_s27 + $0x18] sm:$0xff] %v1087_v1  ;;  %1148 = vst [vmem:[%s5488_s27 + $0x20] sm:$0xff] %v1089_v2  ;;  %v1097_v6 = vld [vmem:[%s5492_s9 + $0x48] sm:$0xff]  ;;  %v1099_v7 = vld [vmem:[%s5492_s9 + $0x50] sm:$0xff] }
  0xe2   : >> { %v1101_v8 = vld [vmem:[%s5492_s9 + $0x58] sm:$0xff]  ;;  %1150 = vst [vmem:[%s5488_s27 + $0x28] sm:$0xff] %v1091_v3  ;;  %1152 = vst [vmem:[%s5488_s27 + $0x30] sm:$0xff] %v1093_v4  ;;  %v1103_v9 = vld [vmem:[%s5492_s9 + $0x60] sm:$0xff]  ;;  %s8186_s28 = smov (%p1208_p13, %s1207_s28), 0 }
  0xe3   : >> { %1154 = vst [vmem:[%s5488_s27 + $0x38] sm:$0xff] %v1095_v5  ;;  %v1105_v10 = vld [vmem:[%s5492_s9 + $0x68] sm:$0xff]  ;;  %v1107_v11 = vld [vmem:[%s5492_s9 + $0x70] sm:$0xff]  ;;  %1156 = vst [vmem:[%s5488_s27 + $0x40] sm:$0xff] %v1097_v6  ;;  %s4158_s21 = sshll.u32 %s8186_s28, 8  ;;  %s8112_s20 = smov %s8186_s28 }
  0xe4   : >> { %1158 = vst [vmem:[%s5488_s27 + $0x48] sm:$0xff] %v1099_v7  ;;  %1160 = vst [vmem:[%s5488_s27 + $0x50] sm:$0xff] %v1101_v8  ;;  %v1109_v12 = vld [vmem:[%s5492_s9 + $0x78] sm:$0xff]  ;;  %v1111_v13 = vld [vmem:[%s5492_s9 + $0x80] sm:$0xff]  ;;  %s1212_s12 = scalar_lea.vmem %s6185_s6, %s4158_s21   ;;  %s1213_s13 = scalar_lea.vmem %s6189_s25, %s4158_s21 [#allocation3]  }
  0xe5   : >> { %v1113_v14 = vld [vmem:[%s5492_s9 + $0x88] sm:$0xff]  ;;  %1162 = vst [vmem:[%s5488_s27 + $0x58] sm:$0xff] %v1103_v9  ;;  %1164 = vst [vmem:[%s5488_s27 + $0x60] sm:$0xff] %v1105_v10  ;;  %v1115_v15 = vld [vmem:[%s5492_s9 + $0x90] sm:$0xff] }
  0xe6   : >> { %1166 = vst [vmem:[%s5488_s27 + $0x68] sm:$0xff] %v1107_v11  ;;  %v1117_v16 = vld [vmem:[%s5492_s9 + $0x98] sm:$0xff]  ;;  %v1119_v17 = vld [vmem:[%s5492_s9 + $0xa0] sm:$0xff]  ;;  %1168 = vst [vmem:[%s5488_s27 + $0x70] sm:$0xff] %v1109_v12 }
  0xe7   : >> { %1170 = vst [vmem:[%s5488_s27 + $0x78] sm:$0xff] %v1111_v13  ;;  %1172 = vst [vmem:[%s5488_s27 + $0x80] sm:$0xff] %v1113_v14  ;;  %v1121_v18 = vld [vmem:[%s5492_s9 + $0xa8] sm:$0xff]  ;;  %v1123_v19 = vld [vmem:[%s5492_s9 + $0xb0] sm:$0xff] }
  0xe8   : >> { %v1125_v20 = vld [vmem:[%s5492_s9 + $0xb8] sm:$0xff]  ;;  %1174 = vst [vmem:[%s5488_s27 + $0x88] sm:$0xff] %v1115_v15  ;;  %1176 = vst [vmem:[%s5488_s27 + $0x90] sm:$0xff] %v1117_v16  ;;  %v1127_v21 = vld [vmem:[%s5492_s9 + $0xc0] sm:$0xff] }
  0xe9   : >> { %1178 = vst [vmem:[%s5488_s27 + $0x98] sm:$0xff] %v1119_v17  ;;  %v1129_v22 = vld [vmem:[%s5492_s9 + $0xc8] sm:$0xff]  ;;  %v1131_v23 = vld [vmem:[%s5492_s9 + $0xd0] sm:$0xff]  ;;  %1180 = vst [vmem:[%s5488_s27 + $0xa0] sm:$0xff] %v1121_v18 }
  0xea   : >> { %1182 = vst [vmem:[%s5488_s27 + $0xa8] sm:$0xff] %v1123_v19  ;;  %1184 = vst [vmem:[%s5488_s27 + $0xb0] sm:$0xff] %v1125_v20  ;;  %v1133_v24 = vld [vmem:[%s5492_s9 + $0xd8] sm:$0xff]  ;;  %v1135_v25 = vld [vmem:[%s5492_s9 + $0xe0] sm:$0xff] }
  0xeb   : >> { %v1137_v26 = vld [vmem:[%s5492_s9 + $0xe8] sm:$0xff]  ;;  %1186 = vst [vmem:[%s5488_s27 + $0xb8] sm:$0xff] %v1127_v21  ;;  %1188 = vst [vmem:[%s5488_s27 + $0xc0] sm:$0xff] %v1129_v22  ;;  %v1139_v27 = vld [vmem:[%s5492_s9 + $0xf0] sm:$0xff] }
  0xec   : >> { %1190 = vst [vmem:[%s5488_s27 + $0xc8] sm:$0xff] %v1131_v23  ;;  %v1141_v28 = vld [vmem:[%s5492_s9 + $0xf8] sm:$0xff]  ;;  %v1079_v29 = vld [vmem:[%s5492_s9] sm:$0xff]  ;;  %1192 = vst [vmem:[%s5488_s27 + $0xd0] sm:$0xff] %v1133_v24 }
  0xed   : >> { %1194 = vst [vmem:[%s5488_s27 + $0xd8] sm:$0xff] %v1135_v25  ;;  %1196 = vst [vmem:[%s5488_s27 + $0xe0] sm:$0xff] %v1137_v26  ;;  %v1081_v30 = vld [vmem:[%s5492_s9 + $0x8] sm:$0xff]  ;;  %v1201_v31 = vld [vmem:[%s5492_s9 + $0x100] sm:$0xff]  ;;  %1075 = sbr.rel (!%p1072_p0) target bundleno = 223 (0xdf), region = 609 }
  0xee   : >> { %1080 = vst [vmem:[%s5488_s27] sm:$0xff] %v1079_v29  ;;  %1198 = vst [vmem:[%s5488_s27 + $0xe8] sm:$0xff] %v1139_v27  ;;  %v1203_v32 = vld [vmem:[%s5492_s9 + $0x108] sm:$0xff]  ;;  %v1205_v33 = vld [vmem:[%s5492_s9 + $0x110] sm:$0xff]  ;;  %s8111_s9 = smov %s1212_s12 }
  0xef   : >> { %1200 = vst [vmem:[%s5488_s27 + $0xf0] sm:$0xff] %v1141_v28  ;;  %1082 = vst [vmem:[%s5488_s27 + $0x8] sm:$0xff] %v1081_v30 }
  0xf0   : >> { %1202 = vst [vmem:[%s5488_s27 + $0xf8] sm:$0xff] %v1201_v31  ;;  %1204 = vst [vmem:[%s5488_s27 + $0x100] sm:$0xff] %v1203_v32 }
  0xf1   : >> { %1206 = vst [vmem:[%s5488_s27 + $0x108] sm:$0xff] %v1205_v33  ;;  %s8110_s27 = smov %s1213_s13 }
  0xf2 PF: > { %s6451_s11 = sand.u32 31, %s1066_s26   ;;  %s4297_s10 = sshll.u32 %s6338_s5, 12 }
  0xf3   : > { %s1218_s21 = sshra.s32 %s4297_s10, 4  ;;  %p4163_p1 = scmp.le.s32.totalorder %s6451_s11, 0 }
  0xf4   : > { %s6455_s0 = scalar_lea.vmem %s6185_s6, %s1218_s21   ;;  %s1222_s13 = scalar_lea.vmem %s6189_s25, %s1218_s21 [#allocation3]  }
  0xf5   : > { %3891 = sbr.rel (%p4163_p1) target bundleno = 258 (0x102), region = 614  ;;  %s5502_s28 = smov (!%p4163_p1), %s1222_s13  }
  0xf6   : > { %s5506_s8 = smov (!%p4163_p1), %s6455_s0   ;;  %s5510_s12 = smov (!%p4163_p1), 0  }
  0xf7   : > { %s5514_s27 = smov (!%p4163_p1), 0  }
  0xfa LB: >> { %v1234_v34 = vld [vmem:[%s5508_s8] sm:$0xff]  ;;  %v1236_v35 = vld [vmem:[%s5508_s8 + $0x18] sm:$0xff]  ;;  %s1238_s26 = sadd.s32 1, %s5512_s12  ;;  %s1228_s27 = sadd.s32 1, %s5516_s27   ;;  %s5516_s27 = sphi %s5514_s27, %s1228_s27   ;;  %s5512_s12 = sphi %s5510_s12, %s5511_s12   ;;  %s5508_s8 = sphi %s5506_s8, %s1243_s8   ;;  %s5504_s28 = sphi %s5502_s28, %s1244_s28  }
  0xfb   : >> { %1235 = vst [vmem:[%s5504_s28] sm:$0xff] %v1234_v34  ;;  %1237 = vst [vmem:[%s5504_s28 + $0x10] sm:$0xff] %v1236_v35  ;;  %p1239_p2 = scmp.ge.s32.totalorder %s1238_s26, %s6451_s11  ;;  %p1227_p3 = scmp.ge.s32.totalorder %s1228_s27, %s6451_s11 }
  0xfd   : >> { %s8188_s26 = smov (%p1239_p2, %s1238_s26), 0  ;;  %1230 = sbr.rel (!%p1227_p3) target bundleno = 250 (0xfa), region = 620 }
  0xfe   : >> { %s4164_s5 = sshll.u32 %s8188_s26, 3  ;;  %s5511_s12 = smov %s8188_s26  }
  0xff   : >> { %s1243_s8 = scalar_lea.vmem %s6455_s0, %s4164_s5   ;;  %s1244_s28 = scalar_lea.vmem %s1222_s13, %s4164_s5 [#allocation3]  }
 0x102 PF: > { %s5712_s9 = smov 1  }
 0x103   : > { %s1245_s20 = sshll.u32 %s5712_s9, %s6193_s29 }
 0x104   : > { %s4166_s10 = sadd.s32 4294967295, %s1245_s20 }
 0x105   : > { %v1255_v36 = vld [vmem:[%s6331_s14] sm:%s4166_s10]  ;;  %v1257_v37 = vld [vmem:[%s6331_s14 + $0x18] sm:%s4166_s10] }
 0x106   : > { %1256 = vst [vmem:[%s6334_s30] sm:%s4166_s10] %v1255_v36  ;;  %1258 = vst [vmem:[%s6334_s30 + $0x10] sm:%s4166_s10] %v1257_v37 }
 0x107 PF: > { %p4167_p6 = scmp.ge.u32.totalorder %s6187_s7, 8 }
 0x108   : > { %s5713_s21 = smov (!%p4167_p6), 1  }
 0x109   : > { %859 = sbr.rel (%p4167_p6) target bundleno = 272 (0x110), region = 98  ;;  %s860_s0 = sshll.u32 (!%p4167_p6), %s5713_s21, %s6187_s7 }
 0x10a   : > { %s4168_s11 = sadd.s32 (!%p4167_p6), 4294967295, %s860_s0 }
 0x10e   : > { %v870_v38 = vld [vmem:[%s6185_s6] sm:%s4168_s11]  ;;  %v872_v39 = vld [vmem:[%s6185_s6 + $0x18] sm:%s4168_s11] }
 0x10f   : > { %871 = vst [vmem:[%s6189_s25] sm:%s4168_s11] %v870_v38  ;;  %873 = vst [vmem:[%s6189_s25 + $0x10] sm:%s4168_s11] %v872_v39 }
 0x110 PF: > { %1262 = sbr.rel (!%p5777_p4) target bundleno = 395 (0x18b), region = 152  ;;  %s1264_s29 = sand.u32 (%p5777_p4), 1, %s5384_s16  }
 0x111   : > { %s4170_s14 = sshll.u32 (%p5777_p4), %s5388_s17, 1  ;;  %s4169_s30 = sshll.u32 (%p5777_p4), %s1264_s29, 5 }
 0x112   : > { %s1268_s13 = ssub.s32 (%p5777_p4), 3, %s4170_s14  ;;  %s4299_s7 = sshll.u32 (%p5777_p4), %s5388_s17, 4 }
 0x113   : > { %p1269_p7 = scmp.lt.s32.totalorder (%p5777_p4), %s1268_s13, 2  ;;  %s6482_s25 = scalar_lea.vmem (%p5777_p4), %s8081_s2, %s4299_s7  }
 0x114   : > { %s6486_s23 = scalar_lea.vmem (%p5777_p4), [#allocation4], %s4169_s30  }
 0x115   : > { %s8190_s13 = smov (!%p1269_p7, %s1268_s13), 2 }
 0x116   : > { %s4171_s8 = sshll.u32 %s8190_s13, 8  ;;  %s6484_s12 = sshll.u32 %s8190_s13, 3 }
 0x117   : > { %p4175_p4 = scmp.eq.s32.totalorder %s4171_s8, 0 }
 0x118   : > { %p1279_p8 = scmp.lt.u32.totalorder (!%p4175_p4), %s6484_s12, 8 }
 0x119   : > { %1278 = sbr.rel (%p4175_p4) target bundleno = 395 (0x18b), region = 156 }
 0x11e   : > { %1282 = sbr.rel (%p1279_p8) target bundleno = 386 (0x182), region = 160  ;;  %s6490_s27 = sand.u32 (!%p1279_p8), 7, %s6484_s12  }
 0x11f   : > { %p1301_p9 = scmp.eq.s32.totalorder (!%p1279_p8), %s6490_s27, 0  ;;  %p4176_p10 = scmp.ne.s32.totalorder (!%p1279_p8), %s6490_s27, 0 }
 0x123   : > { %1304 = sbr.rel (%p4176_p10) target bundleno = 336 (0x150), region = 175  ;;  %s1305_s26 = sshrl.u32 (!%p4176_p10), %s6484_s12, 3 }
 0x124   : > { %s6497_s5 = sshrl.u32 (!%p4176_p10), %s1305_s26, 5 }
 0x125   : > { %p4177_p11 = scmp.le.s32.totalorder (!%p4176_p10), %s6497_s5, 0 }
 0x128   : > { %3905 = sbr.rel (%p4177_p11) target bundleno = 320 (0x140), region = 625  ;;  %s8113_s9 = smov (!%p4177_p11), %s6486_s23 }
 0x129   : > { %s8114_s20 = smov (!%p4177_p11), %s6482_s25  ;;  %s6506_s10 = smov (!%p4177_p11), 0  }
 0x12a   : > { %s6508_s21 = smov (!%p4177_p11), 0  }
 0x12d LB: >> { %v1324_v40 = vld [vmem:[%s5524_s20 + $0x18] sm:$0xff]  ;;  %v1326_v41 = vld [vmem:[%s5524_s20 + $0x20] sm:$0xff]  ;;  %v1328_v42 = vld [vmem:[%s5524_s20 + $0x28] sm:$0xff]  ;;  %s1446_s0 = sadd.s32 1, %s5528_s10  ;;  %s1312_s21 = sadd.s32 1, %s5532_s21   ;;  %s5532_s21 = sphi %s6508_s21, %s1312_s21   ;;  %s5528_s10 = sphi %s6506_s10, %s8117_s10   ;;  %s5524_s20 = sphi %s8114_s20, %s8116_s20   ;;  %s5520_s9 = sphi %s8113_s9, %s8115_s9  }
 0x12e   : >> { %v1330_v43 = vld [vmem:[%s5524_s20 + $0x30] sm:$0xff]  ;;  %v1332_v44 = vld [vmem:[%s5524_s20 + $0x38] sm:$0xff]  ;;  %v1334_v45 = vld [vmem:[%s5524_s20 + $0x40] sm:$0xff]  ;;  %1383 = vst [vmem:[%s5520_s9 + $0x10] sm:$0xff] %v1324_v40  ;;  %p1447_p12 = scmp.ge.s32.totalorder %s1446_s0, %s6497_s5  ;;  %p1311_p13 = scmp.ge.s32.totalorder %s1312_s21, %s6497_s5 }
 0x12f   : >> { %1385 = vst [vmem:[%s5520_s9 + $0x18] sm:$0xff] %v1326_v41  ;;  %1387 = vst [vmem:[%s5520_s9 + $0x20] sm:$0xff] %v1328_v42  ;;  %v1336_v46 = vld [vmem:[%s5524_s20 + $0x48] sm:$0xff]  ;;  %v1338_v47 = vld [vmem:[%s5524_s20 + $0x50] sm:$0xff] }
 0x130   : >> { %v1340_v48 = vld [vmem:[%s5524_s20 + $0x58] sm:$0xff]  ;;  %1389 = vst [vmem:[%s5520_s9 + $0x28] sm:$0xff] %v1330_v43  ;;  %1391 = vst [vmem:[%s5520_s9 + $0x30] sm:$0xff] %v1332_v44  ;;  %v1342_v49 = vld [vmem:[%s5524_s20 + $0x60] sm:$0xff]  ;;  %s8192_s0 = smov (%p1447_p12, %s1446_s0), 0 }
 0x131   : >> { %1393 = vst [vmem:[%s5520_s9 + $0x38] sm:$0xff] %v1334_v45  ;;  %v1344_v50 = vld [vmem:[%s5524_s20 + $0x68] sm:$0xff]  ;;  %v1346_v51 = vld [vmem:[%s5524_s20 + $0x70] sm:$0xff]  ;;  %1395 = vst [vmem:[%s5520_s9 + $0x40] sm:$0xff] %v1336_v46  ;;  %s4178_s11 = sshll.u32 %s8192_s0, 8  ;;  %s8117_s10 = smov %s8192_s0 }
 0x132   : >> { %1397 = vst [vmem:[%s5520_s9 + $0x48] sm:$0xff] %v1338_v47  ;;  %1399 = vst [vmem:[%s5520_s9 + $0x50] sm:$0xff] %v1340_v48  ;;  %v1348_v52 = vld [vmem:[%s5524_s20 + $0x78] sm:$0xff]  ;;  %v1350_v53 = vld [vmem:[%s5524_s20 + $0x80] sm:$0xff]  ;;  %s1451_s29 = scalar_lea.vmem %s6482_s25, %s4178_s11   ;;  %s1452_s14 = scalar_lea.vmem %s6486_s23, %s4178_s11 [#allocation4]  }
 0x133   : >> { %v1352_v54 = vld [vmem:[%s5524_s20 + $0x88] sm:$0xff]  ;;  %1401 = vst [vmem:[%s5520_s9 + $0x58] sm:$0xff] %v1342_v49  ;;  %1403 = vst [vmem:[%s5520_s9 + $0x60] sm:$0xff] %v1344_v50  ;;  %v1354_v55 = vld [vmem:[%s5524_s20 + $0x90] sm:$0xff] }
 0x134   : >> { %1405 = vst [vmem:[%s5520_s9 + $0x68] sm:$0xff] %v1346_v51  ;;  %v1356_v56 = vld [vmem:[%s5524_s20 + $0x98] sm:$0xff]  ;;  %v1358_v57 = vld [vmem:[%s5524_s20 + $0xa0] sm:$0xff]  ;;  %1407 = vst [vmem:[%s5520_s9 + $0x70] sm:$0xff] %v1348_v52 }
 0x135   : >> { %1409 = vst [vmem:[%s5520_s9 + $0x78] sm:$0xff] %v1350_v53  ;;  %1411 = vst [vmem:[%s5520_s9 + $0x80] sm:$0xff] %v1352_v54  ;;  %v1360_v58 = vld [vmem:[%s5524_s20 + $0xa8] sm:$0xff]  ;;  %v1362_v59 = vld [vmem:[%s5524_s20 + $0xb0] sm:$0xff] }
 0x136   : >> { %v1364_v60 = vld [vmem:[%s5524_s20 + $0xb8] sm:$0xff]  ;;  %1413 = vst [vmem:[%s5520_s9 + $0x88] sm:$0xff] %v1354_v55  ;;  %1415 = vst [vmem:[%s5520_s9 + $0x90] sm:$0xff] %v1356_v56  ;;  %v1366_v61 = vld [vmem:[%s5524_s20 + $0xc0] sm:$0xff] }
 0x137   : >> { %1417 = vst [vmem:[%s5520_s9 + $0x98] sm:$0xff] %v1358_v57  ;;  %v1368_v62 = vld [vmem:[%s5524_s20 + $0xc8] sm:$0xff]  ;;  %v1370_v63 = vld [vmem:[%s5524_s20 + $0xd0] sm:$0xff]  ;;  %1419 = vst [vmem:[%s5520_s9 + $0xa0] sm:$0xff] %v1360_v58 }
 0x138   : >> { %1421 = vst [vmem:[%s5520_s9 + $0xa8] sm:$0xff] %v1362_v59  ;;  %1423 = vst [vmem:[%s5520_s9 + $0xb0] sm:$0xff] %v1364_v60  ;;  %v1372_v0 = vld [vmem:[%s5524_s20 + $0xd8] sm:$0xff]  ;;  %v1374_v1 = vld [vmem:[%s5524_s20 + $0xe0] sm:$0xff] }
 0x139   : >> { %v1376_v2 = vld [vmem:[%s5524_s20 + $0xe8] sm:$0xff]  ;;  %1425 = vst [vmem:[%s5520_s9 + $0xb8] sm:$0xff] %v1366_v61  ;;  %1427 = vst [vmem:[%s5520_s9 + $0xc0] sm:$0xff] %v1368_v62  ;;  %v1378_v3 = vld [vmem:[%s5524_s20 + $0xf0] sm:$0xff] }
 0x13a   : >> { %1429 = vst [vmem:[%s5520_s9 + $0xc8] sm:$0xff] %v1370_v63  ;;  %v1380_v4 = vld [vmem:[%s5524_s20 + $0xf8] sm:$0xff]  ;;  %v1318_v5 = vld [vmem:[%s5524_s20] sm:$0xff]  ;;  %1431 = vst [vmem:[%s5520_s9 + $0xd0] sm:$0xff] %v1372_v0 }
 0x13b   : >> { %1433 = vst [vmem:[%s5520_s9 + $0xd8] sm:$0xff] %v1374_v1  ;;  %1435 = vst [vmem:[%s5520_s9 + $0xe0] sm:$0xff] %v1376_v2  ;;  %v1320_v6 = vld [vmem:[%s5524_s20 + $0x8] sm:$0xff]  ;;  %v1440_v7 = vld [vmem:[%s5524_s20 + $0x100] sm:$0xff]  ;;  %1314 = sbr.rel (!%p1311_p13) target bundleno = 301 (0x12d), region = 631 }
 0x13c   : >> { %1319 = vst [vmem:[%s5520_s9] sm:$0xff] %v1318_v5  ;;  %1437 = vst [vmem:[%s5520_s9 + $0xe8] sm:$0xff] %v1378_v3  ;;  %v1442_v8 = vld [vmem:[%s5524_s20 + $0x108] sm:$0xff]  ;;  %v1444_v9 = vld [vmem:[%s5524_s20 + $0x110] sm:$0xff]  ;;  %s8116_s20 = smov %s1451_s29 }
 0x13d   : >> { %1439 = vst [vmem:[%s5520_s9 + $0xf0] sm:$0xff] %v1380_v4  ;;  %1321 = vst [vmem:[%s5520_s9 + $0x8] sm:$0xff] %v1320_v6 }
 0x13e   : >> { %1441 = vst [vmem:[%s5520_s9 + $0xf8] sm:$0xff] %v1440_v7  ;;  %1443 = vst [vmem:[%s5520_s9 + $0x100] sm:$0xff] %v1442_v8 }
 0x13f   : >> { %1445 = vst [vmem:[%s5520_s9 + $0x108] sm:$0xff] %v1444_v9  ;;  %s8115_s9 = smov %s1452_s14 }
 0x140 PF: > { %s6610_s30 = sand.u32 31, %s1305_s26   ;;  %s4300_s13 = sshll.u32 %s6497_s5, 12 }
 0x141   : > { %s1457_s7 = sshra.s32 %s4300_s13, 4  ;;  %p4183_p0 = scmp.le.s32.totalorder %s6610_s30, 0 }
 0x142   : > { %s6614_s28 = scalar_lea.vmem %s6482_s25, %s1457_s7   ;;  %s1461_s6 = scalar_lea.vmem %s6486_s23, %s1457_s7 [#allocation4]  }
 0x143   : > { %3919 = sbr.rel (%p4183_p0) target bundleno = 336 (0x150), region = 636  ;;  %s5534_s8 = smov (!%p4183_p0), %s1461_s6  }
 0x144   : > { %s5538_s21 = smov (!%p4183_p0), %s6614_s28   ;;  %s5542_s0 = smov (!%p4183_p0), 0  }
 0x145   : > { %s5546_s9 = smov (!%p4183_p0), 0  }
 0x148 LB: >> { %v1473_v10 = vld [vmem:[%s5540_s21] sm:$0xff]  ;;  %v1475_v11 = vld [vmem:[%s5540_s21 + $0x18] sm:$0xff]  ;;  %s1477_s26 = sadd.s32 1, %s5544_s0  ;;  %s1467_s9 = sadd.s32 1, %s5548_s9   ;;  %s5548_s9 = sphi %s5546_s9, %s1467_s9   ;;  %s5544_s0 = sphi %s5542_s0, %s5543_s0   ;;  %s5540_s21 = sphi %s5538_s21, %s1482_s21   ;;  %s5536_s8 = sphi %s5534_s8, %s1483_s8  }
 0x149   : >> { %1474 = vst [vmem:[%s5536_s8] sm:$0xff] %v1473_v10  ;;  %1476 = vst [vmem:[%s5536_s8 + $0x10] sm:$0xff] %v1475_v11  ;;  %p1478_p1 = scmp.ge.s32.totalorder %s1477_s26, %s6610_s30  ;;  %p1466_p2 = scmp.ge.s32.totalorder %s1467_s9, %s6610_s30 }
 0x14b   : >> { %s8194_s26 = smov (%p1478_p1, %s1477_s26), 0  ;;  %1469 = sbr.rel (!%p1466_p2) target bundleno = 328 (0x148), region = 642 }
 0x14c   : >> { %s4184_s5 = sshll.u32 %s8194_s26, 3  ;;  %s5543_s0 = smov %s8194_s26  }
 0x14d   : >> { %s1482_s21 = scalar_lea.vmem %s6614_s28, %s4184_s5   ;;  %s1483_s8 = scalar_lea.vmem %s1461_s6, %s4184_s5 [#allocation4]  }
 0x150 PF: > { %1486 = sbr.rel (%p1301_p9) target bundleno = 386 (0x182), region = 193  ;;  %s1488_s20 = ssub.s32 (!%p1301_p9), %s6484_s12, %s6490_s27 }
 0x151   : > { %s1492_s10 = sshrl.u32 (!%p1301_p9), %s6484_s12, 3  ;;  %s6628_s11 = scalar_lea.vmem (!%p1301_p9), %s6482_s25, %s1488_s20 }
 0x152   : > { %s6631_s29 = scalar_lea.vmem (!%p1301_p9), %s6486_s23, %s1488_s20 [#allocation4]  ;;  %s6635_s14 = sshrl.u32 (!%p1301_p9), %s1492_s10, 5 }
 0x153   : > { %p4186_p3 = scmp.le.s32.totalorder (!%p1301_p9), %s6635_s14, 0 }
 0x155   : > { %3933 = sbr.rel (%p4186_p3) target bundleno = 365 (0x16d), region = 647  ;;  %s8118_s30 = smov (!%p4186_p3), %s6486_s23 }
 0x156   : > { %s8119_s13 = smov (!%p4186_p3), %s6482_s25  ;;  %s6644_s7 = smov (!%p4186_p3), 0  }
 0x157   : > { %s6646_s28 = smov (!%p4186_p3), 0  }
 0x15a LB: >> { %v1511_v12 = vld [vmem:[%s5556_s13 + $0x18] sm:$0xff]  ;;  %v1513_v13 = vld [vmem:[%s5556_s13 + $0x20] sm:$0xff]  ;;  %v1515_v14 = vld [vmem:[%s5556_s13 + $0x28] sm:$0xff]  ;;  %s1633_s6 = sadd.s32 1, %s5560_s7  ;;  %s1499_s28 = sadd.s32 1, %s5564_s28   ;;  %s5564_s28 = sphi %s6646_s28, %s1499_s28   ;;  %s5560_s7 = sphi %s6644_s7, %s8122_s7   ;;  %s5556_s13 = sphi %s8119_s13, %s8121_s13   ;;  %s5552_s30 = sphi %s8118_s30, %s8120_s30  }
 0x15b   : >> { %v1517_v15 = vld [vmem:[%s5556_s13 + $0x30] sm:$0xff]  ;;  %v1519_v16 = vld [vmem:[%s5556_s13 + $0x38] sm:$0xff]  ;;  %v1521_v17 = vld [vmem:[%s5556_s13 + $0x40] sm:$0xff]  ;;  %1570 = vst [vmem:[%s5552_s30 + $0x10] sm:$0xff] %v1511_v12  ;;  %p1634_p6 = scmp.ge.s32.totalorder %s1633_s6, %s6635_s14  ;;  %p1498_p7 = scmp.ge.s32.totalorder %s1499_s28, %s6635_s14 }
 0x15c   : >> { %1572 = vst [vmem:[%s5552_s30 + $0x18] sm:$0xff] %v1513_v13  ;;  %1574 = vst [vmem:[%s5552_s30 + $0x20] sm:$0xff] %v1515_v14  ;;  %v1523_v18 = vld [vmem:[%s5556_s13 + $0x48] sm:$0xff]  ;;  %v1525_v19 = vld [vmem:[%s5556_s13 + $0x50] sm:$0xff] }
 0x15d   : >> { %v1527_v20 = vld [vmem:[%s5556_s13 + $0x58] sm:$0xff]  ;;  %1576 = vst [vmem:[%s5552_s30 + $0x28] sm:$0xff] %v1517_v15  ;;  %1578 = vst [vmem:[%s5552_s30 + $0x30] sm:$0xff] %v1519_v16  ;;  %v1529_v21 = vld [vmem:[%s5556_s13 + $0x60] sm:$0xff]  ;;  %s8196_s6 = smov (%p1634_p6, %s1633_s6), 0 }
 0x15e   : >> { %1580 = vst [vmem:[%s5552_s30 + $0x38] sm:$0xff] %v1521_v17  ;;  %v1531_v22 = vld [vmem:[%s5556_s13 + $0x68] sm:$0xff]  ;;  %v1533_v23 = vld [vmem:[%s5556_s13 + $0x70] sm:$0xff]  ;;  %1582 = vst [vmem:[%s5552_s30 + $0x40] sm:$0xff] %v1523_v18  ;;  %s4187_s8 = sshll.u32 %s8196_s6, 8  ;;  %s8122_s7 = smov %s8196_s6 }
 0x15f   : >> { %1584 = vst [vmem:[%s5552_s30 + $0x48] sm:$0xff] %v1525_v19  ;;  %1586 = vst [vmem:[%s5552_s30 + $0x50] sm:$0xff] %v1527_v20  ;;  %v1535_v24 = vld [vmem:[%s5556_s13 + $0x78] sm:$0xff]  ;;  %v1537_v25 = vld [vmem:[%s5556_s13 + $0x80] sm:$0xff]  ;;  %s1638_s21 = scalar_lea.vmem %s6482_s25, %s4187_s8   ;;  %s1639_s0 = scalar_lea.vmem %s6486_s23, %s4187_s8 [#allocation4]  }
 0x160   : >> { %v1539_v26 = vld [vmem:[%s5556_s13 + $0x88] sm:$0xff]  ;;  %1588 = vst [vmem:[%s5552_s30 + $0x58] sm:$0xff] %v1529_v21  ;;  %1590 = vst [vmem:[%s5552_s30 + $0x60] sm:$0xff] %v1531_v22  ;;  %v1541_v27 = vld [vmem:[%s5556_s13 + $0x90] sm:$0xff] }
 0x161   : >> { %1592 = vst [vmem:[%s5552_s30 + $0x68] sm:$0xff] %v1533_v23  ;;  %v1543_v28 = vld [vmem:[%s5556_s13 + $0x98] sm:$0xff]  ;;  %v1545_v29 = vld [vmem:[%s5556_s13 + $0xa0] sm:$0xff]  ;;  %1594 = vst [vmem:[%s5552_s30 + $0x70] sm:$0xff] %v1535_v24 }
 0x162   : >> { %1596 = vst [vmem:[%s5552_s30 + $0x78] sm:$0xff] %v1537_v25  ;;  %1598 = vst [vmem:[%s5552_s30 + $0x80] sm:$0xff] %v1539_v26  ;;  %v1547_v30 = vld [vmem:[%s5556_s13 + $0xa8] sm:$0xff]  ;;  %v1549_v31 = vld [vmem:[%s5556_s13 + $0xb0] sm:$0xff] }
 0x163   : >> { %v1551_v32 = vld [vmem:[%s5556_s13 + $0xb8] sm:$0xff]  ;;  %1600 = vst [vmem:[%s5552_s30 + $0x88] sm:$0xff] %v1541_v27  ;;  %1602 = vst [vmem:[%s5552_s30 + $0x90] sm:$0xff] %v1543_v28  ;;  %v1553_v33 = vld [vmem:[%s5556_s13 + $0xc0] sm:$0xff] }
 0x164   : >> { %1604 = vst [vmem:[%s5552_s30 + $0x98] sm:$0xff] %v1545_v29  ;;  %v1555_v34 = vld [vmem:[%s5556_s13 + $0xc8] sm:$0xff]  ;;  %v1557_v35 = vld [vmem:[%s5556_s13 + $0xd0] sm:$0xff]  ;;  %1606 = vst [vmem:[%s5552_s30 + $0xa0] sm:$0xff] %v1547_v30 }
 0x165   : >> { %1608 = vst [vmem:[%s5552_s30 + $0xa8] sm:$0xff] %v1549_v31  ;;  %1610 = vst [vmem:[%s5552_s30 + $0xb0] sm:$0xff] %v1551_v32  ;;  %v1559_v36 = vld [vmem:[%s5556_s13 + $0xd8] sm:$0xff]  ;;  %v1561_v37 = vld [vmem:[%s5556_s13 + $0xe0] sm:$0xff] }
 0x166   : >> { %v1563_v38 = vld [vmem:[%s5556_s13 + $0xe8] sm:$0xff]  ;;  %1612 = vst [vmem:[%s5552_s30 + $0xb8] sm:$0xff] %v1553_v33  ;;  %1614 = vst [vmem:[%s5552_s30 + $0xc0] sm:$0xff] %v1555_v34  ;;  %v1565_v39 = vld [vmem:[%s5556_s13 + $0xf0] sm:$0xff] }
 0x167   : >> { %1616 = vst [vmem:[%s5552_s30 + $0xc8] sm:$0xff] %v1557_v35  ;;  %v1567_v40 = vld [vmem:[%s5556_s13 + $0xf8] sm:$0xff]  ;;  %v1505_v41 = vld [vmem:[%s5556_s13] sm:$0xff]  ;;  %1618 = vst [vmem:[%s5552_s30 + $0xd0] sm:$0xff] %v1559_v36 }
 0x168   : >> { %1620 = vst [vmem:[%s5552_s30 + $0xd8] sm:$0xff] %v1561_v37  ;;  %1622 = vst [vmem:[%s5552_s30 + $0xe0] sm:$0xff] %v1563_v38  ;;  %v1507_v42 = vld [vmem:[%s5556_s13 + $0x8] sm:$0xff]  ;;  %v1627_v43 = vld [vmem:[%s5556_s13 + $0x100] sm:$0xff]  ;;  %1501 = sbr.rel (!%p1498_p7) target bundleno = 346 (0x15a), region = 653 }
 0x169   : >> { %1506 = vst [vmem:[%s5552_s30] sm:$0xff] %v1505_v41  ;;  %1624 = vst [vmem:[%s5552_s30 + $0xe8] sm:$0xff] %v1565_v39  ;;  %v1629_v44 = vld [vmem:[%s5556_s13 + $0x108] sm:$0xff]  ;;  %v1631_v45 = vld [vmem:[%s5556_s13 + $0x110] sm:$0xff]  ;;  %s8121_s13 = smov %s1638_s21 }
 0x16a   : >> { %1626 = vst [vmem:[%s5552_s30 + $0xf0] sm:$0xff] %v1567_v40  ;;  %1508 = vst [vmem:[%s5552_s30 + $0x8] sm:$0xff] %v1507_v42 }
 0x16b   : >> { %1628 = vst [vmem:[%s5552_s30 + $0xf8] sm:$0xff] %v1627_v43  ;;  %1630 = vst [vmem:[%s5552_s30 + $0x100] sm:$0xff] %v1629_v44 }
 0x16c   : >> { %1632 = vst [vmem:[%s5552_s30 + $0x108] sm:$0xff] %v1631_v45  ;;  %s8120_s30 = smov %s1639_s0 }
 0x16d PF: > { %s6748_s9 = sand.u32 31, %s1492_s10   ;;  %s4302_s26 = sshll.u32 %s6635_s14, 12 }
 0x16e   : > { %s1644_s5 = sshra.s32 %s4302_s26, 4  ;;  %p4192_p4 = scmp.le.s32.totalorder %s6748_s9, 0 }
 0x16f   : > { %s6752_s20 = scalar_lea.vmem %s6482_s25, %s1644_s5   ;;  %s1648_s8 = scalar_lea.vmem %s6486_s23, %s1644_s5 [#allocation4]  }
 0x170   : > { %3947 = sbr.rel (%p4192_p4) target bundleno = 381 (0x17d), region = 658  ;;  %s5566_s6 = smov (!%p4192_p4), %s1648_s8  }
 0x171   : > { %s5570_s28 = smov (!%p4192_p4), %s6752_s20   ;;  %s5574_s21 = smov (!%p4192_p4), 0  }
 0x172   : > { %s5578_s30 = smov (!%p4192_p4), 0  }
 0x175 LB: >> { %v1660_v46 = vld [vmem:[%s5572_s28] sm:$0xff]  ;;  %v1662_v47 = vld [vmem:[%s5572_s28 + $0x18] sm:$0xff]  ;;  %s1664_s10 = sadd.s32 1, %s5576_s21  ;;  %s1654_s30 = sadd.s32 1, %s5580_s30   ;;  %s5580_s30 = sphi %s5578_s30, %s1654_s30   ;;  %s5576_s21 = sphi %s5574_s21, %s5575_s21   ;;  %s5572_s28 = sphi %s5570_s28, %s1669_s28   ;;  %s5568_s6 = sphi %s5566_s6, %s1670_s6  }
 0x176   : >> { %1661 = vst [vmem:[%s5568_s6] sm:$0xff] %v1660_v46  ;;  %1663 = vst [vmem:[%s5568_s6 + $0x10] sm:$0xff] %v1662_v47  ;;  %p1665_p8 = scmp.ge.s32.totalorder %s1664_s10, %s6748_s9  ;;  %p1653_p9 = scmp.ge.s32.totalorder %s1654_s30, %s6748_s9 }
 0x178   : >> { %s8198_s10 = smov (%p1665_p8, %s1664_s10), 0  ;;  %1656 = sbr.rel (!%p1653_p9) target bundleno = 373 (0x175), region = 664 }
 0x179   : >> { %s4193_s14 = sshll.u32 %s8198_s10, 3  ;;  %s5575_s21 = smov %s8198_s10  }
 0x17a   : >> { %s1669_s28 = scalar_lea.vmem %s6752_s20, %s4193_s14   ;;  %s1670_s6 = scalar_lea.vmem %s1648_s8, %s4193_s14 [#allocation4]  }
 0x17d PF: > { %s5714_s13 = smov 1  }
 0x17e   : > { %s1671_s7 = sshll.u32 %s5714_s13, %s6490_s27 }
 0x17f   : > { %s4195_s0 = sadd.s32 4294967295, %s1671_s7 }
 0x180   : > { %v1681_v48 = vld [vmem:[%s6628_s11] sm:%s4195_s0]  ;;  %v1683_v49 = vld [vmem:[%s6628_s11 + $0x18] sm:%s4195_s0] }
 0x181   : > { %1682 = vst [vmem:[%s6631_s29] sm:%s4195_s0] %v1681_v48  ;;  %1684 = vst [vmem:[%s6631_s29 + $0x10] sm:%s4195_s0] %v1683_v49 }
 0x182 PF: > { %p4196_p10 = scmp.ge.u32.totalorder %s6484_s12, 8 }
 0x183   : > { %s5715_s26 = smov (!%p4196_p10), 1  }
 0x184   : > { %1285 = sbr.rel (%p4196_p10) target bundleno = 395 (0x18b), region = 164  ;;  %s1286_s9 = sshll.u32 (!%p4196_p10), %s5715_s26, %s6484_s12 }
 0x185   : > { %s4197_s5 = sadd.s32 (!%p4196_p10), 4294967295, %s1286_s9 }
 0x189   : > { %v1296_v50 = vld [vmem:[%s6482_s25] sm:%s4197_s5]  ;;  %v1298_v51 = vld [vmem:[%s6482_s25 + $0x18] sm:%s4197_s5] }
 0x18a   : > { %1297 = vst [vmem:[%s6486_s23] sm:%s4197_s5] %v1296_v50  ;;  %1299 = vst [vmem:[%s6486_s23 + $0x10] sm:%s4197_s5] %v1298_v51 }
 0x18b PF: > { %p4198_p11 = scmp.ge.s32.totalorder %s5388_s17, 1  ;;  %p1687_p12 = scmp.lt.s32.totalorder %s5388_s17, 3 }
 0x18d   : > { %p1688_p13 = pnand %p4198_p11, %p1687_p12 }
 0x18e   : > { %s6774_s27 = sand.u32 (!%p1688_p13), 1, %s5380_s15  }
 0x18f   : > { %1691 = sbr.rel (%p1688_p13) target bundleno = 837 (0x345), region = 218  ;;  %s6777_s12 = sshll.u32 (!%p1688_p13), %s6774_s27, 5 }
 0x190   : > { %s6782_s25 = scalar_lea.vmem (!%p1688_p13), [#allocation4], %s6777_s12  ;;  %s6791_s17 = scalar_lea.vmem (!%p1688_p13), [#allocation3], %s6777_s12 }
 0x191   : > { %s4315_s15 = smul.u32 (!%p1688_p13), 104, %s6774_s27  ;;  %s7145_s11 = scalar_lea.vmem (!%p1688_p13), [#allocation6], %s6777_s12  }
 0x192   : > { %s4201_s29 = sshll.u32 (!%p1688_p13), %s6774_s27, 4 }
 0x193   : > { %s6998_s23 = scalar_lea.vmem (!%p1688_p13), [#allocation2], %s4315_s15  ;;  %s7357_s20 = scalar_lea.vmem (!%p1688_p13), [#allocation5], %s4201_s29  }
 0x194   : > { %v1792_v52 = vlaneseq  ;;  %v6785_v54 = vld [vmem:[%s6782_s25] sm:$0xff]  ;;  %v6788_v55 = vld [vmem:[%s6782_s25 + $0x8] sm:$0xff]  ;;  %v4203_v58 = vld [vmem:[%s6782_s25 + $0x10] ss:$8 sm:$0x3]  ;;  %vm1802_vm0 = vcmask 1046528  }
 0x195   : > { %v1776_v56 = vld [vmem:[%s6791_s17] sm:$0xff]  ;;  %v1777_v57 = vld [vmem:[%s6791_s17 + $0x8] sm:$0xff]  ;;  %v4204_v59 = vld [vmem:[%s6791_s17 + $0x10] ss:$8 sm:$0x3]  ;;  %v1787_v60 = vrot.slane %v6785_v54, 1 }
 0x196   : > { %v6779_v53 = vshrl.u32 %v1792_v52, 7  ;;  %v1788_v62 = vrot.slane %v6788_v55, 1  ;;  %v1807_v0 = vrot.slane %v1776_v56, 1  ;;  %v1808_v1 = vrot.slane %v1777_v57, 1  ;;  %s4231_s8 = sshll.u32 (%p5781_p5), %s5762_s18, 1  ;;  %s4304_s6 = sshll.u32 (%p5781_p5), %s5762_s18, 4 }
 0x197   : > { %v4214_v14 = vld [vmem:[%s6791_s17 + $0x10] ss:$8 sm:$0x3]  ;;  %v4215_v17 = vld [vmem:[%s6791_s17 + $0x11] ss:$8 sm:$0x3]  ;;  %s7368_s10 = scalar_lea.vmem (%p5781_p5), %s8082_s3, %s4304_s6  }
 0x198   : > { %v6799_v61 = vsub.s32 0, %v6779_v53  ;;  %v6803_v63 = vsub.s32 1, %v6779_v53  ;;  %v2131_v20 = vadd.f32 %v4215_v17, %v4214_v14  ;;  %v4218_v21 = vld [vmem:[%s6791_s17 + $0x12] ss:$8 sm:$0x3]  ;;  %vm1892_vm14 = vcmask 1040384  }
 0x199   : > { %v4221_v22 = vld [vmem:[%s6791_s17 + $0x13] ss:$8 sm:$0x3]  ;;  %v2244_v26 = vadd.f32 %v4218_v21, %v4215_v17  ;;  %v4224_v32 = vld [vmem:[%s6791_s17 + $0x14] ss:$8 sm:$0x3] }
 0x19a   : > { %v1795_v2 = vrot.slane %v4203_v58, %v6799_v61  ;;  %v1815_v3 = vrot.slane %v4204_v59, %v6799_v61  ;;  %v1799_v4 = vrot.slane %v4203_v58, %v6803_v63  ;;  %v1819_v5 = vrot.slane %v4204_v59, %v6803_v63  ;;  %v6856_v14 = vld [vmem:[%s6782_s25 + $0x11] ss:$8 sm:$0x3]  ;;  %s2738_s28 = ssub.s32 (%p5781_p5), 3, %s4231_s8 }
 0x19b   : > { %v2132_v25 = vmul.f32 0.5, %v2131_v20  ;;  %v2245_v30 = vmul.f32 0.5, %v2244_v26  ;;  %v2349_v31 = vadd.f32 %v4221_v22, %v4218_v21  ;;  %v2454_v38 = vadd.f32 %v4224_v32, %v4221_v22  ;;  %p2739_p0 = scmp.lt.s32.totalorder (%p5781_p5), %s2738_s28, 2 }
 0x19c   : > { %v6809_v6 = vsel %vm1802_vm0, %v1787_v60, %v1795_v2  ;;  %v1822_v7 = vsel %vm1802_vm0, %v1807_v0, %v1815_v3  ;;  %v6811_v8 = vsel %vm1802_vm0, %v1788_v62, %v1799_v4  ;;  %v1823_v9 = vsel %vm1802_vm0, %v1808_v1, %v1819_v5 }
 0x19d   : > { %v6815_v10 = vadd.f32 %v6809_v6, %v6785_v54  ;;  %v6819_v11 = vadd.f32 %v6811_v8, %v6788_v55  ;;  %v1830_v12 = vadd.f32 %v1822_v7, %v1776_v56  ;;  %v1831_v13 = vadd.f32 %v1823_v9, %v1777_v57  ;;  %v6850_v9 = vld [vmem:[%s6782_s25 + $0x10] ss:$8 sm:$0x3] }
 0x19e   : > { %v6831_v29 = vadd.f32 -1.0, %v2132_v25  ;;  %v6835_v36 = vadd.f32 -1.0, %v2245_v30  ;;  %v2350_v37 = vmul.f32 0.5, %v2349_v31  ;;  %v2455_v42 = vmul.f32 0.5, %v2454_v38 }
 0x19f   : > { %v1832_v15 = vmul.f32 0.5, %v1830_v12  ;;  %v1833_v16 = vmul.f32 0.5, %v1831_v13  ;;  %v6840_v44 = vadd.f32 -1.0, %v4224_v32  ;;  %v1824_v21 = vsub.f32 %v6809_v6, %v6785_v54  ;;  %v6877_v54 = vld [vmem:[%s6782_s25 + $0x13] ss:$8 sm:$0x3] }
 0x1a0   : > { %v2137_v35 = vand.u32 2147483647, %v6831_v29  ;;  %v2250_v40 = vand.u32 2147483647, %v6835_v36  ;;  %v6838_v41 = vadd.f32 -1.0, %v2350_v37  ;;  %v6843_v47 = vadd.f32 -1.0, %v2455_v42 }
 0x1a1   : > { %v6823_v18 = vadd.f32 -1.0, %v1832_v15  ;;  %v6825_v19 = vadd.f32 -1.0, %v1833_v16  ;;  %v2556_v50 = vand.u32 2147483647, %v6840_v44  ;;  %v1825_v22 = vsub.f32 %v6811_v8, %v6788_v55 }
 0x1a2   : > { %v2138_v39 = vsub.f32 0.0, %v2137_v35  ;;  %v2251_v45 = vsub.f32 0.0, %v2250_v40  ;;  %v2355_v46 = vand.u32 2147483647, %v6838_v41  ;;  %v2460_v51 = vand.u32 2147483647, %v6843_v47 }
 0x1a3   : > { %v1842_v23 = vand.u32 2147483647, %v6823_v18  ;;  %v1843_v24 = vand.u32 2147483647, %v6825_v19  ;;  %v2557_v56 = vsub.f32 0.0, %v2556_v50  ;;  %v1836_v30 = vmax.f32 %v6823_v18, 0.0 }
 0x1a4   : > { %v2139_v43 = vmul.f32 1.442695, %v2138_v39  ;;  %v2252_v48 = vmul.f32 1.442695, %v2251_v45  ;;  %v2356_v49 = vsub.f32 0.0, %v2355_v46  ;;  %v2461_v57 = vsub.f32 0.0, %v2460_v51 }
 0x1a5   : > { %v1844_v27 = vsub.f32 0.0, %v1842_v23  ;;  %v1845_v28 = vsub.f32 0.0, %v1843_v24  ;;  %v2558_v59 = vmul.f32 1.442695, %v2557_v56  ;;  %v1837_v31 = vmax.f32 %v6825_v19, 0.0 }
 0x1a6   : > { %v2357_v52 = vmul.f32 1.442695, %v2356_v49  ;;  %v2462_v58 = vmul.f32 1.442695, %v2461_v57  ;;  %vm1838_vm1 = vcmp.ne.f32.partialorder %v6823_v18, %v6823_v18  ;;  %vm1839_vm2 = vcmp.ne.f32.partialorder %v6825_v19, %v6825_v19 }
 0x1a7   : > { %v1846_v33 = vmul.f32 1.442695, %v1844_v27  ;;  %v1848_v34 = vmul.f32 1.442695, %v1845_v28  ;;  %v2128_v27 = vsub.f32 %v6856_v14, %v6850_v9  ;;  %vm2135_vm5 = vcmp.ne.f32.partialorder %v6831_v29, %v6831_v29 }
 0x1a8   : > { %v6859_v15 = vld [vmem:[%s6782_s25 + $0x12] ss:$8 sm:$0x3]  ;;  %v2247_v51 = vmax.f32 %v6835_v36, 0.0  ;;  %vm2248_vm7 = vcmp.ne.f32.partialorder %v6835_v36, %v6835_v36  ;;  %vm2353_vm9 = vcmp.ne.f32.partialorder %v6838_v41, %v6838_v41  ;;  %vm2458_vm12 = vcmp.ne.f32.partialorder %v6843_v47, %v6843_v47 }
 0x1a9   : > { %5004 = vpow2.f32 %v1846_v33  ;;  %v2241_v28 = vsub.f32 %v6859_v15, %v6856_v14  ;;  %v2346_v45 = vsub.f32 %v6877_v54, %v6859_v15  ;;  %vm1903_vm15 = vcmask 1041408  }
 0x1aa   : > { %5006 = vpow2.f32 %v1848_v34  ;;  %vm2554_vm0 = vcmp.ne.f32.partialorder %v6840_v44, %v6840_v44 }
 0x1ab   : > { %5008 = vpow2.f32 %v2139_v43 }
 0x1ac   : > { %5010 = vpow2.f32 %v2252_v48  ;;  %v2134_v48 = vmax.f32 %v6831_v29, 0.0 }
 0x1ad   : > { %5012 = vpow2.f32 %v2357_v52 }
 0x1ae   : > { %5014 = vpow2.f32 %v2462_v58 }
 0x1af   : > { %5016 = vpow2.f32 %v2558_v59 }
 0x1b6   : > { %v5005_v60 = vpop.eup %5004 }
 0x1b7   : > { %v5007_v62 = vpop.eup %5006  ;;  %v1850_v0 = vadd.f32 1.0, %v5005_v60  ;;  %v1853_v4 = vmul.f32 -0.5, %v5005_v60  ;;  %v1856_v17 = vand.u32 2147483647, %v5005_v60 }
 0x1b8   : > { %v1859_v1 = vadd.f32 1.0, %v5007_v62  ;;  %v5009_v2 = vpop.eup %5008  ;;  %v1862_v7 = vmul.f32 -0.5, %v5007_v62  ;;  %v1865_v26 = vand.u32 2147483647, %v5007_v62 }
 0x1b9   : > { %5018 = vlog2.f32 %v1850_v0  ;;  %v2141_v3 = vadd.f32 1.0, %v5009_v2  ;;  %v6847_v5 = vpop.eup %5010  ;;  %v1854_v16 = vadd.f32 1.0, %v1853_v4  ;;  %v2144_v24 = vmul.f32 -0.5, %v5009_v2 }
 0x1ba   : > { %5020 = vlog2.f32 %v1859_v1  ;;  %v2254_v12 = vadd.f32 1.0, %v6847_v5  ;;  %v6853_v13 = vpop.eup %5012  ;;  %v1863_v23 = vadd.f32 1.0, %v1862_v7  ;;  %vm6884_vm3 = vcmp.lt.f32.partialorder %v1856_v17, 0.0004427343 }
 0x1bb   : > { %5022 = vlog2.f32 %v2141_v3  ;;  %v2359_v20 = vadd.f32 1.0, %v6853_v13  ;;  %v6866_v25 = vpop.eup %5014  ;;  %v1855_v8 = vmul.f32 %v5005_v60, %v1854_v16  ;;  %v2257_v33 = vmul.f32 -0.5, %v6847_v5 }
 0x1bc   : > { %5024 = vlog2.f32 %v2254_v12  ;;  %v2464_v55 = vadd.f32 1.0, %v6866_v25  ;;  %v6880_v6 = vpop.eup %5016  ;;  %v1864_v35 = vmul.f32 %v5007_v62, %v1863_v23  ;;  %v2145_v37 = vadd.f32 1.0, %v2144_v24 }
 0x1bd   : > { %5026 = vlog2.f32 %v2359_v20  ;;  %v2362_v38 = vmul.f32 -0.5, %v6853_v13  ;;  %vm6890_vm4 = vcmp.lt.f32.partialorder %v1865_v26, 0.0004427343  ;;  %v2147_v43 = vand.u32 2147483647, %v5009_v2 }
 0x1be   : > { %5028 = vlog2.f32 %v2464_v55  ;;  %v2260_v49 = vand.u32 2147483647, %v6847_v5  ;;  %v2258_v52 = vadd.f32 1.0, %v2257_v33  ;;  %v2560_v56 = vadd.f32 1.0, %v6880_v6 }
 0x1bf   : > { %v2146_v59 = vmul.f32 %v5009_v2, %v2145_v37  ;;  %v2363_v60 = vadd.f32 1.0, %v2362_v38  ;;  %vm6906_vm6 = vcmp.lt.f32.partialorder %v2147_v43, 0.0004427343  ;;  %v2467_v3 = vmul.f32 -0.5, %v6866_v25 }
 0x1c0   : > { %vm6917_vm8 = vcmp.lt.f32.partialorder %v2260_v49, 0.0004427343  ;;  %v2365_v12 = vand.u32 2147483647, %v6853_v13  ;;  %v2259_v20 = vmul.f32 %v6847_v5, %v2258_v52  ;;  %5030 = vlog2.f32 %v2560_v56 }
 0x1c1   : > { %v2364_v26 = vmul.f32 %v6853_v13, %v2363_v60  ;;  %v2468_v32 = vadd.f32 1.0, %v2467_v3  ;;  %v2563_v56 = vmul.f32 -0.5, %v6880_v6 }
 0x1c2   : > { %vm6934_vm10 = vcmp.lt.f32.partialorder %v2365_v12, 0.0004427343 }
 0x1c6   : > { %v5019_v34 = vpop.eup %5018 }
 0x1c7   : > { %v5021_v39 = vpop.eup %5020  ;;  %v1852_v40 = vmul.f32 0.6931472, %v5019_v34 }
 0x1c8   : > { %v1861_v46 = vmul.f32 0.6931472, %v5021_v39  ;;  %v5023_v62 = vpop.eup %5022 }
 0x1c9   : > { %v1858_v50 = vsel %vm6884_vm3, %v1855_v8, %v1852_v40  ;;  %v2143_v7 = vmul.f32 0.6931472, %v5023_v62  ;;  %v5025_v23 = vpop.eup %5024  ;;  %v2457_v40 = vmax.f32 %v6843_v47, 0.0  ;;  %vm2721_vm3 = vcmask 1044480  }
 0x1ca   : > { %v1867_v57 = vsel %vm6890_vm4, %v1864_v35, %v1861_v46  ;;  %v1868_v58 = vadd.f32 %v1858_v50, %v1836_v30  ;;  %v2470_v30 = vand.u32 2147483647, %v6866_v25  ;;  %v2256_v8 = vmul.f32 0.6931472, %v5025_v23  ;;  %v5027_v33 = vpop.eup %5026  ;;  %v7075_v23 = vld [vmem:[%s6998_s23 + $0x40] sm:$0xff] }
 0x1cb   : > { %v1869_v0 = vadd.f32 %v1867_v57, %v1837_v31  ;;  %v2361_v35 = vmul.f32 0.6931472, %v5027_v33  ;;  %v5029_v42 = vpop.eup %5028  ;;  %v6951_v46 = vld [vmem:[%s6782_s25 + $0x14] ss:$8 sm:$0x3] }
 0x1cc   : > { %v1870_v4 = vsel %vm1838_vm1, %v6823_v18, %v1868_v58  ;;  %v2149_v18 = vsel %vm6906_vm6, %v2146_v59, %v2143_v7  ;;  %v2262_v34 = vsel %vm6917_vm8, %v2259_v20, %v2256_v8  ;;  %vm6954_vm11 = vcmp.lt.f32.partialorder %v2470_v30, 0.0004427343  ;;  %v7004_v33 = vld [vmem:[%s6998_s23 + $0x8] sm:$0xff] }
 0x1cd   : > { %v1871_v16 = vsel %vm1839_vm2, %v6825_v19, %v1869_v0  ;;  %v1872_v17 = vmul.f32 %v1870_v4, %v1824_v21  ;;  %v2150_v55 = vadd.f32 %v2149_v18, %v2134_v48  ;;  %v2352_v21 = vmax.f32 %v6838_v41, 0.0  ;;  %v5031_v1 = vpop.eup %5030 }
 0x1ce   : > { %v1873_v24 = vmul.f32 %v1871_v16, %v1825_v22  ;;  %v2263_v39 = vadd.f32 %v2262_v34, %v2247_v51  ;;  %v2367_v43 = vsel %vm6934_vm10, %v2364_v26, %v2361_v35  ;;  %v2466_v52 = vmul.f32 0.6931472, %v5029_v42  ;;  %v7014_v34 = vld [vmem:[%s6998_s23 + $0x18] sm:$0xff] }
 0x1cf   : > { %v1874_v31 = vsub.f32 0.0, %v1872_v17  ;;  %v2151_v13 = vsel %vm2135_vm5, %v6831_v29, %v2150_v55  ;;  %v2469_v29 = vmul.f32 %v6866_v25, %v2468_v32  ;;  %v2368_v50 = vadd.f32 %v2367_v43, %v2352_v21  ;;  %v7001_v32 = vld [vmem:[%s6998_s23] sm:$0xff]  ;;  %v7009_v21 = vld [vmem:[%s6998_s23 + $0x10] sm:$0xff] }
 0x1d0   : > { %v1875_v19 = vsub.f32 0.0, %v1873_v24  ;;  %v2152_v38 = vmul.f32 %v2151_v13, %v2128_v27  ;;  %v2264_v27 = vsel %vm2248_vm7, %v6835_v36, %v2263_v39  ;;  %v2451_v58 = vsub.f32 %v6951_v46, %v6877_v54 }
 0x1d1   : > { %v1876_v22 = vmul.f32 1.442695, %v1874_v31  ;;  %v2265_v51 = vmul.f32 %v2264_v27, %v2241_v28  ;;  %v2369_v57 = vsel %vm2353_vm9, %v6838_v41, %v2368_v50  ;;  %v2472_v28 = vsel %vm6954_vm11, %v2469_v29, %v2466_v52 }
 0x1d2   : > { %v1878_v37 = vmul.f32 1.442695, %v1875_v19  ;;  %v2153_v49 = vsub.f32 0.0, %v2152_v38  ;;  %v2370_v36 = vmul.f32 %v2369_v57, %v2346_v45  ;;  %v2473_v60 = vadd.f32 %v2472_v28, %v2457_v40  ;;  %v7026_v40 = vld [vmem:[%s6998_s23 + $0x20] sm:$0xff] }
 0x1d3   : > { %5032 = vpow2.f32 %v1876_v22  ;;  %v2266_v59 = vsub.f32 0.0, %v2265_v51  ;;  %v2564_v41 = vadd.f32 1.0, %v2563_v56  ;;  %v2566_v4 = vand.u32 2147483647, %v6880_v6 }
 0x1d4   : > { %5034 = vpow2.f32 %v1878_v37  ;;  %v2154_v25 = vmul.f32 1.442695, %v2153_v49  ;;  %v2371_v0 = vsub.f32 0.0, %v2370_v36  ;;  %v2474_v3 = vsel %vm2458_vm12, %v6843_v47, %v2473_v60 }
 0x1d5   : > { %v2267_v62 = vmul.f32 1.442695, %v2266_v59  ;;  %v2475_v2 = vmul.f32 %v2474_v3, %v2451_v58  ;;  %v5716_v45 = vmov 1966171168   ;;  %v2562_v17 = vmul.f32 0.6931472, %v5031_v1 }
 0x1d6   : > { %5036 = vpow2.f32 %v2154_v25  ;;  %v2372_v7 = vmul.f32 1.442695, %v2371_v0  ;;  %v2159_v12 = vunpack.c.l.s4 %v5716_v45  ;;  %v2565_v20 = vmul.f32 %v6880_v6, %v2564_v41  ;;  %v7046_v59 = vld [vmem:[%s6998_s23 + $0x28] sm:$0xff] }
 0x1d7   : > { %5038 = vpow2.f32 %v2267_v62  ;;  %v2476_v16 = vsub.f32 0.0, %v2475_v2  ;;  %vm6983_vm13 = vcmp.lt.f32.partialorder %v2566_v4, 0.0004427343  ;;  %v2553_v47 = vmax.f32 %v6840_v44, 0.0  ;;  %v7054_v62 = vld [vmem:[%s6998_s23 + $0x30] sm:$0xff] }
 0x1d8   : > { %5040 = vpow2.f32 %v2372_v7  ;;  %v2160_v31 = vunpack.c.0.s8 %v2159_v12  ;;  %v2568_v55 = vsel %vm6983_vm13, %v2565_v20, %v2562_v17  ;;  %v1962_v38 = vcombine.high %v7001_v32, %v7001_v32  ;;  %v7066_v12 = vld [vmem:[%s6998_s23 + $0x38] sm:$0xff] }
 0x1d9   : > { %v2477_v24 = vmul.f32 1.442695, %v2476_v16  ;;  %v2569_v5 = vadd.f32 %v2568_v55, %v2553_v47  ;;  %v1982_v39 = vcombine.high %v7004_v33, %v7004_v33  ;;  %v1995_v29 = vsub.s32 2, %v6779_v53 }
 0x1da   : > { %v7017_v35 = vsub.s32 %v2160_v31, %v6779_v53  ;;  %v2002_v48 = vcombine.high %v7009_v21, %v7009_v21  ;;  %v2015_v49 = vsub.s32 3, %v6779_v53  ;;  %v7036_v50 = vmul.f32 0.5, %v6815_v10 }
 0x1db   : > { %5042 = vpow2.f32 %v2477_v24  ;;  %vm1914_vm1 = vcmask 1043456   ;;  %v2022_v52 = vcombine.high %v7014_v34, %v7014_v34  ;;  %v2570_v56 = vsel %vm2554_vm0, %v6840_v44, %v2569_v5 }
 0x1dc   : > { %v2035_v57 = vsub.s32 4, %v6779_v53  ;;  %v2042_v58 = vcombine.high %v7026_v40, %v7026_v40  ;;  %v2055_v44 = vsub.s32 5, %v6779_v53  ;;  %v7059_v41 = vmul.f32 0.5, %v6819_v11 }
 0x1dd   : > { %v2571_v4 = vmul.f32 1e+10, %v2570_v56  ;;  %v2075_v45 = vsub.s32 6, %v6779_v53  ;;  %v2129_v20 = vadd.f32 %v6856_v14, %v6850_v9  ;;  %v2242_v24 = vadd.f32 %v6859_v15, %v6856_v14 }
 0x1de   : > { %v7083_v55 = vsub.s32 7, %v6779_v53  ;;  %v8138_v53 = vcombine.high %v7054_v62, %v7054_v62  ;;  %vm2696_vm2 = vcmask 1042432  }
 0x1e0   : > { %v6987_v18 = vpop.eup %5032 }
 0x1e1   : > { %v6990_v26 = vpop.eup %5034  ;;  %v1880_v30 = vsub.f32 1.0, %v6987_v18 }
 0x1e2   : > { %v1881_v6 = vsub.f32 1.0, %v6990_v26 }
 0x1e3   : > { %v1882_v8 = vsub.f32 1.0, %v1880_v30  ;;  %v7011_v22 = vpop.eup %5036 }
 0x1e4   : > { %v1883_v19 = vsub.f32 1.0, %v1881_v6  ;;  %v2156_v42 = vsub.f32 1.0, %v7011_v22  ;;  %v7033_v27 = vpop.eup %5038 }
 0x1e5   : > { %v1884_v13 = vadd.f32 1e-10, %v1882_v8  ;;  %v8085_v10 = vsub.f32 1.0, %v7033_v27  ;;  %v7049_v36 = vpop.eup %5040 }
 0x1e6   : > { %v1885_v37 = vadd.f32 1e-10, %v1883_v19  ;;  %v2222_v0 = vsub.f32 1.0, %v2156_v42  ;;  %v8084_v3 = vsub.f32 1.0, %v7049_v36 }
 0x1e7   : > { %v1888_v43 = vrot.slane %v1884_v13, 7  ;;  %v2327_v16 = vsub.f32 1.0, %v8085_v10 }
 0x1e8   : > { %v1889_v51 = vrot.slane %v1885_v37, 7  ;;  %v7079_v47 = vpop.eup %5042  ;;  %v2223_v8 = vadd.f32 1e-10, %v2222_v0  ;;  %v2432_v19 = vsub.f32 1.0, %v8084_v3  ;;  %v7096_v0 = vmul.f32 0.5, %v2129_v20 }
 0x1e9   : > { %v1893_v25 = vsel %vm1892_vm14, 1.0, %v1888_v43  ;;  %v2328_v56 = vadd.f32 1e-10, %v2327_v16 }
 0x1ea   : > { %v1894_v28 = vsel %vm1892_vm14, 1.0, %v1889_v51  ;;  %v1895_v60 = vmul.f32 %v1893_v25, %v1884_v13  ;;  %v7093_v51 = vld [vmem:[%s6998_s23 + $0x48] sm:$0xff]  ;;  %v8086_v25 = vsub.f32 1.0, %v7079_v47  ;;  %v2232_v43 = vrot.slane %v2223_v8, %v6803_v63 }
 0x1eb   : > { %v1896_v1 = vmul.f32 %v1894_v28, %v1885_v37  ;;  %v2572_v37 = vsub.f32 0.0, %v2571_v4  ;;  %v2228_v4 = vrot.slane %v2223_v8, %v6799_v61  ;;  %v2333_v10 = vrot.slane %v2328_v56, %v6799_v61 }
 0x1ec   : > { %v1899_v7 = vrot.slane %v1895_v60, 6  ;;  %v7122_v8 = vadd.f32 %v6951_v46, %v6877_v54 }
 0x1ed   : > { %v1900_v17 = vrot.slane %v1896_v1, 6 }
 0x1ee   : > { %v1904_v31 = vsel %vm1903_vm15, 1.0, %v1899_v7  ;;  %v7098_v7 = vmul.f32 0.5, %v2242_v24  ;;  %v2573_v24 = vmul.f32 1.442695, %v2572_v37  ;;  %v2337_v37 = vrot.slane %v2328_v56, %v6803_v63 }
 0x1ef   : > { %v1905_v5 = vsel %vm1903_vm15, 1.0, %v1900_v17  ;;  %v1906_v9 = vmul.f32 %v1904_v31, %v1895_v60  ;;  %v2347_v60 = vadd.f32 %v6877_v54, %v6859_v15  ;;  %v2433_v31 = vadd.f32 1e-10, %v2432_v19 }
 0x1f0   : > { %v1907_v14 = vmul.f32 %v1905_v5, %v1896_v1  ;;  %v7104_v1 = vld [vmem:[%s6998_s23 + $0x50] sm:$0xff]  ;;  %v2537_v5 = vsub.f32 1.0, %v8086_v25  ;;  %5044 = vpow2.f32 %v2573_v24 }
 0x1f1   : > { %v1910_v28 = vrot.slane %v1906_v9, 4  ;;  %v7116_v19 = vmul.f32 0.5, %v2347_v60  ;;  %v2442_v60 = vrot.slane %v2433_v31, %v6803_v63 }
 0x1f2   : > { %v1911_v17 = vrot.slane %v1907_v14, 4  ;;  %v7114_v13 = vadd.f32 1e-10, %v2537_v5 }
 0x1f3   : > { %v1915_v16 = vsel %vm1914_vm1, 1.0, %v1910_v28 }
 0x1f4   : > { %v1916_v3 = vsel %vm1914_vm1, 1.0, %v1911_v17  ;;  %v1917_v15 = vmul.f32 %v1915_v16, %v1906_v9  ;;  %v2438_v9 = vrot.slane %v2433_v31, %v6799_v61  ;;  %v2543_v54 = vrot.slane %v7114_v13, %v6799_v61 }
 0x1f5   : > { %v1918_v11 = vmul.f32 %v1916_v3, %v1907_v14  ;;  %v2547_v31 = vrot.slane %v7114_v13, %v6803_v63 }
 0x1f6   : > { %v1921_v28 = vrot.slane %v1917_v15, 7  ;;  %v2235_v20 = vmul.f32 %v2228_v4, %v1917_v15 }
 0x1f7   : > { %v1922_v17 = vrot.slane %v1918_v11, 7  ;;  %v2157_v5 = vcombine.high %v1917_v15, %v1918_v11  ;;  %v2236_v16 = vmul.f32 %v2232_v43, %v1918_v11 }
 0x1f8   : > { %v1925_v3 = vsel %vm1892_vm14, 1.0, %v1921_v28  ;;  %v2340_v14 = vmul.f32 %v2333_v10, %v2235_v20 }
 0x1f9   : > { %v1926_v25 = vsel %vm1892_vm14, 1.0, %v1922_v17  ;;  %v7133_v56 = vmul.f32 %v1925_v3, %v1880_v30  ;;  %v2164_v4 = vrot.slane %v2157_v5, %v7017_v35  ;;  %v2272_v2 = vcombine.high %v2235_v20, %v2236_v16 }
 0x1fa   : > { %v7138_v11 = vmul.f32 %v1926_v25, %v1881_v6  ;;  %v2341_v43 = vmul.f32 %v2337_v37, %v2236_v16  ;;  %v7140_v10 = vmul.f32 %v2438_v9, %v2340_v14 }
 0x1fb   : > { %1931 = vst [vmem:[%s7145_s11] sm:$0xff] %v7133_v56  ;;  %v1933_v18 = vmul.f32 %v7133_v56, %v7036_v50  ;;  %v1939_v30 = vrot.slane %v7133_v56, 7  ;;  %v2165_v26 = vcombine.high %v2164_v4, %v2164_v4  ;;  %v2279_v6 = vrot.slane %v2272_v2, %v7017_v35 }
 0x1fc   : > { %1932 = vst [vmem:[%s7145_s11 + $0x8] sm:$0xff] %v7138_v11  ;;  %v1934_v25 = vmul.f32 %v7138_v11, %v7059_v41  ;;  %v1940_v20 = vrot.slane %v7138_v11, 7  ;;  %v2377_v24 = vcombine.high %v2340_v14, %v2341_v43  ;;  %v7158_v15 = vmul.f32 %v2442_v60, %v2341_v43 }
 0x1fd   : > { %v1943_v28 = vsel %vm1892_vm14, 0.0, %v1939_v30  ;;  %v2108_v37 = vrot.slane %v1933_v18, 4  ;;  %v2172_v50 = vrot.slane %v2165_v26, %v7017_v35  ;;  %v2280_v9 = vcombine.high %v2279_v6, %v2279_v6 }
 0x1fe   : > { %v1944_v17 = vsel %vm1892_vm14, 0.0, %v1940_v20  ;;  %v1945_v2 = vadd.f32 %v1943_v28, %v7133_v56  ;;  %v2114_v5 = vrot.slane %v1934_v25, 4  ;;  %v7165_v16 = vrot.slane %v2377_v24, %v7017_v35 }
 0x1ff   : > { %v1946_v41 = vadd.f32 %v1944_v17, %v7138_v11  ;;  %v2109_v3 = vadd.f32 %v2108_v37, %v1933_v18  ;;  %v2173_v14 = vcombine.high %v2172_v50, %v2172_v50  ;;  %v7169_v60 = vrot.slane %v2280_v9, %v7017_v35 }
 0x200   : > { %v1947_v4 = vmul.f32 0.5, %v1945_v2  ;;  %v2115_v43 = vadd.f32 %v2114_v5, %v1934_v25  ;;  %v2385_v30 = vcombine.high %v7165_v16, %v7165_v16  ;;  %v2482_v26 = vcombine.high %v7140_v10, %v7158_v15  ;;  %v7193_v2 = vpop.eup %5044 }
 0x201   : > { %v1948_v6 = vmul.f32 0.5, %v1946_v41  ;;  %v2110_v20 = vrot.slane %v2109_v3, 2  ;;  %v7177_v24 = vmul.f32 %v2173_v14, %v2156_v42  ;;  %v2288_v18 = vcombine.high %v7169_v60, %v7169_v60 }
 0x202   : > { %v1956_v28 = vrot.slane %v1947_v4, %v6799_v61  ;;  %v1976_v37 = vrot.slane %v1947_v4, %v6803_v63  ;;  %v1996_v25 = vrot.slane %v1947_v4, %v1995_v29  ;;  %v2016_v50 = vrot.slane %v1947_v4, %v2015_v49 }
 0x203   : > { %v1960_v9 = vrot.slane %v1948_v6, %v6799_v61  ;;  %v1980_v17 = vrot.slane %v1948_v6, %v6803_v63  ;;  %v2000_v22 = vrot.slane %v1948_v6, %v1995_v29  ;;  %v2020_v42 = vrot.slane %v1948_v6, %v2015_v49 }
 0x204   : > { %v1964_v5 = vmul.f32 %v1956_v28, %v7001_v32  ;;  %v1984_v16 = vmul.f32 %v7004_v33, %v1976_v37  ;;  %v2004_v41 = vmul.f32 %v7009_v21, %v1996_v25  ;;  %v2024_v14 = vmul.f32 %v7014_v34, %v2016_v50 }
 0x205   : > { %v1965_v60 = vmul.f32 %v1962_v38, %v1960_v9  ;;  %v1985_v29 = vmul.f32 %v1982_v39, %v1980_v17  ;;  %v2005_v49 = vmul.f32 %v2002_v48, %v2000_v22  ;;  %v2025_v28 = vmul.f32 %v2022_v52, %v2020_v42 }
 0x206   : > { %v1986_v37 = vadd.f32 %v1984_v16, %v1964_v5  ;;  %v2036_v25 = vrot.slane %v1947_v4, %v2035_v57  ;;  %v2040_v32 = vrot.slane %v1948_v6, %v2035_v57  ;;  %v2056_v38 = vrot.slane %v1947_v4, %v2055_v44 }
 0x207   : > { %v1987_v33 = vadd.f32 %v1985_v29, %v1965_v60  ;;  %v2060_v39 = vrot.slane %v1948_v6, %v2055_v44  ;;  %v2076_v21 = vrot.slane %v1947_v4, %v2075_v45  ;;  %v2080_v34 = vrot.slane %v1948_v6, %v2075_v45 }
 0x208   : > { %v2006_v48 = vadd.f32 %v2004_v41, %v1986_v37  ;;  %v2044_v52 = vmul.f32 %v7026_v40, %v2036_v25  ;;  %v2045_v57 = vmul.f32 %v2042_v58, %v2040_v32  ;;  %v2064_v50 = vmul.f32 %v7046_v59, %v2056_v38 }
 0x209   : > { %v2007_v9 = vadd.f32 %v2005_v49, %v1987_v33  ;;  %v8137_v17 = vcombine.high %v7046_v59, %v7046_v59  ;;  %v2084_v22 = vmul.f32 %v7054_v62, %v2076_v21  ;;  %v2085_v45 = vmul.f32 %v8138_v53, %v2080_v34 }
 0x20a   : > { %v2026_v42 = vadd.f32 %v2024_v14, %v2006_v48  ;;  %v2096_v5 = vrot.slane %v1947_v4, %v7083_v55  ;;  %v2100_v16 = vrot.slane %v1948_v6, %v7083_v55  ;;  %v2111_v40 = vadd.f32 %v2110_v20, %v2109_v3 }
 0x20b   : > { %v2065_v44 = vmul.f32 %v8137_v17, %v2060_v39  ;;  %v2027_v58 = vadd.f32 %v2025_v28, %v2007_v9  ;;  %v2116_v41 = vrot.slane %v2115_v43, 2  ;;  %v2176_v60 = vmul.f32 %v7177_v24, %v7096_v0 }
 0x20c   : > { %v7241_v59 = vrot.slane %v7177_v24, %v6799_v61  ;;  %v2046_v29 = vadd.f32 %v2044_v52, %v2026_v42  ;;  %v2104_v49 = vmul.f32 %v7066_v12, %v2096_v5  ;;  %v8139_v62 = vcombine.high %v7066_v12, %v7066_v12 }
 0x20d   : > { %v2112_v4 = vrot.slane %v2111_v40, 1  ;;  %v2047_v37 = vadd.f32 %v2045_v57, %v2027_v58  ;;  %v2117_v6 = vadd.f32 %v2116_v41, %v2115_v43  ;;  %v2181_v3 = vrot.slane %v2176_v60, %v6799_v61 }
 0x20e   : > { %v2105_v14 = vmul.f32 %v8139_v62, %v2100_v16  ;;  %v2185_v20 = vrot.slane %v2176_v60, %v6803_v63  ;;  %v2066_v28 = vadd.f32 %v2064_v50, %v2046_v29  ;;  %v7251_v25 = vrot.slane %v7177_v24, %v6803_v63 }
 0x20f   : > { %v2113_v0 = vadd.f32 %v2112_v4, %v2111_v40  ;;  %v2203_v32 = vadd.f32 %v7241_v59, %v7133_v56  ;;  %v2067_v38 = vadd.f32 %v2065_v44, %v2047_v37  ;;  %v2118_v33 = vrot.slane %v2117_v6, 1 }
 0x210   : > { %v8140_v12 = vsub.f32 1.0, %v7033_v27  ;;  %v2392_v43 = vrot.slane %v2385_v30, %v7017_v35  ;;  %v2086_v21 = vadd.f32 %v2084_v22, %v2066_v28  ;;  %v2204_v48 = vadd.f32 %v7251_v25, %v7138_v11 }
 0x211   : > { %v2188_v34 = vadd.f32 %v2181_v3, %v2113_v0  ;;  %v2205_v52 = vmul.f32 0.5, %v2203_v32  ;;  %v2087_v57 = vadd.f32 %v2085_v45, %v2067_v38  ;;  %v2119_v50 = vadd.f32 %v2118_v33, %v2117_v6 }
 0x212   : > { %v7257_v39 = vmul.f32 %v2288_v18, %v8140_v12  ;;  %v2106_v17 = vadd.f32 %v2104_v49, %v2086_v21  ;;  %v2206_v27 = vmul.f32 0.5, %v2204_v48  ;;  %v2393_v44 = vcombine.high %v2392_v43, %v2392_v43 }
 0x213   : > { %v2210_v18 = vrot.slane %v2205_v52, %v7083_v55  ;;  %v2107_v30 = vadd.f32 %v2105_v14, %v2087_v57  ;;  %v2189_v22 = vadd.f32 %v2185_v20, %v2119_v50  ;;  %v2489_v58 = vrot.slane %v2482_v26, %v7017_v35  ;;  %v4225_v50 = vld [vmem:[%s6998_s23 + $0x58] sm:$0xff] }
 0x214   : > { %v2291_v9 = vmul.f32 %v7257_v39, %v7098_v7  ;;  %v2307_v56 = vadd.f32 %v7257_v39, %v7177_v24  ;;  %v2214_v45 = vrot.slane %v2206_v27, %v7083_v55  ;;  %v8141_v7 = vsub.f32 1.0, %v7049_v36 }
 0x215   : > { %v2218_v42 = vmul.f32 %v7075_v23, %v2210_v18  ;;  %v7281_v41 = vmul.f32 %v2543_v54, %v7140_v10  ;;  %v8142_v55 = vcombine.high %v7075_v23, %v7075_v23  ;;  %v2490_v26 = vcombine.high %v2489_v58, %v2489_v58 }
 0x216   : > { %v2296_v53 = vrot.slane %v2291_v9, %v6799_v61  ;;  %v2300_v11 = vrot.slane %v2291_v9, %v6803_v63  ;;  %v2308_v5 = vmul.f32 0.5, %v2307_v56  ;;  %v2395_v16 = vmul.f32 %v2393_v44, %v8141_v7 }
 0x217   : > { %v2219_v60 = vmul.f32 %v8142_v55, %v2214_v45  ;;  %v2220_v29 = vadd.f32 %v2218_v42, %v2106_v17  ;;  %v7294_v54 = vmul.f32 %v2547_v31, %v7158_v15  ;;  %v8143_v4 = vcombine.high %v7093_v51, %v7093_v51 }
 0x218   : > { %v2303_v24 = vadd.f32 %v2296_v53, %v2188_v34  ;;  %v2304_v40 = vadd.f32 %v2300_v11, %v2189_v22  ;;  %v2313_v36 = vrot.slane %v2308_v5, %v6799_v61  ;;  %v2317_v49 = vrot.slane %v2308_v5, %v6803_v63 }
 0x219   : > { %v2396_v62 = vmul.f32 %v2395_v16, %v7116_v19  ;;  %v2412_v14 = vadd.f32 %v2395_v16, %v7257_v39  ;;  %v2221_v10 = vadd.f32 %v2219_v60, %v2107_v30  ;;  %v2453_v6 = vmul.f32 0.5, %v7122_v8 }
 0x21a   : > { %v2323_v23 = vmul.f32 %v7093_v51, %v2313_v36  ;;  %v2324_v37 = vmul.f32 %v8143_v4, %v2317_v49  ;;  %v2497_v28 = vrot.slane %v2490_v26, %v7017_v35  ;;  %v2575_v15 = vsub.f32 1.0, %v7193_v2 }
 0x21b   : > { %v2401_v19 = vrot.slane %v2396_v62, %v6799_v61  ;;  %v2405_v3 = vrot.slane %v2396_v62, %v6803_v63  ;;  %v2413_v20 = vmul.f32 0.5, %v2412_v14  ;;  %v2578_v0 = vcombine.high %v7281_v41, %v7294_v54 }
 0x21c   : > { %v2325_v13 = vadd.f32 %v2323_v23, %v2220_v29  ;;  %v2326_v31 = vadd.f32 %v2324_v37, %v2221_v10  ;;  %v2498_v33 = vcombine.high %v2497_v28, %v2497_v28  ;;  %v2652_v43 = vrot.slane %v7257_v39, %v6799_v61 }
 0x21d   : > { %v2408_v32 = vadd.f32 %v2401_v19, %v2303_v24  ;;  %v2409_v51 = vadd.f32 %v2405_v3, %v2304_v40  ;;  %v2418_v38 = vrot.slane %v2413_v20, %v6799_v61  ;;  %v2422_v8 = vrot.slane %v2413_v20, %v6803_v63 }
 0x21e   : > { %v2585_v12 = vrot.slane %v2578_v0, %v7017_v35  ;;  %v2656_v21 = vrot.slane %v7257_v39, %v6803_v63  ;;  %v8144_v34 = vcombine.high %v7104_v1, %v7104_v1  ;;  %v8145_v52 = vsub.f32 1.0, %v7079_v47 }
 0x21f   : > { %v2428_v2 = vmul.f32 %v7104_v1, %v2418_v38  ;;  %v2633_v56 = vsub.f32 1.0, %v2575_v15  ;;  %v2663_v17 = vrot.slane %v2395_v16, %v6799_v61  ;;  %v2667_v44 = vrot.slane %v2395_v16, %v6803_v63 }
 0x220   : > { %v2429_v48 = vmul.f32 %v8144_v34, %v2422_v8  ;;  %v2500_v57 = vmul.f32 %v2498_v33, %v8145_v52  ;;  %v2586_v9 = vcombine.high %v2585_v12, %v2585_v12  ;;  %v2692_v39 = vsel %vm1892_vm14, %v7241_v59, %v2652_v43  ;;  %v4226_v59 = vld [vmem:[%s6998_s23 + $0x60] sm:$0xff] }
 0x221   : > { %v2430_v27 = vadd.f32 %v2428_v2, %v2325_v13  ;;  %v2693_v47 = vsel %vm1892_vm14, %v7251_v25, %v2656_v21  ;;  %v2531_v53 = vcombine.high %v4225_v50, %v4225_v50  ;;  %v2627_v49 = vcombine.high %v4226_v59, %v4226_v59 }
 0x222   : > { %v2431_v18 = vadd.f32 %v2429_v48, %v2326_v31  ;;  %v2501_v30 = vmul.f32 %v2500_v57, %v2453_v6  ;;  %v2517_v22 = vadd.f32 %v2500_v57, %v2395_v16  ;;  %v2593_v1 = vrot.slane %v2586_v9, %v7017_v35 }
 0x223   : > { %v2674_v11 = vrot.slane %v2500_v57, %v6799_v61  ;;  %v2678_v45 = vrot.slane %v2500_v57, %v6803_v63  ;;  %v2613_v40 = vmul.f32 0.5, %v2500_v57  ;;  %v2634_v16 = vadd.f32 1e-10, %v2633_v56 }
 0x224   : > { %v2506_v42 = vrot.slane %v2501_v30, %v6799_v61  ;;  %v2510_v5 = vrot.slane %v2501_v30, %v6803_v63  ;;  %v2518_v7 = vmul.f32 0.5, %v2517_v22  ;;  %v2594_v24 = vcombine.high %v2593_v1, %v2593_v1 }
 0x225   : > { %v2694_v35 = vsel %vm1903_vm15, %v2692_v39, %v2663_v17  ;;  %v2695_v58 = vsel %vm1903_vm15, %v2693_v47, %v2667_v44  ;;  %v2639_v20 = vrot.slane %v2634_v16, %v6799_v61  ;;  %v2643_v28 = vrot.slane %v2634_v16, %v6803_v63 }
 0x226   : > { %v2513_v25 = vadd.f32 %v2506_v42, %v2408_v32  ;;  %v2514_v55 = vadd.f32 %v2510_v5, %v2409_v51  ;;  %v2523_v60 = vrot.slane %v2518_v7, %v6799_v61  ;;  %v2527_v29 = vrot.slane %v2518_v7, %v6803_v63 }
 0x227   : > { %v2596_v36 = vmul.f32 %v2594_v24, %v2575_v15  ;;  %v2697_v26 = vsel %vm2696_vm2, %v2694_v35, %v2674_v11  ;;  %v2698_v10 = vsel %vm2696_vm2, %v2695_v58, %v2678_v45  ;;  %v2646_v12 = vmul.f32 %v2639_v20, %v7281_v41 }
 0x228   : > { %v2533_v62 = vmul.f32 %v4225_v50, %v2523_v60  ;;  %v2534_v14 = vmul.f32 %v2531_v53, %v2527_v29  ;;  %v2647_v43 = vmul.f32 %v2643_v28, %v7294_v54 }
 0x229   : > { %v2597_v23 = vmul.f32 %v6951_v46, %v2596_v36  ;;  %v2614_v4 = vadd.f32 %v2613_v40, %v2596_v36  ;;  %v2685_v37 = vrot.slane %v2596_v36, %v6799_v61  ;;  %v2689_v6 = vrot.slane %v2596_v36, %v6803_v63 }
 0x22a   : > { %v2535_v19 = vadd.f32 %v2533_v62, %v2430_v27  ;;  %v2536_v3 = vadd.f32 %v2534_v14, %v2431_v18  ;;  %v2715_v52 = vrot.slane %v2646_v12, 2  ;;  %v2716_v57 = vrot.slane %v2647_v43, 2 }
 0x22b   : > { %v2602_v13 = vrot.slane %v2597_v23, %v6799_v61  ;;  %v2606_v31 = vrot.slane %v2597_v23, %v6803_v63  ;;  %v2619_v46 = vrot.slane %v2614_v4, %v6799_v61  ;;  %v2623_v15 = vrot.slane %v2614_v4, %v6803_v63 }
 0x22c   : > { %v2699_v0 = vsel %vm1914_vm1, %v2697_v26, %v2685_v37  ;;  %v2700_v32 = vsel %vm1914_vm1, %v2698_v10, %v2689_v6 }
 0x22d   : > { %v2609_v51 = vadd.f32 %v2602_v13, %v2513_v25  ;;  %v2610_v38 = vadd.f32 %v2606_v31, %v2514_v55  ;;  %v2629_v8 = vmul.f32 %v4226_v59, %v2619_v46  ;;  %v2630_v33 = vmul.f32 %v2627_v49, %v2623_v15  ;;  %2701 = vst [vmem:[%s7145_s11 + $0x10] sm:$0x1f] %v2699_v0 }
 0x22e   : > { %2702 = vst [vmem:[%s7145_s11 + $0x18] sm:$0x1f] %v2700_v32 }
 0x22f   : > { %v2631_v21 = vadd.f32 %v2629_v8, %v2535_v19  ;;  %v2632_v2 = vadd.f32 %v2630_v33, %v2536_v3  ;;  %v2709_v63 = vrot.slane %v2609_v51, 4  ;;  %v2710_v48 = vrot.slane %v2610_v38, 4 }
 0x231   : > { %v2703_v61 = vmul.f32 2.0, %v2631_v21  ;;  %v2704_v34 = vmul.f32 2.0, %v2632_v2 }
 0x233   : > { %v4227_v50 = vadd.f32 -1.0, %v2703_v61  ;;  %v4228_v9 = vadd.f32 -1.0, %v2704_v34  ;;  %2736 = sbr.rel (!%p5781_p5) target bundleno = 714 (0x2ca), region = 234 }
 0x235   : > { %v2719_v56 = vsel %vm1914_vm1, %v4227_v50, %v2709_v63  ;;  %v2720_v17 = vsel %vm1914_vm1, %v4228_v9, %v2710_v48 }
 0x236   : > { %v2722_v27 = vsel %vm2721_vm3, %v2719_v56, %v2715_v52  ;;  %v2723_v41 = vsel %vm2721_vm3, %v2720_v17, %v2716_v57 }
 0x237   : > { %2724 = vst [vmem:[%s7357_s20] sm:$0x3f] %v2722_v27  ;;  %2725 = vst [vmem:[%s7357_s20 + $0x8] sm:$0x3f] %v2723_v41 }
 0x238   : > { %s8200_s28 = smov (!%p2739_p0, %s2738_s28), 2 }
 0x239   : > { %s4232_s14 = sshll.u32 %s8200_s28, 7  ;;  %s7370_s13 = sshll.u32 %s8200_s28, 3 }
 0x23a   : > { %p4236_p1 = scmp.eq.s32.totalorder %s4232_s14, 0 }
 0x23b   : > { %p2749_p2 = scmp.lt.u32.totalorder (!%p4236_p1), %s7370_s13, 8 }
 0x23c   : > { %2748 = sbr.rel (%p4236_p1) target bundleno = 714 (0x2ca), region = 238 }
 0x241   : > { %2752 = sbr.rel (%p2749_p2) target bundleno = 705 (0x2c1), region = 242  ;;  %s7374_s7 = sand.u32 (!%p2749_p2), 7, %s7370_s13  }
 0x242   : > { %p2769_p3 = scmp.eq.s32.totalorder (!%p2749_p2), %s7374_s7, 0  ;;  %p4237_p6 = scmp.ne.s32.totalorder (!%p2749_p2), %s7374_s7, 0 }
 0x246   : > { %2772 = sbr.rel (%p4237_p6) target bundleno = 641 (0x281), region = 257  ;;  %s2773_s0 = sshrl.u32 (!%p4237_p6), %s7370_s13, 3 }
 0x247   : > { %s7381_s26 = sshrl.u32 (!%p4237_p6), %s2773_s0, 6 }
 0x248   : > { %p4238_p7 = scmp.le.s32.totalorder (!%p4237_p6), %s7381_s26, 0 }
 0x24b   : > { %3961 = sbr.rel (%p4238_p7) target bundleno = 625 (0x271), region = 669  ;;  %s8146_s9 = smov (!%p4238_p7), %s7368_s10 }
 0x24c   : > { %s8147_s5 = smov (!%p4238_p7), %s7357_s20  ;;  %s7390_s27 = smov (!%p4238_p7), 0  }
 0x24d   : > { %s7392_s12 = smov (!%p4238_p7), 0  }
 0x250 LB: >> { %v2786_v54 = vld [vmem:[%s5588_s5] sm:$0xff]  ;;  %v2788_v18 = vld [vmem:[%s5588_s5 + $0x8] sm:$0xff]  ;;  %v2790_v44 = vld [vmem:[%s5588_s5 + $0x10] sm:$0xff]  ;;  %s2914_s25 = sadd.s32 1, %s5592_s27  ;;  %s2780_s12 = sadd.s32 1, %s5596_s12   ;;  %s5596_s12 = sphi %s7392_s12, %s2780_s12   ;;  %s5592_s27 = sphi %s7390_s27, %s8150_s27   ;;  %s5588_s5 = sphi %s8147_s5, %s8149_s5   ;;  %s5584_s9 = sphi %s8146_s9, %s8148_s9  }
 0x251   : >> { %2787 = vst [vmem:[%s5584_s9] sm:$0xff] %v2786_v54  ;;  %2789 = vst [vmem:[%s5584_s9 + $0x8] sm:$0xff] %v2788_v18  ;;  %v2792_v39 = vld [vmem:[%s5588_s5 + $0x18] sm:$0xff]  ;;  %v2794_v30 = vld [vmem:[%s5588_s5 + $0x20] sm:$0xff]  ;;  %p2915_p4 = scmp.ge.s32.totalorder %s2914_s25, %s7381_s26  ;;  %p2779_p8 = scmp.ge.s32.totalorder %s2780_s12, %s7381_s26 }
 0x252   : >> { %2791 = vst [vmem:[%s5584_s9 + $0x10] sm:$0xff] %v2790_v44  ;;  %v2796_v22 = vld [vmem:[%s5588_s5 + $0x28] sm:$0xff]  ;;  %2793 = vst [vmem:[%s5584_s9 + $0x18] sm:$0xff] %v2792_v39  ;;  %v2798_v1 = vld [vmem:[%s5588_s5 + $0x30] sm:$0xff] }
 0x253   : >> { %2795 = vst [vmem:[%s5584_s9 + $0x20] sm:$0xff] %v2794_v30  ;;  %2797 = vst [vmem:[%s5584_s9 + $0x28] sm:$0xff] %v2796_v22  ;;  %v2800_v47 = vld [vmem:[%s5588_s5 + $0x38] sm:$0xff]  ;;  %v2802_v53 = vld [vmem:[%s5588_s5 + $0x40] sm:$0xff]  ;;  %s8202_s25 = smov (%p2915_p4, %s2914_s25), 0 }
 0x254   : >> { %2799 = vst [vmem:[%s5584_s9 + $0x30] sm:$0xff] %v2798_v1  ;;  %2801 = vst [vmem:[%s5584_s9 + $0x38] sm:$0xff] %v2800_v47  ;;  %v2804_v11 = vld [vmem:[%s5588_s5 + $0x48] sm:$0xff]  ;;  %v2806_v45 = vld [vmem:[%s5588_s5 + $0x50] sm:$0xff]  ;;  %s4239_s17 = sshll.u32 %s8202_s25, 9  ;;  %s8150_s27 = smov %s8202_s25 }
 0x255   : >> { %2803 = vst [vmem:[%s5584_s9 + $0x40] sm:$0xff] %v2802_v53  ;;  %v2808_v42 = vld [vmem:[%s5588_s5 + $0x58] sm:$0xff]  ;;  %2805 = vst [vmem:[%s5584_s9 + $0x48] sm:$0xff] %v2804_v11  ;;  %v2810_v5 = vld [vmem:[%s5588_s5 + $0x60] sm:$0xff]  ;;  %s7448_s15 = scalar_lea.vmem %s7357_s20, %s4239_s17 [#allocation5]   ;;  %s7451_s23 = scalar_lea.vmem %s7368_s10, %s4239_s17  }
 0x256   : >> { %2807 = vst [vmem:[%s5584_s9 + $0x50] sm:$0xff] %v2806_v45  ;;  %2809 = vst [vmem:[%s5584_s9 + $0x58] sm:$0xff] %v2808_v42  ;;  %v2812_v7 = vld [vmem:[%s5588_s5 + $0x68] sm:$0xff]  ;;  %v2814_v24 = vld [vmem:[%s5588_s5 + $0x70] sm:$0xff] }
 0x257   : >> { %2811 = vst [vmem:[%s5584_s9 + $0x60] sm:$0xff] %v2810_v5  ;;  %2813 = vst [vmem:[%s5584_s9 + $0x68] sm:$0xff] %v2812_v7  ;;  %v2816_v59 = vld [vmem:[%s5588_s5 + $0x78] sm:$0xff]  ;;  %v2818_v40 = vld [vmem:[%s5588_s5 + $0x80] sm:$0xff] }
 0x258   : >> { %2815 = vst [vmem:[%s5584_s9 + $0x70] sm:$0xff] %v2814_v24  ;;  %v2820_v16 = vld [vmem:[%s5588_s5 + $0x88] sm:$0xff]  ;;  %2817 = vst [vmem:[%s5584_s9 + $0x78] sm:$0xff] %v2816_v59  ;;  %v2822_v35 = vld [vmem:[%s5588_s5 + $0x90] sm:$0xff] }
 0x259   : >> { %2819 = vst [vmem:[%s5584_s9 + $0x80] sm:$0xff] %v2818_v40  ;;  %2821 = vst [vmem:[%s5584_s9 + $0x88] sm:$0xff] %v2820_v16  ;;  %v2824_v58 = vld [vmem:[%s5588_s5 + $0x98] sm:$0xff]  ;;  %v2826_v25 = vld [vmem:[%s5588_s5 + $0xa0] sm:$0xff] }
 0x25a   : >> { %2823 = vst [vmem:[%s5584_s9 + $0x90] sm:$0xff] %v2822_v35  ;;  %2825 = vst [vmem:[%s5584_s9 + $0x98] sm:$0xff] %v2824_v58  ;;  %v2828_v55 = vld [vmem:[%s5588_s5 + $0xa8] sm:$0xff]  ;;  %v2830_v60 = vld [vmem:[%s5588_s5 + $0xb0] sm:$0xff] }
 0x25b   : >> { %2827 = vst [vmem:[%s5584_s9 + $0xa0] sm:$0xff] %v2826_v25  ;;  %v2832_v29 = vld [vmem:[%s5588_s5 + $0xb8] sm:$0xff]  ;;  %2829 = vst [vmem:[%s5584_s9 + $0xa8] sm:$0xff] %v2828_v55  ;;  %v2834_v36 = vld [vmem:[%s5588_s5 + $0xc0] sm:$0xff] }
 0x25c   : >> { %2831 = vst [vmem:[%s5584_s9 + $0xb0] sm:$0xff] %v2830_v60  ;;  %2833 = vst [vmem:[%s5584_s9 + $0xb8] sm:$0xff] %v2832_v29  ;;  %v2836_v49 = vld [vmem:[%s5588_s5 + $0xc8] sm:$0xff]  ;;  %v2838_v62 = vld [vmem:[%s5588_s5 + $0xd0] sm:$0xff] }
 0x25d   : >> { %2835 = vst [vmem:[%s5584_s9 + $0xc0] sm:$0xff] %v2834_v36  ;;  %2837 = vst [vmem:[%s5584_s9 + $0xc8] sm:$0xff] %v2836_v49  ;;  %v2840_v14 = vld [vmem:[%s5588_s5 + $0xd8] sm:$0xff]  ;;  %v2842_v26 = vld [vmem:[%s5588_s5 + $0xe0] sm:$0xff] }
 0x25e   : >> { %2839 = vst [vmem:[%s5584_s9 + $0xd0] sm:$0xff] %v2838_v62  ;;  %v2844_v10 = vld [vmem:[%s5588_s5 + $0xe8] sm:$0xff]  ;;  %2841 = vst [vmem:[%s5584_s9 + $0xd8] sm:$0xff] %v2840_v14  ;;  %v2846_v23 = vld [vmem:[%s5588_s5 + $0xf0] sm:$0xff] }
 0x25f   : >> { %2843 = vst [vmem:[%s5584_s9 + $0xe0] sm:$0xff] %v2842_v26  ;;  %2845 = vst [vmem:[%s5584_s9 + $0xe8] sm:$0xff] %v2844_v10  ;;  %v2848_v4 = vld [vmem:[%s5588_s5 + $0xf8] sm:$0xff]  ;;  %v2850_v37 = vld [vmem:[%s5588_s5 + $0x100] sm:$0xff] }
 0x260   : >> { %2847 = vst [vmem:[%s5584_s9 + $0xf0] sm:$0xff] %v2846_v23  ;;  %2849 = vst [vmem:[%s5584_s9 + $0xf8] sm:$0xff] %v2848_v4  ;;  %v2852_v6 = vld [vmem:[%s5588_s5 + $0x108] sm:$0xff]  ;;  %v2854_v19 = vld [vmem:[%s5588_s5 + $0x110] sm:$0xff] }
 0x261   : >> { %2851 = vst [vmem:[%s5584_s9 + $0x100] sm:$0xff] %v2850_v37  ;;  %v2856_v3 = vld [vmem:[%s5588_s5 + $0x118] sm:$0xff]  ;;  %2853 = vst [vmem:[%s5584_s9 + $0x108] sm:$0xff] %v2852_v6  ;;  %v2858_v20 = vld [vmem:[%s5588_s5 + $0x120] sm:$0xff] }
 0x262   : >> { %2855 = vst [vmem:[%s5584_s9 + $0x110] sm:$0xff] %v2854_v19  ;;  %2857 = vst [vmem:[%s5584_s9 + $0x118] sm:$0xff] %v2856_v3  ;;  %v2860_v28 = vld [vmem:[%s5588_s5 + $0x128] sm:$0xff]  ;;  %v2862_v13 = vld [vmem:[%s5588_s5 + $0x130] sm:$0xff] }
 0x263   : >> { %2859 = vst [vmem:[%s5584_s9 + $0x120] sm:$0xff] %v2858_v20  ;;  %2861 = vst [vmem:[%s5584_s9 + $0x128] sm:$0xff] %v2860_v28  ;;  %v2864_v31 = vld [vmem:[%s5588_s5 + $0x138] sm:$0xff]  ;;  %v2866_v46 = vld [vmem:[%s5588_s5 + $0x140] sm:$0xff] }
 0x264   : >> { %2863 = vst [vmem:[%s5584_s9 + $0x130] sm:$0xff] %v2862_v13  ;;  %v2868_v15 = vld [vmem:[%s5588_s5 + $0x148] sm:$0xff]  ;;  %2865 = vst [vmem:[%s5584_s9 + $0x138] sm:$0xff] %v2864_v31  ;;  %v2870_v0 = vld [vmem:[%s5588_s5 + $0x150] sm:$0xff] }
 0x265   : >> { %2867 = vst [vmem:[%s5584_s9 + $0x140] sm:$0xff] %v2866_v46  ;;  %2869 = vst [vmem:[%s5584_s9 + $0x148] sm:$0xff] %v2868_v15  ;;  %v2872_v32 = vld [vmem:[%s5588_s5 + $0x158] sm:$0xff]  ;;  %v2874_v51 = vld [vmem:[%s5588_s5 + $0x160] sm:$0xff] }
 0x266   : >> { %2871 = vst [vmem:[%s5584_s9 + $0x150] sm:$0xff] %v2870_v0  ;;  %2873 = vst [vmem:[%s5584_s9 + $0x158] sm:$0xff] %v2872_v32  ;;  %v2876_v38 = vld [vmem:[%s5588_s5 + $0x168] sm:$0xff]  ;;  %v2878_v8 = vld [vmem:[%s5588_s5 + $0x170] sm:$0xff] }
 0x267   : >> { %2875 = vst [vmem:[%s5584_s9 + $0x160] sm:$0xff] %v2874_v51  ;;  %v2880_v33 = vld [vmem:[%s5588_s5 + $0x178] sm:$0xff]  ;;  %2877 = vst [vmem:[%s5584_s9 + $0x168] sm:$0xff] %v2876_v38  ;;  %v2882_v12 = vld [vmem:[%s5588_s5 + $0x180] sm:$0xff] }
 0x268   : >> { %2879 = vst [vmem:[%s5584_s9 + $0x170] sm:$0xff] %v2878_v8  ;;  %2881 = vst [vmem:[%s5584_s9 + $0x178] sm:$0xff] %v2880_v33  ;;  %v2884_v43 = vld [vmem:[%s5588_s5 + $0x188] sm:$0xff]  ;;  %v2886_v21 = vld [vmem:[%s5588_s5 + $0x190] sm:$0xff] }
 0x269   : >> { %2883 = vst [vmem:[%s5584_s9 + $0x180] sm:$0xff] %v2882_v12  ;;  %2885 = vst [vmem:[%s5584_s9 + $0x188] sm:$0xff] %v2884_v43  ;;  %v2888_v2 = vld [vmem:[%s5588_s5 + $0x198] sm:$0xff]  ;;  %v2890_v61 = vld [vmem:[%s5588_s5 + $0x1a0] sm:$0xff] }
 0x26a   : >> { %2887 = vst [vmem:[%s5584_s9 + $0x190] sm:$0xff] %v2886_v21  ;;  %v2892_v34 = vld [vmem:[%s5588_s5 + $0x1a8] sm:$0xff]  ;;  %2889 = vst [vmem:[%s5584_s9 + $0x198] sm:$0xff] %v2888_v2  ;;  %v2894_v63 = vld [vmem:[%s5588_s5 + $0x1b0] sm:$0xff] }
 0x26b   : >> { %2891 = vst [vmem:[%s5584_s9 + $0x1a0] sm:$0xff] %v2890_v61  ;;  %2893 = vst [vmem:[%s5584_s9 + $0x1a8] sm:$0xff] %v2892_v34  ;;  %v2896_v48 = vld [vmem:[%s5588_s5 + $0x1b8] sm:$0xff]  ;;  %v2898_v52 = vld [vmem:[%s5588_s5 + $0x1c0] sm:$0xff] }
 0x26c   : >> { %2895 = vst [vmem:[%s5584_s9 + $0x1b0] sm:$0xff] %v2894_v63  ;;  %2897 = vst [vmem:[%s5584_s9 + $0x1b8] sm:$0xff] %v2896_v48  ;;  %v2900_v57 = vld [vmem:[%s5588_s5 + $0x1c8] sm:$0xff]  ;;  %v2902_v50 = vld [vmem:[%s5588_s5 + $0x1d0] sm:$0xff]  ;;  %2782 = sbr.rel (!%p2779_p8) target bundleno = 592 (0x250), region = 675 }
 0x26d   : >> { %2899 = vst [vmem:[%s5584_s9 + $0x1c0] sm:$0xff] %v2898_v52  ;;  %v2904_v9 = vld [vmem:[%s5588_s5 + $0x1d8] sm:$0xff]  ;;  %2901 = vst [vmem:[%s5584_s9 + $0x1c8] sm:$0xff] %v2900_v57  ;;  %v2906_v56 = vld [vmem:[%s5588_s5 + $0x1e0] sm:$0xff] }
 0x26e   : >> { %2903 = vst [vmem:[%s5584_s9 + $0x1d0] sm:$0xff] %v2902_v50  ;;  %2905 = vst [vmem:[%s5584_s9 + $0x1d8] sm:$0xff] %v2904_v9  ;;  %v2908_v17 = vld [vmem:[%s5588_s5 + $0x1e8] sm:$0xff]  ;;  %v2910_v27 = vld [vmem:[%s5588_s5 + $0x1f0] sm:$0xff] }
 0x26f   : >> { %2907 = vst [vmem:[%s5584_s9 + $0x1e0] sm:$0xff] %v2906_v56  ;;  %2909 = vst [vmem:[%s5584_s9 + $0x1e8] sm:$0xff] %v2908_v17  ;;  %v2912_v41 = vld [vmem:[%s5588_s5 + $0x1f8] sm:$0xff]  ;;  %s8149_s5 = smov %s7448_s15 }
 0x270   : >> { %2911 = vst [vmem:[%s5584_s9 + $0x1f0] sm:$0xff] %v2910_v27  ;;  %2913 = vst [vmem:[%s5584_s9 + $0x1f8] sm:$0xff] %v2912_v41  ;;  %s8148_s9 = smov %s7451_s23 }
 0x271 PF: > { %s7557_s29 = sand.u32 63, %s2773_s0   ;;  %s4305_s8 = sshll.u32 %s7381_s26, 13 }
 0x272   : > { %s2925_s6 = sshra.s32 %s4305_s8, 4  ;;  %p4244_p9 = scmp.le.s32.totalorder %s7557_s29, 0 }
 0x273   : > { %s2926_s28 = scalar_lea.vmem %s7357_s20, %s2925_s6 [#allocation5]   ;;  %s2929_s21 = scalar_lea.vmem %s7368_s10, %s2925_s6  }
 0x274   : > { %3975 = sbr.rel (%p4244_p9) target bundleno = 641 (0x281), region = 680  ;;  %s5598_s30 = smov (!%p4244_p9), %s2929_s21  }
 0x275   : > { %s5602_s14 = smov (!%p4244_p9), %s2926_s28   ;;  %s5606_s25 = smov (!%p4244_p9), 0  }
 0x276   : > { %s5610_s12 = smov (!%p4244_p9), 0  }
 0x279 LB: >> { %v2941_v54 = vld [vmem:[%s5604_s14] sm:$0xff]  ;;  %s2943_s0 = sadd.s32 1, %s5608_s25  ;;  %s2935_s12 = sadd.s32 1, %s5612_s12   ;;  %s5612_s12 = sphi %s5610_s12, %s2935_s12   ;;  %s5608_s25 = sphi %s5606_s25, %s5607_s25   ;;  %s5604_s14 = sphi %s5602_s14, %s2948_s14   ;;  %s5600_s30 = sphi %s5598_s30, %s2949_s30  }
 0x27a   : >> { %2942 = vst [vmem:[%s5600_s30] sm:$0xff] %v2941_v54  ;;  %p2944_p10 = scmp.ge.s32.totalorder %s2943_s0, %s7557_s29  ;;  %p2934_p11 = scmp.ge.s32.totalorder %s2935_s12, %s7557_s29 }
 0x27c   : >> { %s8204_s0 = smov (%p2944_p10, %s2943_s0), 0  ;;  %2937 = sbr.rel (!%p2934_p11) target bundleno = 633 (0x279), region = 686 }
 0x27d   : >> { %s4245_s26 = sshll.u32 %s8204_s0, 3  ;;  %s5607_s25 = smov %s8204_s0  }
 0x27e   : >> { %s2948_s14 = scalar_lea.vmem %s2926_s28, %s4245_s26 [#allocation5]   ;;  %s2949_s30 = scalar_lea.vmem %s2929_s21, %s4245_s26  }
 0x281 PF: > { %2952 = sbr.rel (%p2769_p3) target bundleno = 705 (0x2c1), region = 275  ;;  %s7569_s9 = ssub.s32 (!%p2769_p3), %s7370_s13, %s7374_s7 }
 0x282   : > { %s2958_s5 = sshrl.u32 (!%p2769_p3), %s7370_s13, 3  ;;  %s2955_s27 = scalar_lea.vmem (!%p2769_p3), %s7357_s20, %s7569_s9 [#allocation5] }
 0x283   : > { %s2957_s17 = scalar_lea.vmem (!%p2769_p3), %s7368_s10, %s7569_s9  ;;  %s7578_s15 = sshrl.u32 (!%p2769_p3), %s2958_s5, 6 }
 0x284   : > { %p4247_p12 = scmp.le.s32.totalorder (!%p2769_p3), %s7578_s15, 0 }
 0x286   : > { %3989 = sbr.rel (%p4247_p12) target bundleno = 684 (0x2ac), region = 691  ;;  %s8151_s23 = smov (!%p4247_p12), %s7368_s10 }
 0x287   : > { %s8152_s29 = smov (!%p4247_p12), %s7357_s20  ;;  %s7587_s8 = smov (!%p4247_p12), 0  }
 0x288   : > { %s7589_s6 = smov (!%p4247_p12), 0  }
 0x28b LB: >> { %v2971_v18 = vld [vmem:[%s5620_s29] sm:$0xff]  ;;  %v2973_v44 = vld [vmem:[%s5620_s29 + $0x8] sm:$0xff]  ;;  %v2975_v39 = vld [vmem:[%s5620_s29 + $0x10] sm:$0xff]  ;;  %s3099_s28 = sadd.s32 1, %s5624_s8  ;;  %s2965_s6 = sadd.s32 1, %s5628_s6   ;;  %s5628_s6 = sphi %s7589_s6, %s2965_s6   ;;  %s5624_s8 = sphi %s7587_s8, %s8155_s8   ;;  %s5620_s29 = sphi %s8152_s29, %s8154_s29   ;;  %s5616_s23 = sphi %s8151_s23, %s8153_s23  }
 0x28c   : >> { %2972 = vst [vmem:[%s5616_s23] sm:$0xff] %v2971_v18  ;;  %2974 = vst [vmem:[%s5616_s23 + $0x8] sm:$0xff] %v2973_v44  ;;  %v2977_v30 = vld [vmem:[%s5620_s29 + $0x18] sm:$0xff]  ;;  %v2979_v22 = vld [vmem:[%s5620_s29 + $0x20] sm:$0xff]  ;;  %p3100_p13 = scmp.ge.s32.totalorder %s3099_s28, %s7578_s15  ;;  %p2964_p0 = scmp.ge.s32.totalorder %s2965_s6, %s7578_s15 }
 0x28d   : >> { %2976 = vst [vmem:[%s5616_s23 + $0x10] sm:$0xff] %v2975_v39  ;;  %v2981_v1 = vld [vmem:[%s5620_s29 + $0x28] sm:$0xff]  ;;  %2978 = vst [vmem:[%s5616_s23 + $0x18] sm:$0xff] %v2977_v30  ;;  %v2983_v47 = vld [vmem:[%s5620_s29 + $0x30] sm:$0xff] }
 0x28e   : >> { %2980 = vst [vmem:[%s5616_s23 + $0x20] sm:$0xff] %v2979_v22  ;;  %2982 = vst [vmem:[%s5616_s23 + $0x28] sm:$0xff] %v2981_v1  ;;  %v2985_v53 = vld [vmem:[%s5620_s29 + $0x38] sm:$0xff]  ;;  %v2987_v11 = vld [vmem:[%s5620_s29 + $0x40] sm:$0xff]  ;;  %s8206_s28 = smov (%p3100_p13, %s3099_s28), 0 }
 0x28f   : >> { %2984 = vst [vmem:[%s5616_s23 + $0x30] sm:$0xff] %v2983_v47  ;;  %2986 = vst [vmem:[%s5616_s23 + $0x38] sm:$0xff] %v2985_v53  ;;  %v2989_v45 = vld [vmem:[%s5620_s29 + $0x48] sm:$0xff]  ;;  %v2991_v42 = vld [vmem:[%s5620_s29 + $0x50] sm:$0xff]  ;;  %s4248_s21 = sshll.u32 %s8206_s28, 9  ;;  %s8155_s8 = smov %s8206_s28 }
 0x290   : >> { %2988 = vst [vmem:[%s5616_s23 + $0x40] sm:$0xff] %v2987_v11  ;;  %v2993_v5 = vld [vmem:[%s5620_s29 + $0x58] sm:$0xff]  ;;  %2990 = vst [vmem:[%s5616_s23 + $0x48] sm:$0xff] %v2989_v45  ;;  %v2995_v7 = vld [vmem:[%s5620_s29 + $0x60] sm:$0xff]  ;;  %s7645_s30 = scalar_lea.vmem %s7357_s20, %s4248_s21 [#allocation5]   ;;  %s7648_s14 = scalar_lea.vmem %s7368_s10, %s4248_s21  }
 0x291   : >> { %2992 = vst [vmem:[%s5616_s23 + $0x50] sm:$0xff] %v2991_v42  ;;  %2994 = vst [vmem:[%s5616_s23 + $0x58] sm:$0xff] %v2993_v5  ;;  %v2997_v24 = vld [vmem:[%s5620_s29 + $0x68] sm:$0xff]  ;;  %v2999_v59 = vld [vmem:[%s5620_s29 + $0x70] sm:$0xff] }
 0x292   : >> { %2996 = vst [vmem:[%s5616_s23 + $0x60] sm:$0xff] %v2995_v7  ;;  %2998 = vst [vmem:[%s5616_s23 + $0x68] sm:$0xff] %v2997_v24  ;;  %v3001_v40 = vld [vmem:[%s5620_s29 + $0x78] sm:$0xff]  ;;  %v3003_v16 = vld [vmem:[%s5620_s29 + $0x80] sm:$0xff] }
 0x293   : >> { %3000 = vst [vmem:[%s5616_s23 + $0x70] sm:$0xff] %v2999_v59  ;;  %v3005_v35 = vld [vmem:[%s5620_s29 + $0x88] sm:$0xff]  ;;  %3002 = vst [vmem:[%s5616_s23 + $0x78] sm:$0xff] %v3001_v40  ;;  %v3007_v58 = vld [vmem:[%s5620_s29 + $0x90] sm:$0xff] }
 0x294   : >> { %3004 = vst [vmem:[%s5616_s23 + $0x80] sm:$0xff] %v3003_v16  ;;  %3006 = vst [vmem:[%s5616_s23 + $0x88] sm:$0xff] %v3005_v35  ;;  %v3009_v25 = vld [vmem:[%s5620_s29 + $0x98] sm:$0xff]  ;;  %v3011_v55 = vld [vmem:[%s5620_s29 + $0xa0] sm:$0xff] }
 0x295   : >> { %3008 = vst [vmem:[%s5616_s23 + $0x90] sm:$0xff] %v3007_v58  ;;  %3010 = vst [vmem:[%s5616_s23 + $0x98] sm:$0xff] %v3009_v25  ;;  %v3013_v60 = vld [vmem:[%s5620_s29 + $0xa8] sm:$0xff]  ;;  %v3015_v29 = vld [vmem:[%s5620_s29 + $0xb0] sm:$0xff] }
 0x296   : >> { %3012 = vst [vmem:[%s5616_s23 + $0xa0] sm:$0xff] %v3011_v55  ;;  %v3017_v36 = vld [vmem:[%s5620_s29 + $0xb8] sm:$0xff]  ;;  %3014 = vst [vmem:[%s5616_s23 + $0xa8] sm:$0xff] %v3013_v60  ;;  %v3019_v49 = vld [vmem:[%s5620_s29 + $0xc0] sm:$0xff] }
 0x297   : >> { %3016 = vst [vmem:[%s5616_s23 + $0xb0] sm:$0xff] %v3015_v29  ;;  %3018 = vst [vmem:[%s5616_s23 + $0xb8] sm:$0xff] %v3017_v36  ;;  %v3021_v62 = vld [vmem:[%s5620_s29 + $0xc8] sm:$0xff]  ;;  %v3023_v14 = vld [vmem:[%s5620_s29 + $0xd0] sm:$0xff] }
 0x298   : >> { %3020 = vst [vmem:[%s5616_s23 + $0xc0] sm:$0xff] %v3019_v49  ;;  %3022 = vst [vmem:[%s5616_s23 + $0xc8] sm:$0xff] %v3021_v62  ;;  %v3025_v26 = vld [vmem:[%s5620_s29 + $0xd8] sm:$0xff]  ;;  %v3027_v10 = vld [vmem:[%s5620_s29 + $0xe0] sm:$0xff] }
 0x299   : >> { %3024 = vst [vmem:[%s5616_s23 + $0xd0] sm:$0xff] %v3023_v14  ;;  %v3029_v23 = vld [vmem:[%s5620_s29 + $0xe8] sm:$0xff]  ;;  %3026 = vst [vmem:[%s5616_s23 + $0xd8] sm:$0xff] %v3025_v26  ;;  %v3031_v4 = vld [vmem:[%s5620_s29 + $0xf0] sm:$0xff] }
 0x29a   : >> { %3028 = vst [vmem:[%s5616_s23 + $0xe0] sm:$0xff] %v3027_v10  ;;  %3030 = vst [vmem:[%s5616_s23 + $0xe8] sm:$0xff] %v3029_v23  ;;  %v3033_v37 = vld [vmem:[%s5620_s29 + $0xf8] sm:$0xff]  ;;  %v3035_v6 = vld [vmem:[%s5620_s29 + $0x100] sm:$0xff] }
 0x29b   : >> { %3032 = vst [vmem:[%s5616_s23 + $0xf0] sm:$0xff] %v3031_v4  ;;  %3034 = vst [vmem:[%s5616_s23 + $0xf8] sm:$0xff] %v3033_v37  ;;  %v3037_v19 = vld [vmem:[%s5620_s29 + $0x108] sm:$0xff]  ;;  %v3039_v3 = vld [vmem:[%s5620_s29 + $0x110] sm:$0xff] }
 0x29c   : >> { %3036 = vst [vmem:[%s5616_s23 + $0x100] sm:$0xff] %v3035_v6  ;;  %v3041_v20 = vld [vmem:[%s5620_s29 + $0x118] sm:$0xff]  ;;  %3038 = vst [vmem:[%s5616_s23 + $0x108] sm:$0xff] %v3037_v19  ;;  %v3043_v28 = vld [vmem:[%s5620_s29 + $0x120] sm:$0xff] }
 0x29d   : >> { %3040 = vst [vmem:[%s5616_s23 + $0x110] sm:$0xff] %v3039_v3  ;;  %3042 = vst [vmem:[%s5616_s23 + $0x118] sm:$0xff] %v3041_v20  ;;  %v3045_v13 = vld [vmem:[%s5620_s29 + $0x128] sm:$0xff]  ;;  %v3047_v31 = vld [vmem:[%s5620_s29 + $0x130] sm:$0xff] }
 0x29e   : >> { %3044 = vst [vmem:[%s5616_s23 + $0x120] sm:$0xff] %v3043_v28  ;;  %3046 = vst [vmem:[%s5616_s23 + $0x128] sm:$0xff] %v3045_v13  ;;  %v3049_v46 = vld [vmem:[%s5620_s29 + $0x138] sm:$0xff]  ;;  %v3051_v15 = vld [vmem:[%s5620_s29 + $0x140] sm:$0xff] }
 0x29f   : >> { %3048 = vst [vmem:[%s5616_s23 + $0x130] sm:$0xff] %v3047_v31  ;;  %v3053_v0 = vld [vmem:[%s5620_s29 + $0x148] sm:$0xff]  ;;  %3050 = vst [vmem:[%s5616_s23 + $0x138] sm:$0xff] %v3049_v46  ;;  %v3055_v32 = vld [vmem:[%s5620_s29 + $0x150] sm:$0xff] }
 0x2a0   : >> { %3052 = vst [vmem:[%s5616_s23 + $0x140] sm:$0xff] %v3051_v15  ;;  %3054 = vst [vmem:[%s5616_s23 + $0x148] sm:$0xff] %v3053_v0  ;;  %v3057_v51 = vld [vmem:[%s5620_s29 + $0x158] sm:$0xff]  ;;  %v3059_v38 = vld [vmem:[%s5620_s29 + $0x160] sm:$0xff] }
 0x2a1   : >> { %3056 = vst [vmem:[%s5616_s23 + $0x150] sm:$0xff] %v3055_v32  ;;  %3058 = vst [vmem:[%s5616_s23 + $0x158] sm:$0xff] %v3057_v51  ;;  %v3061_v8 = vld [vmem:[%s5620_s29 + $0x168] sm:$0xff]  ;;  %v3063_v33 = vld [vmem:[%s5620_s29 + $0x170] sm:$0xff] }
 0x2a2   : >> { %3060 = vst [vmem:[%s5616_s23 + $0x160] sm:$0xff] %v3059_v38  ;;  %v3065_v12 = vld [vmem:[%s5620_s29 + $0x178] sm:$0xff]  ;;  %3062 = vst [vmem:[%s5616_s23 + $0x168] sm:$0xff] %v3061_v8  ;;  %v3067_v43 = vld [vmem:[%s5620_s29 + $0x180] sm:$0xff] }
 0x2a3   : >> { %3064 = vst [vmem:[%s5616_s23 + $0x170] sm:$0xff] %v3063_v33  ;;  %3066 = vst [vmem:[%s5616_s23 + $0x178] sm:$0xff] %v3065_v12  ;;  %v3069_v21 = vld [vmem:[%s5620_s29 + $0x188] sm:$0xff]  ;;  %v3071_v2 = vld [vmem:[%s5620_s29 + $0x190] sm:$0xff] }
 0x2a4   : >> { %3068 = vst [vmem:[%s5616_s23 + $0x180] sm:$0xff] %v3067_v43  ;;  %3070 = vst [vmem:[%s5616_s23 + $0x188] sm:$0xff] %v3069_v21  ;;  %v3073_v61 = vld [vmem:[%s5620_s29 + $0x198] sm:$0xff]  ;;  %v3075_v34 = vld [vmem:[%s5620_s29 + $0x1a0] sm:$0xff] }
 0x2a5   : >> { %3072 = vst [vmem:[%s5616_s23 + $0x190] sm:$0xff] %v3071_v2  ;;  %v3077_v63 = vld [vmem:[%s5620_s29 + $0x1a8] sm:$0xff]  ;;  %3074 = vst [vmem:[%s5616_s23 + $0x198] sm:$0xff] %v3073_v61  ;;  %v3079_v48 = vld [vmem:[%s5620_s29 + $0x1b0] sm:$0xff] }
 0x2a6   : >> { %3076 = vst [vmem:[%s5616_s23 + $0x1a0] sm:$0xff] %v3075_v34  ;;  %3078 = vst [vmem:[%s5616_s23 + $0x1a8] sm:$0xff] %v3077_v63  ;;  %v3081_v52 = vld [vmem:[%s5620_s29 + $0x1b8] sm:$0xff]  ;;  %v3083_v57 = vld [vmem:[%s5620_s29 + $0x1c0] sm:$0xff] }
 0x2a7   : >> { %3080 = vst [vmem:[%s5616_s23 + $0x1b0] sm:$0xff] %v3079_v48  ;;  %3082 = vst [vmem:[%s5616_s23 + $0x1b8] sm:$0xff] %v3081_v52  ;;  %v3085_v50 = vld [vmem:[%s5620_s29 + $0x1c8] sm:$0xff]  ;;  %v3087_v9 = vld [vmem:[%s5620_s29 + $0x1d0] sm:$0xff]  ;;  %2967 = sbr.rel (!%p2964_p0) target bundleno = 651 (0x28b), region = 697 }
 0x2a8   : >> { %3084 = vst [vmem:[%s5616_s23 + $0x1c0] sm:$0xff] %v3083_v57  ;;  %v3089_v56 = vld [vmem:[%s5620_s29 + $0x1d8] sm:$0xff]  ;;  %3086 = vst [vmem:[%s5616_s23 + $0x1c8] sm:$0xff] %v3085_v50  ;;  %v3091_v17 = vld [vmem:[%s5620_s29 + $0x1e0] sm:$0xff] }
 0x2a9   : >> { %3088 = vst [vmem:[%s5616_s23 + $0x1d0] sm:$0xff] %v3087_v9  ;;  %3090 = vst [vmem:[%s5616_s23 + $0x1d8] sm:$0xff] %v3089_v56  ;;  %v3093_v27 = vld [vmem:[%s5620_s29 + $0x1e8] sm:$0xff]  ;;  %v3095_v41 = vld [vmem:[%s5620_s29 + $0x1f0] sm:$0xff] }
 0x2aa   : >> { %3092 = vst [vmem:[%s5616_s23 + $0x1e0] sm:$0xff] %v3091_v17  ;;  %3094 = vst [vmem:[%s5616_s23 + $0x1e8] sm:$0xff] %v3093_v27  ;;  %v3097_v54 = vld [vmem:[%s5620_s29 + $0x1f8] sm:$0xff]  ;;  %s8154_s29 = smov %s7645_s30 }
 0x2ab   : >> { %3096 = vst [vmem:[%s5616_s23 + $0x1f0] sm:$0xff] %v3095_v41  ;;  %3098 = vst [vmem:[%s5616_s23 + $0x1f8] sm:$0xff] %v3097_v54  ;;  %s8153_s23 = smov %s7648_s14 }
 0x2ac PF: > { %s7754_s25 = sand.u32 63, %s2958_s5   ;;  %s4307_s12 = sshll.u32 %s7578_s15, 13 }
 0x2ad   : > { %s3110_s0 = sshra.s32 %s4307_s12, 4  ;;  %p4253_p1 = scmp.le.s32.totalorder %s7754_s25, 0 }
 0x2ae   : > { %s3111_s26 = scalar_lea.vmem %s7357_s20, %s3110_s0 [#allocation5]   ;;  %s3114_s21 = scalar_lea.vmem %s7368_s10, %s3110_s0  }
 0x2af   : > { %4003 = sbr.rel (%p4253_p1) target bundleno = 700 (0x2bc), region = 702  ;;  %s5630_s30 = smov (!%p4253_p1), %s3114_s21  }
 0x2b0   : > { %s5634_s28 = smov (!%p4253_p1), %s3111_s26   ;;  %s5638_s14 = smov (!%p4253_p1), 0  }
 0x2b1   : > { %s5642_s6 = smov (!%p4253_p1), 0  }
 0x2b4 LB: >> { %v3126_v18 = vld [vmem:[%s5636_s28] sm:$0xff]  ;;  %s3128_s5 = sadd.s32 1, %s5640_s14  ;;  %s3120_s6 = sadd.s32 1, %s5644_s6   ;;  %s5644_s6 = sphi %s5642_s6, %s3120_s6   ;;  %s5640_s14 = sphi %s5638_s14, %s5639_s14   ;;  %s5636_s28 = sphi %s5634_s28, %s3133_s28   ;;  %s5632_s30 = sphi %s5630_s30, %s3134_s30  }
 0x2b5   : >> { %3127 = vst [vmem:[%s5632_s30] sm:$0xff] %v3126_v18  ;;  %p3129_p2 = scmp.ge.s32.totalorder %s3128_s5, %s7754_s25  ;;  %p3119_p3 = scmp.ge.s32.totalorder %s3120_s6, %s7754_s25 }
 0x2b7   : >> { %s8208_s5 = smov (%p3129_p2, %s3128_s5), 0  ;;  %3122 = sbr.rel (!%p3119_p3) target bundleno = 692 (0x2b4), region = 708 }
 0x2b8   : >> { %s4254_s15 = sshll.u32 %s8208_s5, 3  ;;  %s5639_s14 = smov %s8208_s5  }
 0x2b9   : >> { %s3133_s28 = scalar_lea.vmem %s3111_s26, %s4254_s15 [#allocation5]   ;;  %s3134_s30 = scalar_lea.vmem %s3114_s21, %s4254_s15  }
 0x2bc PF: > { %s5717_s23 = smov 1  }
 0x2bd   : > { %s3135_s29 = sshll.u32 %s5717_s23, %s7374_s7 }
 0x2be   : > { %s4256_s8 = sadd.s32 4294967295, %s3135_s29 }
 0x2bf   : > { %v3145_v44 = vld [vmem:[%s2955_s27] sm:%s4256_s8] }
 0x2c0   : > { %3146 = vst [vmem:[%s2957_s17] sm:%s4256_s8] %v3145_v44 }
 0x2c1 PF: > { %p4257_p6 = scmp.ge.u32.totalorder %s7370_s13, 8 }
 0x2c2   : > { %s5718_s12 = smov (!%p4257_p6), 1  }
 0x2c3   : > { %2755 = sbr.rel (%p4257_p6) target bundleno = 714 (0x2ca), region = 246  ;;  %s2756_s25 = sshll.u32 (!%p4257_p6), %s5718_s12, %s7370_s13 }
 0x2c4   : > { %s4258_s0 = sadd.s32 (!%p4257_p6), 4294967295, %s2756_s25 }
 0x2c8   : > { %v2766_v39 = vld [vmem:[%s7357_s20] sm:%s4258_s0] }
 0x2c9   : > { %2767 = vst [vmem:[%s7368_s10] sm:%s4258_s0] %v2766_v39 }
 0x2ca PF: > { %3150 = sbr.rel (!%p5781_p5) target bundleno = 837 (0x345), region = 300  ;;  %s4259_s7 = sshll.u32 (%p5781_p5), %s5762_s18, 1 }
 0x2cb   : > { %s4309_s9 = sshll.u32 (%p5781_p5), %s5762_s18, 4  ;;  %s3152_s27 = ssub.s32 (%p5781_p5), 3, %s4259_s7 }
 0x2cc   : > { %s7780_s21 = scalar_lea.vmem (%p5781_p5), %s8083_s4, %s4309_s9   ;;  %p3153_p7 = scmp.lt.s32.totalorder (%p5781_p5), %s3152_s27, 2 }
 0x2cf   : > { %s8210_s27 = smov (!%p3153_p7, %s3152_s27), 2 }
 0x2d0   : > { %s4260_s20 = sshll.u32 %s8210_s27, 8  ;;  %s7782_s10 = sshll.u32 %s8210_s27, 3 }
 0x2d1   : > { %p4264_p4 = scmp.eq.s32.totalorder %s4260_s20, 0 }
 0x2d2   : > { %p3163_p8 = scmp.lt.u32.totalorder (!%p4264_p4), %s7782_s10, 8 }
 0x2d3   : > { %3162 = sbr.rel (%p4264_p4) target bundleno = 837 (0x345), region = 304 }
 0x2d8   : > { %3166 = sbr.rel (%p3163_p8) target bundleno = 828 (0x33c), region = 308  ;;  %s7786_s24 = sand.u32 (!%p3163_p8), 7, %s7782_s10  }
 0x2d9   : > { %p3185_p5 = scmp.eq.s32.totalorder (!%p3163_p8), %s7786_s24, 0  ;;  %p4265_p9 = scmp.ne.s32.totalorder (!%p3163_p8), %s7786_s24, 0 }
 0x2dd   : > { %3188 = sbr.rel (%p4265_p9) target bundleno = 778 (0x30a), region = 323  ;;  %s3189_s18 = sshrl.u32 (!%p4265_p9), %s7782_s10, 3 }
 0x2de   : > { %s7793_s13 = sshrl.u32 (!%p4265_p9), %s3189_s18, 5 }
 0x2df   : > { %p4266_p10 = scmp.le.s32.totalorder (!%p4265_p9), %s7793_s13, 0 }
 0x2e2   : > { %4017 = sbr.rel (%p4266_p10) target bundleno = 762 (0x2fa), region = 713  ;;  %s8156_s30 = smov (!%p4266_p10), %s7780_s21 }
 0x2e3   : > { %s8157_s28 = smov (!%p4266_p10), %s7145_s11  ;;  %s7802_s14 = smov (!%p4266_p10), 0  }
 0x2e4   : > { %s7804_s6 = smov (!%p4266_p10), 0  }
 0x2e7 LB: >> { %v3202_v30 = vld [vmem:[%s5652_s28] sm:$0xff]  ;;  %v3204_v22 = vld [vmem:[%s5652_s28 + $0x8] sm:$0xff]  ;;  %v3206_v1 = vld [vmem:[%s5652_s28 + $0x10] sm:$0xff]  ;;  %s3330_s5 = sadd.s32 1, %s5656_s14  ;;  %s3196_s6 = sadd.s32 1, %s5660_s6   ;;  %s5660_s6 = sphi %s7804_s6, %s3196_s6   ;;  %s5656_s14 = sphi %s7802_s14, %s8160_s14   ;;  %s5652_s28 = sphi %s8157_s28, %s8159_s28   ;;  %s5648_s30 = sphi %s8156_s30, %s8158_s30  }
 0x2e8   : >> { %3203 = vst [vmem:[%s5648_s30] sm:$0xff] %v3202_v30  ;;  %3205 = vst [vmem:[%s5648_s30 + $0x8] sm:$0xff] %v3204_v22  ;;  %v3268_v47 = vld [vmem:[%s5652_s28 + $0x18] sm:$0xff]  ;;  %v3270_v53 = vld [vmem:[%s5652_s28 + $0x20] sm:$0xff]  ;;  %p3331_p11 = scmp.ge.s32.totalorder %s3330_s5, %s7793_s13  ;;  %p3195_p12 = scmp.ge.s32.totalorder %s3196_s6, %s7793_s13 }
 0x2e9   : >> { %3207 = vst [vmem:[%s5648_s30 + $0x10] sm:$0xff] %v3206_v1  ;;  %3267 = vst [vmem:[%s5648_s30 + $0x18] sm:$0xff] %v3206_v1  ;;  %v3272_v11 = vld [vmem:[%s5652_s28 + $0x28] sm:$0xff]  ;;  %v3274_v45 = vld [vmem:[%s5652_s28 + $0x30] sm:$0xff] }
 0x2ea   : >> { %3269 = vst [vmem:[%s5648_s30 + $0x20] sm:$0xff] %v3268_v47  ;;  %3271 = vst [vmem:[%s5648_s30 + $0x28] sm:$0xff] %v3270_v53  ;;  %v3276_v42 = vld [vmem:[%s5652_s28 + $0x38] sm:$0xff]  ;;  %v3278_v5 = vld [vmem:[%s5652_s28 + $0x40] sm:$0xff]  ;;  %s8212_s5 = smov (%p3331_p11, %s3330_s5), 0 }
 0x2eb   : >> { %3273 = vst [vmem:[%s5648_s30 + $0x30] sm:$0xff] %v3272_v11  ;;  %3275 = vst [vmem:[%s5648_s30 + $0x38] sm:$0xff] %v3274_v45  ;;  %v3280_v7 = vld [vmem:[%s5652_s28 + $0x48] sm:$0xff]  ;;  %v3282_v24 = vld [vmem:[%s5652_s28 + $0x50] sm:$0xff]  ;;  %s4267_s15 = sshll.u32 %s8212_s5, 8  ;;  %s8160_s14 = smov %s8212_s5 }
 0x2ec   : >> { %3277 = vst [vmem:[%s5648_s30 + $0x40] sm:$0xff] %v3276_v42  ;;  %3279 = vst [vmem:[%s5648_s30 + $0x48] sm:$0xff] %v3278_v5  ;;  %v3284_v59 = vld [vmem:[%s5652_s28 + $0x58] sm:$0xff]  ;;  %v3286_v40 = vld [vmem:[%s5652_s28 + $0x60] sm:$0xff]  ;;  %s3335_s23 = scalar_lea.vmem %s7145_s11, %s4267_s15 [#allocation6]   ;;  %s3336_s29 = scalar_lea.vmem %s7780_s21, %s4267_s15  }
 0x2ed   : >> { %3281 = vst [vmem:[%s5648_s30 + $0x50] sm:$0xff] %v3280_v7  ;;  %3283 = vst [vmem:[%s5648_s30 + $0x58] sm:$0xff] %v3282_v24  ;;  %v3288_v16 = vld [vmem:[%s5652_s28 + $0x68] sm:$0xff]  ;;  %v3290_v35 = vld [vmem:[%s5652_s28 + $0x70] sm:$0xff] }
 0x2ee   : >> { %3285 = vst [vmem:[%s5648_s30 + $0x60] sm:$0xff] %v3284_v59  ;;  %3287 = vst [vmem:[%s5648_s30 + $0x68] sm:$0xff] %v3286_v40  ;;  %v3292_v58 = vld [vmem:[%s5652_s28 + $0x78] sm:$0xff]  ;;  %v3294_v25 = vld [vmem:[%s5652_s28 + $0x80] sm:$0xff] }
 0x2ef   : >> { %3289 = vst [vmem:[%s5648_s30 + $0x70] sm:$0xff] %v3288_v16  ;;  %3291 = vst [vmem:[%s5648_s30 + $0x78] sm:$0xff] %v3290_v35  ;;  %v3296_v55 = vld [vmem:[%s5652_s28 + $0x88] sm:$0xff]  ;;  %v3298_v60 = vld [vmem:[%s5652_s28 + $0x90] sm:$0xff] }
 0x2f0   : >> { %3293 = vst [vmem:[%s5648_s30 + $0x80] sm:$0xff] %v3292_v58  ;;  %3295 = vst [vmem:[%s5648_s30 + $0x88] sm:$0xff] %v3294_v25  ;;  %v3300_v29 = vld [vmem:[%s5652_s28 + $0x98] sm:$0xff]  ;;  %v3302_v36 = vld [vmem:[%s5652_s28 + $0xa0] sm:$0xff] }
 0x2f1   : >> { %3297 = vst [vmem:[%s5648_s30 + $0x90] sm:$0xff] %v3296_v55  ;;  %3299 = vst [vmem:[%s5648_s30 + $0x98] sm:$0xff] %v3298_v60  ;;  %v3304_v49 = vld [vmem:[%s5652_s28 + $0xa8] sm:$0xff]  ;;  %v3306_v62 = vld [vmem:[%s5652_s28 + $0xb0] sm:$0xff] }
 0x2f2   : >> { %3301 = vst [vmem:[%s5648_s30 + $0xa0] sm:$0xff] %v3300_v29  ;;  %3303 = vst [vmem:[%s5648_s30 + $0xa8] sm:$0xff] %v3302_v36  ;;  %v3308_v14 = vld [vmem:[%s5652_s28 + $0xb8] sm:$0xff]  ;;  %v3310_v26 = vld [vmem:[%s5652_s28 + $0xc0] sm:$0xff] }
 0x2f3   : >> { %3305 = vst [vmem:[%s5648_s30 + $0xb0] sm:$0xff] %v3304_v49  ;;  %3307 = vst [vmem:[%s5648_s30 + $0xb8] sm:$0xff] %v3306_v62  ;;  %v3312_v10 = vld [vmem:[%s5652_s28 + $0xc8] sm:$0xff]  ;;  %v3314_v23 = vld [vmem:[%s5652_s28 + $0xd0] sm:$0xff] }
 0x2f4   : >> { %3309 = vst [vmem:[%s5648_s30 + $0xc0] sm:$0xff] %v3308_v14  ;;  %3311 = vst [vmem:[%s5648_s30 + $0xc8] sm:$0xff] %v3310_v26  ;;  %v3316_v4 = vld [vmem:[%s5652_s28 + $0xd8] sm:$0xff]  ;;  %v3318_v37 = vld [vmem:[%s5652_s28 + $0xe0] sm:$0xff] }
 0x2f5   : >> { %3313 = vst [vmem:[%s5648_s30 + $0xd0] sm:$0xff] %v3312_v10  ;;  %3315 = vst [vmem:[%s5648_s30 + $0xd8] sm:$0xff] %v3314_v23  ;;  %v3320_v6 = vld [vmem:[%s5652_s28 + $0xe8] sm:$0xff]  ;;  %v3322_v19 = vld [vmem:[%s5652_s28 + $0xf0] sm:$0xff]  ;;  %3198 = sbr.rel (!%p3195_p12) target bundleno = 743 (0x2e7), region = 719 }
 0x2f6   : >> { %3317 = vst [vmem:[%s5648_s30 + $0xe0] sm:$0xff] %v3316_v4  ;;  %3319 = vst [vmem:[%s5648_s30 + $0xe8] sm:$0xff] %v3318_v37  ;;  %v3324_v3 = vld [vmem:[%s5652_s28 + $0xf8] sm:$0xff]  ;;  %v3326_v20 = vld [vmem:[%s5652_s28 + $0x100] sm:$0xff] }
 0x2f7   : >> { %3321 = vst [vmem:[%s5648_s30 + $0xf0] sm:$0xff] %v3320_v6  ;;  %3323 = vst [vmem:[%s5648_s30 + $0xf8] sm:$0xff] %v3322_v19  ;;  %v3328_v28 = vld [vmem:[%s5652_s28 + $0x108] sm:$0xff]  ;;  %s8159_s28 = smov %s3335_s23 }
 0x2f8   : >> { %3325 = vst [vmem:[%s5648_s30 + $0x100] sm:$0xff] %v3324_v3  ;;  %3327 = vst [vmem:[%s5648_s30 + $0x108] sm:$0xff] %v3326_v20 }
 0x2f9   : >> { %3329 = vst [vmem:[%s5648_s30 + $0x110] sm:$0xff] %v3328_v28  ;;  %s8158_s30 = smov %s3336_s29 }
 0x2fa PF: > { %s7907_s8 = sand.u32 31, %s3189_s18   ;;  %s4310_s12 = sshll.u32 %s7793_s13, 12 }
 0x2fb   : > { %s3341_s25 = sshra.s32 %s4310_s12, 4  ;;  %p4272_p13 = scmp.le.s32.totalorder %s7907_s8, 0 }
 0x2fc   : > { %s7911_s0 = scalar_lea.vmem %s7145_s11, %s3341_s25 [#allocation6]   ;;  %s3345_s7 = scalar_lea.vmem %s7780_s21, %s3341_s25  }
 0x2fd   : > { %4031 = sbr.rel (%p4272_p13) target bundleno = 778 (0x30a), region = 724  ;;  %s5662_s9 = smov (!%p4272_p13), %s3345_s7  }
 0x2fe   : > { %s5666_s27 = smov (!%p4272_p13), %s7911_s0   ;;  %s5670_s17 = smov (!%p4272_p13), 0  }
 0x2ff   : > { %s5674_s26 = smov (!%p4272_p13), 0  }
 0x302 LB: >> { %v3357_v13 = vld [vmem:[%s5668_s27] sm:$0xff]  ;;  %v3359_v31 = vld [vmem:[%s5668_s27 + $0x10] sm:$0xff]  ;;  %s3361_s20 = sadd.s32 1, %s5672_s17  ;;  %s3351_s26 = sadd.s32 1, %s5676_s26   ;;  %s5676_s26 = sphi %s5674_s26, %s3351_s26   ;;  %s5672_s17 = sphi %s5670_s17, %s5671_s17   ;;  %s5668_s27 = sphi %s5666_s27, %s3366_s27   ;;  %s5664_s9 = sphi %s5662_s9, %s3367_s9  }
 0x303   : >> { %3358 = vst [vmem:[%s5664_s9] sm:$0xff] %v3357_v13  ;;  %3360 = vst [vmem:[%s5664_s9 + $0x18] sm:$0xff] %v3359_v31  ;;  %p3362_p0 = scmp.ge.s32.totalorder %s3361_s20, %s7907_s8  ;;  %p3350_p1 = scmp.ge.s32.totalorder %s3351_s26, %s7907_s8 }
 0x305   : >> { %s8214_s20 = smov (%p3362_p0, %s3361_s20), 0  ;;  %3353 = sbr.rel (!%p3350_p1) target bundleno = 770 (0x302), region = 730 }
 0x306   : >> { %s4273_s18 = sshll.u32 %s8214_s20, 3  ;;  %s5671_s17 = smov %s8214_s20  }
 0x307   : >> { %s3366_s27 = scalar_lea.vmem %s7911_s0, %s4273_s18 [#allocation6]   ;;  %s3367_s9 = scalar_lea.vmem %s3345_s7, %s4273_s18  }
 0x30a PF: > { %3370 = sbr.rel (%p3185_p5) target bundleno = 828 (0x33c), region = 341  ;;  %s3372_s13 = ssub.s32 (!%p3185_p5), %s7782_s10, %s7786_s24 }
 0x30b   : > { %s3376_s30 = sshrl.u32 (!%p3185_p5), %s7782_s10, 3  ;;  %s7925_s28 = scalar_lea.vmem (!%p3185_p5), %s7145_s11, %s3372_s13 [#allocation6] }
 0x30c   : > { %s7928_s14 = scalar_lea.vmem (!%p3185_p5), %s7780_s21, %s3372_s13  ;;  %s7932_s6 = sshrl.u32 (!%p3185_p5), %s3376_s30, 5 }
 0x30d   : > { %p4275_p2 = scmp.le.s32.totalorder (!%p3185_p5), %s7932_s6, 0 }
 0x30f   : > { %4045 = sbr.rel (%p4275_p2) target bundleno = 807 (0x327), region = 735  ;;  %s8161_s5 = smov (!%p4275_p2), %s7780_s21 }
 0x310   : > { %s8162_s15 = smov (!%p4275_p2), %s7145_s11  ;;  %s7941_s23 = smov (!%p4275_p2), 0  }
 0x311   : > { %s7943_s29 = smov (!%p4275_p2), 0  }
 0x314 LB: >> { %v3389_v46 = vld [vmem:[%s5684_s15] sm:$0xff]  ;;  %v3391_v15 = vld [vmem:[%s5684_s15 + $0x8] sm:$0xff]  ;;  %v3393_v0 = vld [vmem:[%s5684_s15 + $0x10] sm:$0xff]  ;;  %s3517_s8 = sadd.s32 1, %s5688_s23  ;;  %s3383_s29 = sadd.s32 1, %s5692_s29   ;;  %s5692_s29 = sphi %s7943_s29, %s3383_s29   ;;  %s5688_s23 = sphi %s7941_s23, %s8165_s23   ;;  %s5684_s15 = sphi %s8162_s15, %s8164_s15   ;;  %s5680_s5 = sphi %s8161_s5, %s8163_s5  }
 0x315   : >> { %3390 = vst [vmem:[%s5680_s5] sm:$0xff] %v3389_v46  ;;  %3392 = vst [vmem:[%s5680_s5 + $0x8] sm:$0xff] %v3391_v15  ;;  %v3455_v32 = vld [vmem:[%s5684_s15 + $0x18] sm:$0xff]  ;;  %v3457_v51 = vld [vmem:[%s5684_s15 + $0x20] sm:$0xff]  ;;  %p3518_p3 = scmp.ge.s32.totalorder %s3517_s8, %s7932_s6  ;;  %p3382_p6 = scmp.ge.s32.totalorder %s3383_s29, %s7932_s6 }
 0x316   : >> { %3394 = vst [vmem:[%s5680_s5 + $0x10] sm:$0xff] %v3393_v0  ;;  %3454 = vst [vmem:[%s5680_s5 + $0x18] sm:$0xff] %v3393_v0  ;;  %v3459_v38 = vld [vmem:[%s5684_s15 + $0x28] sm:$0xff]  ;;  %v3461_v8 = vld [vmem:[%s5684_s15 + $0x30] sm:$0xff] }
 0x317   : >> { %3456 = vst [vmem:[%s5680_s5 + $0x20] sm:$0xff] %v3455_v32  ;;  %3458 = vst [vmem:[%s5680_s5 + $0x28] sm:$0xff] %v3457_v51  ;;  %v3463_v33 = vld [vmem:[%s5684_s15 + $0x38] sm:$0xff]  ;;  %v3465_v12 = vld [vmem:[%s5684_s15 + $0x40] sm:$0xff]  ;;  %s8216_s8 = smov (%p3518_p3, %s3517_s8), 0 }
 0x318   : >> { %3460 = vst [vmem:[%s5680_s5 + $0x30] sm:$0xff] %v3459_v38  ;;  %3462 = vst [vmem:[%s5680_s5 + $0x38] sm:$0xff] %v3461_v8  ;;  %v3467_v43 = vld [vmem:[%s5684_s15 + $0x48] sm:$0xff]  ;;  %v3469_v21 = vld [vmem:[%s5684_s15 + $0x50] sm:$0xff]  ;;  %s4276_s12 = sshll.u32 %s8216_s8, 8  ;;  %s8165_s23 = smov %s8216_s8 }
 0x319   : >> { %3464 = vst [vmem:[%s5680_s5 + $0x40] sm:$0xff] %v3463_v33  ;;  %3466 = vst [vmem:[%s5680_s5 + $0x48] sm:$0xff] %v3465_v12  ;;  %v3471_v2 = vld [vmem:[%s5684_s15 + $0x58] sm:$0xff]  ;;  %v3473_v61 = vld [vmem:[%s5684_s15 + $0x60] sm:$0xff]  ;;  %s3522_s25 = scalar_lea.vmem %s7145_s11, %s4276_s12 [#allocation6]   ;;  %s3523_s0 = scalar_lea.vmem %s7780_s21, %s4276_s12  }
 0x31a   : >> { %3468 = vst [vmem:[%s5680_s5 + $0x50] sm:$0xff] %v3467_v43  ;;  %3470 = vst [vmem:[%s5680_s5 + $0x58] sm:$0xff] %v3469_v21  ;;  %v3475_v34 = vld [vmem:[%s5684_s15 + $0x68] sm:$0xff]  ;;  %v3477_v63 = vld [vmem:[%s5684_s15 + $0x70] sm:$0xff] }
 0x31b   : >> { %3472 = vst [vmem:[%s5680_s5 + $0x60] sm:$0xff] %v3471_v2  ;;  %3474 = vst [vmem:[%s5680_s5 + $0x68] sm:$0xff] %v3473_v61  ;;  %v3479_v48 = vld [vmem:[%s5684_s15 + $0x78] sm:$0xff]  ;;  %v3481_v52 = vld [vmem:[%s5684_s15 + $0x80] sm:$0xff] }
 0x31c   : >> { %3476 = vst [vmem:[%s5680_s5 + $0x70] sm:$0xff] %v3475_v34  ;;  %3478 = vst [vmem:[%s5680_s5 + $0x78] sm:$0xff] %v3477_v63  ;;  %v3483_v57 = vld [vmem:[%s5684_s15 + $0x88] sm:$0xff]  ;;  %v3485_v50 = vld [vmem:[%s5684_s15 + $0x90] sm:$0xff] }
 0x31d   : >> { %3480 = vst [vmem:[%s5680_s5 + $0x80] sm:$0xff] %v3479_v48  ;;  %3482 = vst [vmem:[%s5680_s5 + $0x88] sm:$0xff] %v3481_v52  ;;  %v3487_v9 = vld [vmem:[%s5684_s15 + $0x98] sm:$0xff]  ;;  %v3489_v56 = vld [vmem:[%s5684_s15 + $0xa0] sm:$0xff] }
 0x31e   : >> { %3484 = vst [vmem:[%s5680_s5 + $0x90] sm:$0xff] %v3483_v57  ;;  %3486 = vst [vmem:[%s5680_s5 + $0x98] sm:$0xff] %v3485_v50  ;;  %v3491_v17 = vld [vmem:[%s5684_s15 + $0xa8] sm:$0xff]  ;;  %v3493_v27 = vld [vmem:[%s5684_s15 + $0xb0] sm:$0xff] }
 0x31f   : >> { %3488 = vst [vmem:[%s5680_s5 + $0xa0] sm:$0xff] %v3487_v9  ;;  %3490 = vst [vmem:[%s5680_s5 + $0xa8] sm:$0xff] %v3489_v56  ;;  %v3495_v41 = vld [vmem:[%s5684_s15 + $0xb8] sm:$0xff]  ;;  %v3497_v54 = vld [vmem:[%s5684_s15 + $0xc0] sm:$0xff] }
 0x320   : >> { %3492 = vst [vmem:[%s5680_s5 + $0xb0] sm:$0xff] %v3491_v17  ;;  %3494 = vst [vmem:[%s5680_s5 + $0xb8] sm:$0xff] %v3493_v27  ;;  %v3499_v18 = vld [vmem:[%s5684_s15 + $0xc8] sm:$0xff]  ;;  %v3501_v44 = vld [vmem:[%s5684_s15 + $0xd0] sm:$0xff] }
 0x321   : >> { %3496 = vst [vmem:[%s5680_s5 + $0xc0] sm:$0xff] %v3495_v41  ;;  %3498 = vst [vmem:[%s5680_s5 + $0xc8] sm:$0xff] %v3497_v54  ;;  %v3503_v39 = vld [vmem:[%s5684_s15 + $0xd8] sm:$0xff]  ;;  %v3505_v30 = vld [vmem:[%s5684_s15 + $0xe0] sm:$0xff] }
 0x322   : >> { %3500 = vst [vmem:[%s5680_s5 + $0xd0] sm:$0xff] %v3499_v18  ;;  %3502 = vst [vmem:[%s5680_s5 + $0xd8] sm:$0xff] %v3501_v44  ;;  %v3507_v22 = vld [vmem:[%s5684_s15 + $0xe8] sm:$0xff]  ;;  %v3509_v1 = vld [vmem:[%s5684_s15 + $0xf0] sm:$0xff]  ;;  %3385 = sbr.rel (!%p3382_p6) target bundleno = 788 (0x314), region = 741 }
 0x323   : >> { %3504 = vst [vmem:[%s5680_s5 + $0xe0] sm:$0xff] %v3503_v39  ;;  %3506 = vst [vmem:[%s5680_s5 + $0xe8] sm:$0xff] %v3505_v30  ;;  %v3511_v47 = vld [vmem:[%s5684_s15 + $0xf8] sm:$0xff]  ;;  %v3513_v53 = vld [vmem:[%s5684_s15 + $0x100] sm:$0xff] }
 0x324   : >> { %3508 = vst [vmem:[%s5680_s5 + $0xf0] sm:$0xff] %v3507_v22  ;;  %3510 = vst [vmem:[%s5680_s5 + $0xf8] sm:$0xff] %v3509_v1  ;;  %v3515_v11 = vld [vmem:[%s5684_s15 + $0x108] sm:$0xff]  ;;  %s8164_s15 = smov %s3522_s25 }
 0x325   : >> { %3512 = vst [vmem:[%s5680_s5 + $0x100] sm:$0xff] %v3511_v47  ;;  %3514 = vst [vmem:[%s5680_s5 + $0x108] sm:$0xff] %v3513_v53 }
 0x326   : >> { %3516 = vst [vmem:[%s5680_s5 + $0x110] sm:$0xff] %v3515_v11  ;;  %s8163_s5 = smov %s3523_s0 }
 0x327 PF: > { %s8046_s7 = sand.u32 31, %s3376_s30   ;;  %s4312_s9 = sshll.u32 %s7932_s6, 12 }
 0x328   : > { %s3528_s27 = sshra.s32 %s4312_s9, 4  ;;  %p4281_p7 = scmp.le.s32.totalorder %s8046_s7, 0 }
 0x329   : > { %s8050_s17 = scalar_lea.vmem %s7145_s11, %s3528_s27 [#allocation6]   ;;  %s3532_s26 = scalar_lea.vmem %s7780_s21, %s3528_s27  }
 0x32a   : > { %4059 = sbr.rel (%p4281_p7) target bundleno = 823 (0x337), region = 746  ;;  %s5694_s20 = smov (!%p4281_p7), %s3532_s26  }
 0x32b   : > { %s5698_s18 = smov (!%p4281_p7), %s8050_s17   ;;  %s5702_s13 = smov (!%p4281_p7), 0  }
 0x32c   : > { %s5706_s5 = smov (!%p4281_p7), 0  }
 0x32f LB: >> { %v3544_v45 = vld [vmem:[%s5700_s18] sm:$0xff]  ;;  %v3546_v42 = vld [vmem:[%s5700_s18 + $0x10] sm:$0xff]  ;;  %s3548_s30 = sadd.s32 1, %s5704_s13  ;;  %s3538_s5 = sadd.s32 1, %s5708_s5   ;;  %s5708_s5 = sphi %s5706_s5, %s3538_s5   ;;  %s5704_s13 = sphi %s5702_s13, %s5703_s13   ;;  %s5700_s18 = sphi %s5698_s18, %s3553_s18   ;;  %s5696_s20 = sphi %s5694_s20, %s3554_s20  }
 0x330   : >> { %3545 = vst [vmem:[%s5696_s20] sm:$0xff] %v3544_v45  ;;  %3547 = vst [vmem:[%s5696_s20 + $0x18] sm:$0xff] %v3546_v42  ;;  %p3549_p4 = scmp.ge.s32.totalorder %s3548_s30, %s8046_s7  ;;  %p3537_p8 = scmp.ge.s32.totalorder %s3538_s5, %s8046_s7 }
 0x332   : >> { %s8218_s30 = smov (%p3549_p4, %s3548_s30), 0  ;;  %3540 = sbr.rel (!%p3537_p8) target bundleno = 815 (0x32f), region = 752 }
 0x333   : >> { %s4282_s6 = sshll.u32 %s8218_s30, 3  ;;  %s5703_s13 = smov %s8218_s30  }
 0x334   : >> { %s3553_s18 = scalar_lea.vmem %s8050_s17, %s4282_s6 [#allocation6]   ;;  %s3554_s20 = scalar_lea.vmem %s3532_s26, %s4282_s6  }
 0x337 PF: > { %s5719_s15 = smov 1  }
 0x338   : > { %s3555_s23 = sshll.u32 %s5719_s15, %s7786_s24 }
 0x339   : > { %s4284_s29 = sadd.s32 4294967295, %s3555_s23 }
 0x33a   : > { %v3565_v5 = vld [vmem:[%s7925_s28] sm:%s4284_s29]  ;;  %v3567_v7 = vld [vmem:[%s7925_s28 + $0x10] sm:%s4284_s29] }
 0x33b   : > { %3566 = vst [vmem:[%s7928_s14] sm:%s4284_s29] %v3565_v5  ;;  %3568 = vst [vmem:[%s7928_s14 + $0x18] sm:%s4284_s29] %v3567_v7 }
 0x33c PF: > { %p4285_p5 = scmp.ge.u32.totalorder %s7782_s10, 8 }
 0x33d   : > { %s5720_s8 = smov (!%p4285_p5), 1  }
 0x33e   : > { %3169 = sbr.rel (%p4285_p5) target bundleno = 837 (0x345), region = 312  ;;  %s3170_s12 = sshll.u32 (!%p4285_p5), %s5720_s8, %s7782_s10 }
 0x33f   : > { %s4286_s25 = sadd.s32 (!%p4285_p5), 4294967295, %s3170_s12 }
 0x343   : > { %v3180_v24 = vld [vmem:[%s7145_s11] sm:%s4286_s25]  ;;  %v3182_v59 = vld [vmem:[%s7145_s11 + $0x10] sm:%s4286_s25] }
 0x344   : > { %3181 = vst [vmem:[%s7780_s21] sm:%s4286_s25] %v3180_v24  ;;  %3183 = vst [vmem:[%s7780_s21 + $0x18] sm:%s4286_s25] %v3182_v59 }
 0x345 PF: > { %p12_p9 = scmp.ge.s32.totalorder %s5765_s19, 4   ;;  %s8166_s15 = smov %s5384_s16 }
 0x346   : > { %s8167_s16 = smov %s5775_s22  ;;  %s8168_s17 = smov %s5765_s19 }
 0x347   :  { %14 = sbr.rel (!%p12_p9) target bundleno = 4 (0x4), region = 763 }

</bundles_post_ra>
